<compile_context>
chip_gen: v6e
topology: v6e:2x2x1
jax: 0.10.0
libtpu: 0.0.40
codegen_flags: <defaults>
</compile_context>

<pallas_src>
import functools

import jax
import jax.numpy as jnp
from jax.experimental import pallas as pl
from jax.experimental.pallas import tpu as pltpu

_EPS = 1e-5  # PyTorch BatchNorm3d default


# ---------------------------------------------------------------------------
# Pallas kernels
# ---------------------------------------------------------------------------
def _conv_stats_kernel(p_ref, w_ref, y_ref, s_ref, q_ref):
    """im2col GEMM tile + per-tile partial BN statistics (sum, sum of squares)."""
    y = jnp.dot(p_ref[...], w_ref[...], preferred_element_type=jnp.float32)
    y_ref[...] = y
    s_ref[...] = jnp.sum(y, axis=0, keepdims=True)[None]          # (1, 1, C)
    q_ref[...] = jnp.sum(y * y, axis=0, keepdims=True)[None]      # (1, 1, C)


def _conv_bnin_stats_kernel(p_ref, cs_ref, ch_ref, w_ref, y_ref, s_ref, q_ref,
                            *, tm, m_valid, need_mask):
    """Same as above, but the *previous* layer's BatchNorm + ReLU is fused into
    the patch-load path: per-column scale/shift (tiled per kernel tap) + ReLU
    are applied to the raw patches before the MXU dot."""
    a = jnp.maximum(p_ref[...] * cs_ref[...] + ch_ref[...], 0.0)
    if need_mask:
        # Zero out padded rows so they contribute nothing to output/statistics.
        row = pl.program_id(0) * tm + jax.lax.broadcasted_iota(
            jnp.int32, (tm, 1), 0)
        a = jnp.where(row < m_valid, a, 0.0)
    y = jnp.dot(a, w_ref[...], preferred_element_type=jnp.float32)
    y_ref[...] = y
    s_ref[...] = jnp.sum(y, axis=0, keepdims=True)[None]
    q_ref[...] = jnp.sum(y * y, axis=0, keepdims=True)[None]


def _bn_relu_kernel(y_ref, s_ref, b_ref, o_ref):
    """Fused batch-norm affine + ReLU on a lane-dense (rows, 128) view."""
    o_ref[...] = jnp.maximum(y_ref[...] * s_ref[...] + b_ref[...], 0.0)


# ---------------------------------------------------------------------------
# Tiling helpers
# ---------------------------------------------------------------------------
def _round_up(x, m):
    return ((x + m - 1) // m) * m


def _choose_rows(m, row_bytes, cap_rows=512, block_bytes=2 * 1024 * 1024):
    """Row tile for the GEMM: prefer a multiple-of-8 divisor of m (no padding),
    bounded by a VMEM byte budget per block (conservative across v5e/v6e/v7x);
    otherwise pad m up to a multiple of the capped tile."""
    cap = max(8, min(cap_rows, block_bytes // max(row_bytes, 1)))
    cap -= cap % 8
    cap = max(cap, 8)
    t = min(cap, m - (m % 8)) if m >= 8 else 0
    while t >= 8:
        if m % t == 0:
            return t, m
        t -= 8
    return cap, _round_up(m, cap)


def _choose_div(m, cap):
    """Largest multiple-of-8 divisor of m that is <= cap, else the full extent."""
    t = min(cap, m - (m % 8)) if m >= 8 else 0
    while t >= 8:
        if m % t == 0:
            return t
        t -= 8
    return m


# ---------------------------------------------------------------------------
# Pallas wrappers
# ---------------------------------------------------------------------------
def _conv_gemm_stats(patches, w_mat, tm, *, col_scale=None, col_shift=None,
                     m_valid=None):
    """Conv-as-GEMM with fused per-tile partial BN statistics.

    Returns (y, partial_sum, partial_sq) where y is (M_pad, C) and the partials
    are (num_tiles, 1, C)."""
    mp, k = patches.shape
    c = w_mat.shape[1]
    grid = mp // tm
    out_shape = (
        jax.ShapeDtypeStruct((mp, c), jnp.float32),
        jax.ShapeDtypeStruct((grid, 1, c), jnp.float32),
        jax.ShapeDtypeStruct((grid, 1, c), jnp.float32),
    )
    out_specs = (
        pl.BlockSpec((tm, c), lambda i: (i, 0)),
        pl.BlockSpec((1, 1, c), lambda i: (i, 0, 0)),
        pl.BlockSpec((1, 1, c), lambda i: (i, 0, 0)),
    )
    if col_scale is None:
        kernel = _conv_stats_kernel
        in_specs = [
            pl.BlockSpec((tm, k), lambda i: (i, 0)),
            pl.BlockSpec((k, c), lambda i: (0, 0)),      # weights stay resident
        ]
        args = (patches, w_mat)
    else:
        need_mask = (m_valid is not None) and (m_valid < mp)
        kernel = functools.partial(_conv_bnin_stats_kernel, tm=tm,
                                   m_valid=m_valid, need_mask=need_mask)
        in_specs = [
            pl.BlockSpec((tm, k), lambda i: (i, 0)),
            pl.BlockSpec((1, k), lambda i: (0, 0)),
            pl.BlockSpec((1, k), lambda i: (0, 0)),
            pl.BlockSpec((k, c), lambda i: (0, 0)),
        ]
        args = (patches, col_scale.reshape(1, k), col_shift.reshape(1, k), w_mat)

    return pl.pallas_call(
        kernel,
        out_shape=out_shape,
        grid=(grid,),
        in_specs=in_specs,
        out_specs=out_specs,
        compiler_params=pltpu.CompilerParams(dimension_semantics=("parallel",)),
    )(*args)


def _bn_relu_folded(y, scale, shift):
    """Fused BN affine + ReLU over a lane-dense folded view of (M_pad, C)."""
    mp, c = y.shape
    f = 1
    if 128 % c == 0:
        f = 128 // c
        while f > 1 and mp % f != 0:
            f //= 2
    lanes = f * c
    mf = mp // f
    yf = y.reshape(mf, lanes)                       # contiguous: pure relabel
    sf = jnp.tile(scale, f).reshape(1, lanes)
    bf = jnp.tile(shift, f).reshape(1, lanes)
    tmf = _choose_div(mf, 1024)
    out = pl.pallas_call(
        _bn_relu_kernel,
        out_shape=jax.ShapeDtypeStruct((mf, lanes), jnp.float32),
        grid=(mf // tmf,),
        in_specs=[
            pl.BlockSpec((tmf, lanes), lambda i: (i, 0)),
            pl.BlockSpec((1, lanes), lambda i: (0, 0)),
            pl.BlockSpec((1, lanes), lambda i: (0, 0)),
        ],
        out_specs=pl.BlockSpec((tmf, lanes), lambda i: (i, 0)),
        compiler_params=pltpu.CompilerParams(dimension_semantics=("parallel",)),
    )(yf, sf, bf)
    return out.reshape(mp, c)


# ---------------------------------------------------------------------------
# JAX glue
# ---------------------------------------------------------------------------
def _im2col_3d(x_ndhwc, ksize, stride, pad, pad_value=None):
    """im2col for 3-D conv on channels-last input.  pad_value (per-channel) lets
    the caller pad with a value whose fused-BN image is exactly zero."""
    n, d, h, w, c = x_ndhwc.shape
    if pad > 0:
        widths = ((0, 0), (pad, pad), (pad, pad), (pad, pad), (0, 0))
        if pad_value is None:
            xp = jnp.pad(x_ndhwc, widths)
        else:
            v = pad_value.reshape(1, 1, 1, 1, c)
            xp = jnp.pad(x_ndhwc - v, widths) + v
    else:
        xp = x_ndhwc
    do = (d + 2 * pad - ksize) // stride + 1
    ho = (h + 2 * pad - ksize) // stride + 1
    wo = (w + 2 * pad - ksize) // stride + 1
    cols = []
    for kd in range(ksize):
        for kh in range(ksize):
            for kw in range(ksize):
                cols.append(
                    xp[:, kd:kd + stride * do:stride,
                          kh:kh + stride * ho:stride,
                          kw:kw + stride * wo:stride, :])
    patches = jnp.concatenate(cols, axis=-1)  # col idx = tap*C + c_in
    return patches.reshape(n * do * ho * wo, ksize ** 3 * c), (n, do, ho, wo)


def _bn_coeffs(psum, psq, m, gamma, beta, eps=_EPS):
    """Finish the per-channel reduction and produce fused scale/shift."""
    s = jnp.sum(psum[:, 0, :], axis=0)
    q = jnp.sum(psq[:, 0, :], axis=0)
    mean = s / m
    var = jnp.maximum(q / m - mean * mean, 0.0)   # biased var; clamp cancellation
    scale = gamma * jax.lax.rsqrt(var + eps)
    shift = beta - mean * scale
    return scale, shift


def double_conv(x_ncdhw, params, stride=1, kernel_size=3):
    """Forward pass of DoubleConv (training-mode BatchNorm). NCDHW in/out.

    Note: params may contain conv biases ("b1"/"b2"); they are ignored because a
    conv bias followed by training-mode BatchNorm cancels exactly."""
    x = jnp.transpose(x_ncdhw, (0, 2, 3, 4, 1)).astype(jnp.float32)

    # ---- conv1 (no bias) + fused partial stats ----------------------------
    pad1 = int(kernel_size / 2)
    p1, (n, d1, h1, w1) = _im2col_3d(x, kernel_size, stride, pad1)
    c1 = params["w1"].shape[0]
    w1_mat = jnp.transpose(params["w1"], (2, 3, 4, 1, 0)).reshape(-1, c1)
    m1, k1 = p1.shape
    tm1, m1p = _choose_rows(m1, k1 * 4)
    if m1p > m1:
        p1 = jnp.pad(p1, ((0, m1p - m1), (0, 0)))  # zero rows -> zero output/stats
    y1, ps1, pq1 = _conv_gemm_stats(p1, w1_mat, tm1)
    scale1, shift1 = _bn_coeffs(ps1, pq1, m1, params["g1"], params["be1"])

    # ---- conv2: conv1's BN+ReLU fused into the patch-load path ------------
    y1_vol = y1[:m1].reshape(n, d1, h1, w1, c1)            # RAW conv1 output
    denom = jnp.where(scale1 == 0.0, 1.0, scale1)
    halo = jnp.where(scale1 == 0.0, 0.0, -shift1 / denom)  # BN(halo)=0 -> ReLU=0
    p2, (n, d2, h2, w2) = _im2col_3d(y1_vol, 3, 1, 1, pad_value=halo)
    c2 = params["w2"].shape[0]
    w2_mat = jnp.transpose(params["w2"], (2, 3, 4, 1, 0)).reshape(-1, c2)
    m2, k2 = p2.shape
    tm2, m2p = _choose_rows(m2, k2 * 4)
    if m2p > m2:
        p2 = jnp.pad(p2, ((0, m2p - m2), (0, 0)))
    col_scale = jnp.tile(scale1, 27)                       # per kernel-tap tiling
    col_shift = jnp.tile(shift1, 27)
    y2, ps2, pq2 = _conv_gemm_stats(p2, w2_mat, tm2, col_scale=col_scale,
                                    col_shift=col_shift, m_valid=m2)
    scale2, shift2 = _bn_coeffs(ps2, pq2, m2, params["g2"], params["be2"])

    # ---- final BN + ReLU, lane-dense elementwise pass ----------------------
    z2 = _bn_relu_folded(y2, scale2, shift2)
    z2 = z2[:m2].reshape(n, d2, h2, w2, c2)
    return jnp.transpose(z2, (0, 4, 1, 2, 3))


# ---------------------------------------------------------------------------
if __name__ == "__main__":
    key = jax.random.PRNGKey(0)
    in_ch, out_ch = 4, 8
    N, D, H, W = 2, 8, 8, 8

    ks = jax.random.split(key, 9)
    x = jax.random.normal(ks[0], (N, in_ch, D, H, W), jnp.float32)
    params = dict(
        w1=0.1 * jax.random.normal(ks[1], (out_ch, in_ch, 3, 3, 3), jnp.float32),
        b1=0.1 * jax.random.normal(ks[2], (out_ch,), jnp.float32),   # absorbed by BN
        g1=1.0 + 0.1 * jax.random.normal(ks[3], (out_ch,), jnp.float32),
        be1=0.1 * jax.random.normal(ks[4], (out_ch,), jnp.float32),
        w2=0.1 * jax.random.normal(ks[5], (out_ch, out_ch, 3, 3, 3), jnp.float32),
        b2=0.1 * jax.random.normal(ks[6], (out_ch,), jnp.float32),   # absorbed by BN
        g2=1.0 + 0.1 * jax.random.normal(ks[7], (out_ch,), jnp.float32),
        be2=0.1 * jax.random.normal(ks[8], (out_ch,), jnp.float32),
    )

    out = jax.jit(double_conv)(x, params)
    jax.block_until_ready(out)
    assert out.shape == (N, out_ch, D, H, W), out.shape
    assert bool(jnp.all(out >= 0.0))  # final ReLU
    print("KERNEL_OK")
</pallas_src>

<mosaic_0001>
module attributes {stable_mosaic.version = 11 : i64} {
  func.func @_conv_stats_kernel(%arg0: i32, %arg1: memref<512x108xf32, #tpu.memory_space<vmem>>, %arg2: memref<108x8xf32, #tpu.memory_space<vmem>>, %arg3: memref<512x8xf32, #tpu.memory_space<vmem>>, %arg4: memref<1x1x8xf32, #tpu.memory_space<vmem>>, %arg5: memref<1x1x8xf32, #tpu.memory_space<vmem>>) attributes {dimension_semantics = [#tpu.dimension_semantics<parallel>], iteration_bounds = array<i64: 2>, scalar_prefetch = 0 : i64, scratch_operands = 0 : i64, tpu.core_type = #tpu.core_type<tc>, window_params = [{transform_indices = @transform_0, window_bounds = array<i64: 512, 108>}, {pipeline_mode = #tpu.pipeline_mode<synchronous>, transform_indices = @transform_1, window_bounds = array<i64: 108, 8>}, {transform_indices = @transform_2, window_bounds = array<i64: 512, 8>}, {transform_indices = @transform_3, window_bounds = array<i64: 1, 1, 8>}, {transform_indices = @transform_4, window_bounds = array<i64: 1, 1, 8>}]} {
    %c0 = arith.constant 0 : index
    %c0_0 = arith.constant 0 : index
    %0 = vector.load %arg1[%c0, %c0_0] : memref<512x108xf32, #tpu.memory_space<vmem>>, vector<512x108xf32>
    %c0_1 = arith.constant 0 : index
    %c0_2 = arith.constant 0 : index
    %1 = vector.load %arg2[%c0_1, %c0_2] : memref<108x8xf32, #tpu.memory_space<vmem>>, vector<108x8xf32>
    %cst = arith.constant dense<0.000000e+00> : vector<512x8xf32>
    %2 = tpu.matmul %0, %1, %cst {dimension_numbers = #tpu.dot_dimension_numbers<[1], [0], [0], [1], [0, 0, 1, 1], [], []>} : vector<512x108xf32>, vector<108x8xf32>, vector<512x8xf32> -> vector<512x8xf32>
    %c0_3 = arith.constant 0 : index
    %c0_4 = arith.constant 0 : index
    %3 = vector.load %arg3[%c0_3, %c0_4] : memref<512x8xf32, #tpu.memory_space<vmem>>, vector<512x8xf32>
    tpu.vector_store %arg3[%c0_3, %c0_4], %2 {strides = array<i32>} : memref<512x8xf32, #tpu.memory_space<vmem>>, vector<512x8xf32>,
    %cst_5 = arith.constant dense<0.000000e+00> : vector<8xf32>
    %4 = vector.multi_reduction <add>, %2, %cst_5 [0] : vector<512x8xf32> to vector<8xf32>
    %5 = vector.shape_cast %4 : vector<8xf32> to vector<1x8xf32>
    %6 = vector.shape_cast %5 : vector<1x8xf32> to vector<1x1x8xf32>
    %c0_6 = arith.constant 0 : index
    %c0_7 = arith.constant 0 : index
    %c0_8 = arith.constant 0 : index
    %7 = vector.load %arg4[%c0_6, %c0_7, %c0_8] : memref<1x1x8xf32, #tpu.memory_space<vmem>>, vector<1x1x8xf32>
    tpu.vector_store %arg4[%c0_6, %c0_7, %c0_8], %6 {strides = array<i32>} : memref<1x1x8xf32, #tpu.memory_space<vmem>>, vector<1x1x8xf32>,
    %8 = arith.mulf %2, %2 : vector<512x8xf32>
    %cst_9 = arith.constant dense<0.000000e+00> : vector<8xf32>
    %9 = vector.multi_reduction <add>, %8, %cst_9 [0] : vector<512x8xf32> to vector<8xf32>
    %10 = vector.shape_cast %9 : vector<8xf32> to vector<1x8xf32>
    %11 = vector.shape_cast %10 : vector<1x8xf32> to vector<1x1x8xf32>
    %c0_10 = arith.constant 0 : index
    %c0_11 = arith.constant 0 : index
    %c0_12 = arith.constant 0 : index
    %12 = vector.load %arg5[%c0_10, %c0_11, %c0_12] : memref<1x1x8xf32, #tpu.memory_space<vmem>>, vector<1x1x8xf32>
    tpu.vector_store %arg5[%c0_10, %c0_11, %c0_12], %11 {strides = array<i32>} : memref<1x1x8xf32, #tpu.memory_space<vmem>>, vector<1x1x8xf32>,
    return
  }
  func.func @transform_0(%arg0: i32) -> (i32, i32) {
    %c0_i32 = arith.constant 0 : i32
    %c0_i32_0 = arith.constant 0 : i32
    return %arg0, %c0_i32 : i32, i32
  }
  func.func @transform_1(%arg0: i32) -> (i32, i32) {
    %c0_i32 = arith.constant 0 : i32
    %c0_i32_0 = arith.constant 0 : i32
    %c0_i32_1 = arith.constant 0 : i32
    return %c0_i32, %c0_i32_0 : i32, i32
  }
  func.func @transform_2(%arg0: i32) -> (i32, i32) {
    %c0_i32 = arith.constant 0 : i32
    %c0_i32_0 = arith.constant 0 : i32
    return %arg0, %c0_i32 : i32, i32
  }
  func.func @transform_3(%arg0: i32) -> (i32, i32, i32) {
    %c0_i32 = arith.constant 0 : i32
    %c0_i32_0 = arith.constant 0 : i32
    %c0_i32_1 = arith.constant 0 : i32
    return %arg0, %c0_i32, %c0_i32_0 : i32, i32, i32
  }
  func.func @transform_4(%arg0: i32) -> (i32, i32, i32) {
    %c0_i32 = arith.constant 0 : i32
    %c0_i32_0 = arith.constant 0 : i32
    %c0_i32_1 = arith.constant 0 : i32
    return %arg0, %c0_i32, %c0_i32_0 : i32, i32, i32
  }
}

module attributes {stable_mosaic.version = 11 : i64} {
  func.func @_conv_bnin_stats_kernel(%arg0: i32, %arg1: memref<512x216xf32, #tpu.memory_space<vmem>>, %arg2: memref<1x216xf32, #tpu.memory_space<vmem>>, %arg3: memref<1x216xf32, #tpu.memory_space<vmem>>, %arg4: memref<216x8xf32, #tpu.memory_space<vmem>>, %arg5: memref<512x8xf32, #tpu.memory_space<vmem>>, %arg6: memref<1x1x8xf32, #tpu.memory_space<vmem>>, %arg7: memref<1x1x8xf32, #tpu.memory_space<vmem>>) attributes {dimension_semantics = [#tpu.dimension_semantics<parallel>], iteration_bounds = array<i64: 2>, scalar_prefetch = 0 : i64, scratch_operands = 0 : i64, tpu.core_type = #tpu.core_type<tc>, window_params = [{transform_indices = @transform_0, window_bounds = array<i64: 512, 216>}, {pipeline_mode = #tpu.pipeline_mode<synchronous>, transform_indices = @transform_1, window_bounds = array<i64: 1, 216>}, {pipeline_mode = #tpu.pipeline_mode<synchronous>, transform_indices = @transform_2, window_bounds = array<i64: 1, 216>}, {pipeline_mode = #tpu.pipeline_mode<synchronous>, transform_indices = @transform_3, window_bounds = array<i64: 216, 8>}, {transform_indices = @transform_4, window_bounds = array<i64: 512, 8>}, {transform_indices = @transform_5, window_bounds = array<i64: 1, 1, 8>}, {transform_indices = @transform_6, window_bounds = array<i64: 1, 1, 8>}]} {
    %c0 = arith.constant 0 : index
    %c0_0 = arith.constant 0 : index
    %0 = vector.load %arg1[%c0, %c0_0] : memref<512x216xf32, #tpu.memory_space<vmem>>, vector<512x216xf32>
    %c0_1 = arith.constant 0 : index
    %c0_2 = arith.constant 0 : index
    %1 = vector.load %arg2[%c0_1, %c0_2] : memref<1x216xf32, #tpu.memory_space<vmem>>, vector<1x216xf32>
    %2 = vector.broadcast %1 : vector<1x216xf32> to vector<512x216xf32>
    %3 = arith.mulf %0, %2 : vector<512x216xf32>
    %c0_3 = arith.constant 0 : index
    %c0_4 = arith.constant 0 : index
    %4 = vector.load %arg3[%c0_3, %c0_4] : memref<1x216xf32, #tpu.memory_space<vmem>>, vector<1x216xf32>
    %5 = vector.broadcast %4 : vector<1x216xf32> to vector<512x216xf32>
    %6 = arith.addf %3, %5 : vector<512x216xf32>
    %cst = arith.constant 0.000000e+00 : f32
    %7 = vector.broadcast %cst : f32 to vector<512x216xf32>
    %8 = arith.maximumf %6, %7 : vector<512x216xf32>
    %c0_5 = arith.constant 0 : index
    %c0_6 = arith.constant 0 : index
    %9 = vector.load %arg4[%c0_5, %c0_6] : memref<216x8xf32, #tpu.memory_space<vmem>>, vector<216x8xf32>
    %cst_7 = arith.constant dense<0.000000e+00> : vector<512x8xf32>
    %10 = tpu.matmul %8, %9, %cst_7 {dimension_numbers = #tpu.dot_dimension_numbers<[1], [0], [0], [1], [0, 0, 1, 1], [], []>} : vector<512x216xf32>, vector<216x8xf32>, vector<512x8xf32> -> vector<512x8xf32>
    %c0_8 = arith.constant 0 : index
    %c0_9 = arith.constant 0 : index
    %11 = vector.load %arg5[%c0_8, %c0_9] : memref<512x8xf32, #tpu.memory_space<vmem>>, vector<512x8xf32>
    tpu.vector_store %arg5[%c0_8, %c0_9], %10 {strides = array<i32>} : memref<512x8xf32, #tpu.memory_space<vmem>>, vector<512x8xf32>,
    %cst_10 = arith.constant dense<0.000000e+00> : vector<8xf32>
    %12 = vector.multi_reduction <add>, %10, %cst_10 [0] : vector<512x8xf32> to vector<8xf32>
    %13 = vector.shape_cast %12 : vector<8xf32> to vector<1x8xf32>
    %14 = vector.shape_cast %13 : vector<1x8xf32> to vector<1x1x8xf32>
    %c0_11 = arith.constant 0 : index
    %c0_12 = arith.constant 0 : index
    %c0_13 = arith.constant 0 : index
    %15 = vector.load %arg6[%c0_11, %c0_12, %c0_13] : memref<1x1x8xf32, #tpu.memory_space<vmem>>, vector<1x1x8xf32>
    tpu.vector_store %arg6[%c0_11, %c0_12, %c0_13], %14 {strides = array<i32>} : memref<1x1x8xf32, #tpu.memory_space<vmem>>, vector<1x1x8xf32>,
    %16 = arith.mulf %10, %10 : vector<512x8xf32>
    %cst_14 = arith.constant dense<0.000000e+00> : vector<8xf32>
    %17 = vector.multi_reduction <add>, %16, %cst_14 [0] : vector<512x8xf32> to vector<8xf32>
    %18 = vector.shape_cast %17 : vector<8xf32> to vector<1x8xf32>
    %19 = vector.shape_cast %18 : vector<1x8xf32> to vector<1x1x8xf32>
    %c0_15 = arith.constant 0 : index
    %c0_16 = arith.constant 0 : index
    %c0_17 = arith.constant 0 : index
    %20 = vector.load %arg7[%c0_15, %c0_16, %c0_17] : memref<1x1x8xf32, #tpu.memory_space<vmem>>, vector<1x1x8xf32>
    tpu.vector_store %arg7[%c0_15, %c0_16, %c0_17], %19 {strides = array<i32>} : memref<1x1x8xf32, #tpu.memory_space<vmem>>, vector<1x1x8xf32>,
    return
  }
  func.func @transform_0(%arg0: i32) -> (i32, i32) {
    %c0_i32 = arith.constant 0 : i32
    %c0_i32_0 = arith.constant 0 : i32
    return %arg0, %c0_i32 : i32, i32
  }
  func.func @transform_1(%arg0: i32) -> (i32, i32) {
    %c0_i32 = arith.constant 0 : i32
    %c0_i32_0 = arith.constant 0 : i32
    %c0_i32_1 = arith.constant 0 : i32
    return %c0_i32, %c0_i32_0 : i32, i32
  }
  func.func @transform_2(%arg0: i32) -> (i32, i32) {
    %c0_i32 = arith.constant 0 : i32
    %c0_i32_0 = arith.constant 0 : i32
    %c0_i32_1 = arith.constant 0 : i32
    return %c0_i32, %c0_i32_0 : i32, i32
  }
  func.func @transform_3(%arg0: i32) -> (i32, i32) {
    %c0_i32 = arith.constant 0 : i32
    %c0_i32_0 = arith.constant 0 : i32
    %c0_i32_1 = arith.constant 0 : i32
    return %c0_i32, %c0_i32_0 : i32, i32
  }
  func.func @transform_4(%arg0: i32) -> (i32, i32) {
    %c0_i32 = arith.constant 0 : i32
    %c0_i32_0 = arith.constant 0 : i32
    return %arg0, %c0_i32 : i32, i32
  }
  func.func @transform_5(%arg0: i32) -> (i32, i32, i32) {
    %c0_i32 = arith.constant 0 : i32
    %c0_i32_0 = arith.constant 0 : i32
    %c0_i32_1 = arith.constant 0 : i32
    return %arg0, %c0_i32, %c0_i32_0 : i32, i32, i32
  }
  func.func @transform_6(%arg0: i32) -> (i32, i32, i32) {
    %c0_i32 = arith.constant 0 : i32
    %c0_i32_0 = arith.constant 0 : i32
    %c0_i32_1 = arith.constant 0 : i32
    return %arg0, %c0_i32, %c0_i32_0 : i32, i32, i32
  }
}

module attributes {stable_mosaic.version = 11 : i64} {
  func.func @_bn_relu_kernel(%arg0: i32, %arg1: memref<64x128xf32, #tpu.memory_space<vmem>>, %arg2: memref<1x128xf32, #tpu.memory_space<vmem>>, %arg3: memref<1x128xf32, #tpu.memory_space<vmem>>, %arg4: memref<64x128xf32, #tpu.memory_space<vmem>>) attributes {dimension_semantics = [#tpu.dimension_semantics<parallel>], iteration_bounds = array<i64: 1>, scalar_prefetch = 0 : i64, scratch_operands = 0 : i64, tpu.core_type = #tpu.core_type<tc>, window_params = [{transform_indices = @transform_0, window_bounds = array<i64: 64, 128>}, {pipeline_mode = #tpu.pipeline_mode<synchronous>, transform_indices = @transform_1, window_bounds = array<i64: 1, 128>}, {pipeline_mode = #tpu.pipeline_mode<synchronous>, transform_indices = @transform_2, window_bounds = array<i64: 1, 128>}, {transform_indices = @transform_3, window_bounds = array<i64: 64, 128>}]} {
    %c0 = arith.constant 0 : index
    %c0_0 = arith.constant 0 : index
    %0 = vector.load %arg1[%c0, %c0_0] : memref<64x128xf32, #tpu.memory_space<vmem>>, vector<64x128xf32>
    %c0_1 = arith.constant 0 : index
    %c0_2 = arith.constant 0 : index
    %1 = vector.load %arg2[%c0_1, %c0_2] : memref<1x128xf32, #tpu.memory_space<vmem>>, vector<1x128xf32>
    %2 = vector.broadcast %1 : vector<1x128xf32> to vector<64x128xf32>
    %3 = arith.mulf %0, %2 : vector<64x128xf32>
    %c0_3 = arith.constant 0 : index
    %c0_4 = arith.constant 0 : index
    %4 = vector.load %arg3[%c0_3, %c0_4] : memref<1x128xf32, #tpu.memory_space<vmem>>, vector<1x128xf32>
    %5 = vector.broadcast %4 : vector<1x128xf32> to vector<64x128xf32>
    %6 = arith.addf %3, %5 : vector<64x128xf32>
    %cst = arith.constant 0.000000e+00 : f32
    %7 = vector.broadcast %cst : f32 to vector<64x128xf32>
    %8 = arith.maximumf %6, %7 : vector<64x128xf32>
    %c0_5 = arith.constant 0 : index
    %c0_6 = arith.constant 0 : index
    %9 = vector.load %arg4[%c0_5, %c0_6] : memref<64x128xf32, #tpu.memory_space<vmem>>, vector<64x128xf32>
    tpu.vector_store %arg4[%c0_5, %c0_6], %8 {strides = array<i32>} : memref<64x128xf32, #tpu.memory_space<vmem>>, vector<64x128xf32>,
    return
  }
  func.func @transform_0(%arg0: i32) -> (i32, i32) {
    %c0_i32 = arith.constant 0 : i32
    %c0_i32_0 = arith.constant 0 : i32
    return %arg0, %c0_i32 : i32, i32
  }
  func.func @transform_1(%arg0: i32) -> (i32, i32) {
    %c0_i32 = arith.constant 0 : i32
    %c0_i32_0 = arith.constant 0 : i32
    %c0_i32_1 = arith.constant 0 : i32
    return %c0_i32, %c0_i32_0 : i32, i32
  }
  func.func @transform_2(%arg0: i32) -> (i32, i32) {
    %c0_i32 = arith.constant 0 : i32
    %c0_i32_0 = arith.constant 0 : i32
    %c0_i32_1 = arith.constant 0 : i32
    return %c0_i32, %c0_i32_0 : i32, i32
  }
  func.func @transform_3(%arg0: i32) -> (i32, i32) {
    %c0_i32 = arith.constant 0 : i32
    %c0_i32_0 = arith.constant 0 : i32
    return %arg0, %c0_i32 : i32, i32
  }
}

</mosaic_0001>

<bundles_post_ra>
// kernel: double_conv.3
= control target key start
LH: loop header
LB: loop body
LE: loop exit
PB: predicated region body
PF: predicated region fallthrough
CT: control target
= control target key end

     0   :  { %s1729_s15 = smov 0   ;;  %s2386_s0 = inlined_call_operand.vmem [shape: f32[1024,108], index: 0, kind: input, shape index: {}]   ;;  %s2387_s1 = inlined_call_operand.vmem [shape: f32[108,8], index: 1, kind: input, shape index: {}]   ;;  %s2388_s2 = inlined_call_operand.vmem [shape: f32[1024,8], index: 2, kind: output, shape index: {0}]   ;;  %s2389_s3 = inlined_call_operand.vmem [shape: f32[2,1,8], index: 3, kind: output, shape index: {1}]   ;;  %s2390_s4 = inlined_call_operand.vmem [shape: f32[2,1,8], index: 4, kind: output, shape index: {2}]  }
   0x1 LB: > { %s1735_s16 = sadd.s32 4294967295, %s1702_s15   ;;  %p1386_p0 = scmp.ge.s32.totalorder %s1702_s15, 1  ;;  %s1702_s15 = sphi %s1729_s15, %s15_s15  }
   0x2   : > { %p168_p1 = scmp.lt.s32.totalorder %s1702_s15, 3 }
   0x4   : > { %p169_p2 = pnand %p1386_p0, %p168_p1 }
   0x5   : > { %s1387_s21 = sshll.u32 (!%p169_p2), %s1735_s16, 6  ;;  %p212_p4 = scmp.lt.s32.totalorder (!%p169_p2), %s1735_s16, 1 }
   0x6   : > { %172 = sbr.rel (%p169_p2) target bundleno = 379 (0x17b), region = 28  ;;  %p201_p3 = scmp.lt.s32.totalorder (!%p169_p2), %s1387_s21, 127 }
   0xb   : > { %v295_v0 = vld [vmem:[%s2387_s1 + $0x68] sm:$0xf]  ;;  %vm489_vm0 = vcmask 1043456   ;;  %v294_v1 = vld [vmem:[%s2387_s1 + $0x60] sm:$0xff]  ;;  %v293_v2 = vld [vmem:[%s2387_s1 + $0x58] sm:$0xff]  ;;  %s2392_s21 = smov (!%p201_p3, %s1387_s21), 127 }
   0xc   : > { %1536 = vmatprep.subr.msk.mxu0 %vm489_vm0, %v295_v0  ;;  %1660 = vmatprep.subr.msk.mxu1 %vm489_vm0, %v295_v0  ;;  %v292_v3 = vld [vmem:[%s2387_s1 + $0x50] sm:$0xff]  ;;  %s1388_s26 = sshll.u32 %s2392_s21, 3  ;;  %vm296_vm1 = vcmask 883712   ;;  %v291_v4 = vld [vmem:[%s2387_s1 + $0x48] sm:$0xff]  ;;  %v290_v6 = vld [vmem:[%s2387_s1 + $0x40] sm:$0xff]  ;;  %vm878_vm2 = vcmask 64512  }
   0xd   : > { %1537 = vmatpush3.msk.msra.mxu0 %vm489_vm0, %v295_v0  ;;  %1674 = vmatpush3.msk.msra.mxu1 %vm489_vm0, %v295_v0  ;;  %s1763_s5 = scalar_lea.vmem %s2386_s0, %s1388_s26  ;;  %v289_v7 = vld [vmem:[%s2387_s1 + $0x38] sm:$0xff]  ;;  %v288_v8 = vld [vmem:[%s2387_s1 + $0x30] sm:$0xff]  ;;  %v287_v9 = vld [vmem:[%s2387_s1 + $0x28] sm:$0xff]  ;;  %s1925_s30 = scalar_lea.vmem %s2388_s2, %s1388_s26  ;;  %vm1076_vm3 = vcmask 57344  }
   0xe   : > { %1538 = vmatprep.subr.mxu0 %v294_v1  ;;  %1661 = vmatprep.subr.mxu1 %v294_v1  ;;  %v218_v5 = vld [vmem:[%s1763_s5] sm:$0xff]  ;;  %v285_v11 = vld [vmem:[%s2387_s1 + $0x18] sm:$0xff]  ;;  %v284_v12 = vld [vmem:[%s2387_s1 + $0x10] sm:$0xff]  ;;  %s2394_s16 = smov (!%p212_p4, %s1735_s16), 1 }
   0xf   : > { %1539 = vmatpush3.msra.mxu0 %v294_v1  ;;  %1675 = vmatpush3.msra.mxu1 %v294_v1  ;;  %v286_v10 = vld [vmem:[%s2387_s1 + $0x20] sm:$0xff]  ;;  %v283_v13 = vld [vmem:[%s2387_s1 + $0x8] sm:$0xff]  ;;  %v220_v16 = vld [vmem:[%s1763_s5 + $0x10] sm:$0xff]  ;;  %s217_s8 = scalar_lea.vmem %s2390_s4, %s2394_s16 }
  0x10   : > { %1540 = vmatprep.subr.mxu0 %v293_v2  ;;  %1662 = vmatprep.subr.mxu1 %v293_v2  ;;  %v282_v14 = vld [vmem:[%s2387_s1] sm:$0xff]  ;;  %v219_v15 = vld [vmem:[%s1763_s5 + $0x8] sm:$0xff]  ;;  %v252_v19 = vld [vmem:[%s1763_s5 + $0x110] sm:$0xff] }
  0x11   : > { %1541 = vmatpush3.msra.mxu0 %v293_v2  ;;  %1676 = vmatpush3.msra.mxu1 %v293_v2  ;;  %v250_v17 = vld [vmem:[%s1763_s5 + $0x100] sm:$0xff]  ;;  %v251_v18 = vld [vmem:[%s1763_s5 + $0x108] sm:$0xff]  ;;  %v221_v20 = vld [vmem:[%s1763_s5 + $0x18] sm:$0xff] }
  0x12   : > { %1542 = vmatprep.subr.mxu0 %v292_v3  ;;  %1663 = vmatprep.subr.mxu1 %v292_v3  ;;  %v222_v21 = vld [vmem:[%s1763_s5 + $0x20] sm:$0xff]  ;;  %v253_v22 = vld [vmem:[%s1763_s5 + $0x118] sm:$0xff]  ;;  %v223_v24 = vld [vmem:[%s1763_s5 + $0x28] sm:$0xff] }
  0x13   : > { %1543 = vmatpush3.msra.mxu0 %v292_v3  ;;  %1564 = vmatprep.mubr.msk.f32.mxu0 %vm296_vm1, %v218_v5  ;;  %v254_v23 = vld [vmem:[%s1763_s5 + $0x120] sm:$0xff]  ;;  %v224_v25 = vld [vmem:[%s1763_s5 + $0x30] sm:$0xff]  ;;  %v255_v26 = vld [vmem:[%s1763_s5 + $0x128] sm:$0xff] }
  0x14   : > { %1544 = vmatprep.subr.mxu0 %v291_v4  ;;  %1677 = vmatpush3.msra.mxu1 %v292_v3  ;;  %v256_v27 = vld [vmem:[%s1763_s5 + $0x130] sm:$0xff]  ;;  %v225_v28 = vld [vmem:[%s1763_s5 + $0x38] sm:$0xff]  ;;  %v226_v29 = vld [vmem:[%s1763_s5 + $0x40] sm:$0xff] }
  0x15   : > { %1545 = vmatpush3.msra.mxu0 %v291_v4  ;;  %1664 = vmatprep.subr.mxu1 %v291_v4  ;;  %v257_v30 = vld [vmem:[%s1763_s5 + $0x138] sm:$0xff]  ;;  %v258_v31 = vld [vmem:[%s1763_s5 + $0x140] sm:$0xff]  ;;  %v227_v32 = vld [vmem:[%s1763_s5 + $0x48] sm:$0xff] }
  0x16   : > { %1546 = vmatprep.subr.mxu0 %v290_v6  ;;  %1678 = vmatpush3.msra.mxu1 %v291_v4  ;;  %v228_v33 = vld [vmem:[%s1763_s5 + $0x50] sm:$0xff]  ;;  %v259_v34 = vld [vmem:[%s1763_s5 + $0x148] sm:$0xff]  ;;  %v229_v36 = vld [vmem:[%s1763_s5 + $0x58] sm:$0xff] }
  0x17   : > { %1547 = vmatpush3.msra.mxu0 %v290_v6  ;;  %1665 = vmatprep.subr.mxu1 %v290_v6  ;;  %v260_v35 = vld [vmem:[%s1763_s5 + $0x150] sm:$0xff]  ;;  %v230_v37 = vld [vmem:[%s1763_s5 + $0x60] sm:$0xff]  ;;  %v261_v38 = vld [vmem:[%s1763_s5 + $0x158] sm:$0xff] }
  0x18   : > { %1548 = vmatprep.subr.mxu0 %v289_v7  ;;  %1679 = vmatpush3.msra.mxu1 %v290_v6  ;;  %v262_v39 = vld [vmem:[%s1763_s5 + $0x160] sm:$0xff]  ;;  %v231_v40 = vld [vmem:[%s1763_s5 + $0x68] sm:$0xff]  ;;  %v232_v41 = vld [vmem:[%s1763_s5 + $0x70] sm:$0xff] }
  0x19   : > { %1549 = vmatpush3.msra.mxu0 %v289_v7  ;;  %1666 = vmatprep.subr.mxu1 %v289_v7  ;;  %v263_v42 = vld [vmem:[%s1763_s5 + $0x168] sm:$0xff]  ;;  %v264_v43 = vld [vmem:[%s1763_s5 + $0x170] sm:$0xff]  ;;  %v233_v44 = vld [vmem:[%s1763_s5 + $0x78] sm:$0xff] }
  0x1a   : > { %1550 = vmatprep.subr.mxu0 %v288_v8  ;;  %1680 = vmatpush3.msra.mxu1 %v289_v7  ;;  %v234_v45 = vld [vmem:[%s1763_s5 + $0x80] sm:$0xff]  ;;  %v265_v46 = vld [vmem:[%s1763_s5 + $0x178] sm:$0xff]  ;;  %v235_v48 = vld [vmem:[%s1763_s5 + $0x88] sm:$0xff] }
  0x1b   : > { %1551 = vmatpush3.msra.mxu0 %v288_v8  ;;  %1667 = vmatprep.subr.mxu1 %v288_v8  ;;  %v266_v47 = vld [vmem:[%s1763_s5 + $0x180] sm:$0xff]  ;;  %v236_v49 = vld [vmem:[%s1763_s5 + $0x90] sm:$0xff]  ;;  %v267_v50 = vld [vmem:[%s1763_s5 + $0x188] sm:$0xff] }
  0x1c   : > { %1552 = vmatprep.subr.mxu0 %v287_v9  ;;  %1681 = vmatpush3.msra.mxu1 %v288_v8  ;;  %v268_v51 = vld [vmem:[%s1763_s5 + $0x190] sm:$0xff]  ;;  %v237_v52 = vld [vmem:[%s1763_s5 + $0x98] sm:$0xff]  ;;  %v238_v53 = vld [vmem:[%s1763_s5 + $0xa0] sm:$0xff] }
  0x1d   : > { %1553 = vmatpush3.msra.mxu0 %v287_v9  ;;  %1668 = vmatprep.subr.mxu1 %v287_v9  ;;  %v269_v54 = vld [vmem:[%s1763_s5 + $0x198] sm:$0xff]  ;;  %v270_v55 = vld [vmem:[%s1763_s5 + $0x1a0] sm:$0xff]  ;;  %v239_v56 = vld [vmem:[%s1763_s5 + $0xa8] sm:$0xff] }
  0x1e   : > { %1554 = vmatprep.subr.mxu0 %v286_v10  ;;  %1682 = vmatpush3.msra.mxu1 %v287_v9  ;;  %v240_v57 = vld [vmem:[%s1763_s5 + $0xb0] sm:$0xff]  ;;  %v271_v58 = vld [vmem:[%s1763_s5 + $0x1a8] sm:$0xff]  ;;  %v241_v60 = vld [vmem:[%s1763_s5 + $0xb8] sm:$0xff] }
  0x1f   : > { %1555 = vmatpush3.msra.mxu0 %v286_v10  ;;  %1669 = vmatprep.subr.mxu1 %v286_v10  ;;  %v272_v59 = vld [vmem:[%s1763_s5 + $0x1b0] sm:$0xff]  ;;  %v242_v61 = vld [vmem:[%s1763_s5 + $0xc0] sm:$0xff]  ;;  %v273_v62 = vld [vmem:[%s1763_s5 + $0x1b8] sm:$0xff] }
  0x20   : > { %1556 = vmatprep.subr.mxu0 %v285_v11  ;;  %1683 = vmatpush3.msra.mxu1 %v286_v10  ;;  %v274_v63 = vld [vmem:[%s1763_s5 + $0x1c0] sm:$0xff]  ;;  %v243_v0 = vld [vmem:[%s1763_s5 + $0xc8] sm:$0xff]  ;;  %v244_v1 = vld [vmem:[%s1763_s5 + $0xd0] sm:$0xff] }
  0x21   : > { %1557 = vmatpush3.msra.mxu0 %v285_v11  ;;  %1670 = vmatprep.subr.mxu1 %v285_v11  ;;  %v275_v2 = vld [vmem:[%s1763_s5 + $0x1c8] sm:$0xff]  ;;  %v276_v3 = vld [vmem:[%s1763_s5 + $0x1d0] sm:$0xff]  ;;  %v245_v4 = vld [vmem:[%s1763_s5 + $0xd8] sm:$0xff] }
  0x22   : > { %1558 = vmatprep.subr.mxu0 %v284_v12  ;;  %1684 = vmatpush3.msra.mxu1 %v285_v11  ;;  %v246_v5 = vld [vmem:[%s1763_s5 + $0xe0] sm:$0xff]  ;;  %v277_v6 = vld [vmem:[%s1763_s5 + $0x1d8] sm:$0xff]  ;;  %v247_v8 = vld [vmem:[%s1763_s5 + $0xe8] sm:$0xff] }
  0x23   : > { %1559 = vmatpush3.msra.mxu0 %v284_v12  ;;  %1671 = vmatprep.subr.mxu1 %v284_v12  ;;  %v278_v7 = vld [vmem:[%s1763_s5 + $0x1e0] sm:$0xff]  ;;  %v248_v9 = vld [vmem:[%s1763_s5 + $0xf0] sm:$0xff]  ;;  %v279_v10 = vld [vmem:[%s1763_s5 + $0x1e8] sm:$0xff] }
  0x24   : > { %1560 = vmatprep.subr.mxu0 %v283_v13  ;;  %1685 = vmatpush3.msra.mxu1 %v284_v12  ;;  %v280_v11 = vld [vmem:[%s1763_s5 + $0x1f0] sm:$0xff]  ;;  %v249_v12 = vld [vmem:[%s1763_s5 + $0xf8] sm:$0xff] }
  0x25   : > { %1561 = vmatpush3.msra.mxu0 %v283_v13  ;;  %1672 = vmatprep.subr.mxu1 %v283_v13 }
  0x26   : > { %1562 = vmatprep.subr.mxu0 %v282_v14  ;;  %1686 = vmatpush3.msra.mxu1 %v283_v13  ;;  %v281_v13 = vld [vmem:[%s1763_s5 + $0x1f8] sm:$0xff]  ;;  %s214_s5 = scalar_lea.vmem %s2389_s3, %s2394_s16 }
  0x27   : > { %1563 = vmatpush3.msra.mxu0 %v282_v14  ;;  %1673 = vmatprep.subr.mxu1 %v282_v14 }
  0x28   : > { %1565 = vmatmul.mubr.msk.f32.vlgmr.msra.gmra.mxu0 %vm296_vm1, %v219_v15  ;;  %1687 = vmatpush3.msra.mxu1 %v282_v14 }
  0x29   : > { %1567 = vmatprep.mubr.msk.f32.mxu0 %vm296_vm1, %v220_v16  ;;  %1612 = vmatprep.mubr.msk.f32.mxu1 %vm296_vm1, %v250_v17 }
  0x2a   : > { %1613 = vmatmul.mubr.msk.f32.vlgmr.msra.gmra.mxu1 %vm296_vm1, %v251_v18 }
  0x2b   : > { %1615 = vmatprep.mubr.msk.f32.mxu1 %vm296_vm1, %v252_v19 }
  0x2c   : > { %1568 = vmatmul.mubr.msk.f32.gmra.mxu0 %vm296_vm1, %v221_v20 }
  0x2d   : > { %1570 = vmatprep.mubr.msk.f32.mxu0 %vm296_vm1, %v222_v21 }
  0x2e   : > { %1616 = vmatmul.mubr.msk.f32.gmra.mxu1 %vm296_vm1, %v253_v22 }
  0x2f   : > { %1618 = vmatprep.mubr.msk.f32.mxu1 %vm296_vm1, %v254_v23 }
  0x30   : > { %1571 = vmatmul.mubr.msk.f32.gmra.mxu0 %vm296_vm1, %v223_v24 }
  0x31   : > { %1573 = vmatprep.mubr.msk.f32.mxu0 %vm296_vm1, %v224_v25 }
  0x32   : > { %1619 = vmatmul.mubr.msk.f32.gmra.mxu1 %vm296_vm1, %v255_v26 }
  0x33   : > { %1621 = vmatprep.mubr.msk.f32.mxu1 %vm296_vm1, %v256_v27 }
  0x34   : > { %1574 = vmatmul.mubr.msk.f32.gmra.mxu0 %vm296_vm1, %v225_v28 }
  0x35   : > { %1576 = vmatprep.mubr.msk.f32.mxu0 %vm296_vm1, %v226_v29 }
  0x36   : > { %1622 = vmatmul.mubr.msk.f32.gmra.mxu1 %vm296_vm1, %v257_v30 }
  0x37   : > { %1624 = vmatprep.mubr.msk.f32.mxu1 %vm296_vm1, %v258_v31 }
  0x38   : > { %1577 = vmatmul.mubr.msk.f32.gmra.mxu0 %vm296_vm1, %v227_v32 }
  0x39   : > { %1579 = vmatprep.mubr.msk.f32.mxu0 %vm296_vm1, %v228_v33 }
  0x3a   : > { %1625 = vmatmul.mubr.msk.f32.gmra.mxu1 %vm296_vm1, %v259_v34 }
  0x3b   : > { %1627 = vmatprep.mubr.msk.f32.mxu1 %vm296_vm1, %v260_v35 }
  0x3c   : > { %1580 = vmatmul.mubr.msk.f32.gmra.mxu0 %vm296_vm1, %v229_v36 }
  0x3d   : > { %1582 = vmatprep.mubr.msk.f32.mxu0 %vm296_vm1, %v230_v37 }
  0x3e   : > { %1628 = vmatmul.mubr.msk.f32.gmra.mxu1 %vm296_vm1, %v261_v38 }
  0x3f   : > { %1630 = vmatprep.mubr.msk.f32.mxu1 %vm296_vm1, %v262_v39 }
  0x40   : > { %1583 = vmatmul.mubr.msk.f32.gmra.mxu0 %vm296_vm1, %v231_v40 }
  0x41   : > { %1585 = vmatprep.mubr.msk.f32.mxu0 %vm296_vm1, %v232_v41 }
  0x42   : > { %1631 = vmatmul.mubr.msk.f32.gmra.mxu1 %vm296_vm1, %v263_v42 }
  0x43   : > { %1633 = vmatprep.mubr.msk.f32.mxu1 %vm296_vm1, %v264_v43 }
  0x44   : > { %1586 = vmatmul.mubr.msk.f32.gmra.mxu0 %vm296_vm1, %v233_v44 }
  0x45   : > { %1588 = vmatprep.mubr.msk.f32.mxu0 %vm296_vm1, %v234_v45 }
  0x46   : > { %1634 = vmatmul.mubr.msk.f32.gmra.mxu1 %vm296_vm1, %v265_v46 }
  0x47   : > { %1636 = vmatprep.mubr.msk.f32.mxu1 %vm296_vm1, %v266_v47 }
  0x48   : > { %1589 = vmatmul.mubr.msk.f32.gmra.mxu0 %vm296_vm1, %v235_v48 }
  0x49   : > { %1591 = vmatprep.mubr.msk.f32.mxu0 %vm296_vm1, %v236_v49 }
  0x4a   : > { %1637 = vmatmul.mubr.msk.f32.gmra.mxu1 %vm296_vm1, %v267_v50 }
  0x4b   : > { %1639 = vmatprep.mubr.msk.f32.mxu1 %vm296_vm1, %v268_v51 }
  0x4c   : > { %1592 = vmatmul.mubr.msk.f32.gmra.mxu0 %vm296_vm1, %v237_v52 }
  0x4d   : > { %1594 = vmatprep.mubr.msk.f32.mxu0 %vm296_vm1, %v238_v53 }
  0x4e   : > { %1640 = vmatmul.mubr.msk.f32.gmra.mxu1 %vm296_vm1, %v269_v54 }
  0x4f   : > { %1642 = vmatprep.mubr.msk.f32.mxu1 %vm296_vm1, %v270_v55 }
  0x50   : > { %1595 = vmatmul.mubr.msk.f32.gmra.mxu0 %vm296_vm1, %v239_v56 }
  0x51   : > { %1597 = vmatprep.mubr.msk.f32.mxu0 %vm296_vm1, %v240_v57 }
  0x52   : > { %1643 = vmatmul.mubr.msk.f32.gmra.mxu1 %vm296_vm1, %v271_v58 }
  0x53   : > { %1645 = vmatprep.mubr.msk.f32.mxu1 %vm296_vm1, %v272_v59 }
  0x54   : > { %1598 = vmatmul.mubr.msk.f32.gmra.mxu0 %vm296_vm1, %v241_v60 }
  0x55   : > { %1600 = vmatprep.mubr.msk.f32.mxu0 %vm296_vm1, %v242_v61 }
  0x56   : > { %1646 = vmatmul.mubr.msk.f32.gmra.mxu1 %vm296_vm1, %v273_v62 }
  0x57   : > { %1648 = vmatprep.mubr.msk.f32.mxu1 %vm296_vm1, %v274_v63 }
  0x58   : > { %1601 = vmatmul.mubr.msk.f32.gmra.mxu0 %vm296_vm1, %v243_v0 }
  0x59   : > { %1603 = vmatprep.mubr.msk.f32.mxu0 %vm296_vm1, %v244_v1 }
  0x5a   : > { %1649 = vmatmul.mubr.msk.f32.gmra.mxu1 %vm296_vm1, %v275_v2 }
  0x5b   : > { %1651 = vmatprep.mubr.msk.f32.mxu1 %vm296_vm1, %v276_v3 }
  0x5c   : > { %1604 = vmatmul.mubr.msk.f32.gmra.mxu0 %vm296_vm1, %v245_v4 }
  0x5d   : > { %1606 = vmatprep.mubr.msk.f32.mxu0 %vm296_vm1, %v246_v5 }
  0x5e   : > { %1652 = vmatmul.mubr.msk.f32.gmra.mxu1 %vm296_vm1, %v277_v6 }
  0x5f   : > { %1654 = vmatprep.mubr.msk.f32.mxu1 %vm296_vm1, %v278_v7 }
  0x60   : > { %1607 = vmatmul.mubr.msk.f32.gmra.mxu0 %vm296_vm1, %v247_v8 }
  0x61   : > { %1609 = vmatprep.mubr.msk.f32.mxu0 %vm296_vm1, %v248_v9 }
  0x62   : > { %1655 = vmatmul.mubr.msk.f32.gmra.mxu1 %vm296_vm1, %v279_v10 }
  0x63   : > { %1657 = vmatprep.mubr.msk.f32.mxu1 %vm296_vm1, %v280_v11 }
  0x64   : > { %1610 = vmatmul.mubr.msk.f32.gmra.mxu0 %vm296_vm1, %v249_v12 }
  0x66   : > { %1658 = vmatmul.mubr.msk.f32.gmra.mxu1 %vm296_vm1, %v281_v13 }
  0xe8   : > { %v1566_v14 = vpop.f32.mrf.mxu0 }
  0xe9   : > { %880 = vst.msk [vmem:[%s1925_s30 + $0x8] sm:$0xff] %vm878_vm2, %v1566_v14  ;;  %v1079_v17 = vmul.f32 %v1566_v14, %v1566_v14  ;;  %v944_v22 = vsel %vm878_vm2, %v1566_v14, 0.0 }
  0xea   : > { %v559_v15 = vpop.f32.mrf.mxu0  ;;  %v1929_v16 = vpop.f32.mrf.mxu1 }
  0xeb   : > { %879 = vst.msk [vmem:[%s1925_s30] sm:$0xff] %vm878_vm2, %v559_v15  ;;  %v943_v18 = vsel %vm878_vm2, %v559_v15, 0.0  ;;  %v1078_v19 = vmul.f32 %v559_v15, %v559_v15  ;;  %912 = vst.msk [vmem:[%s1925_s30 + $0x108] sm:$0xff] %vm878_vm2, %v1929_v16  ;;  %v1143_v27 = vsel %vm878_vm2, %v1079_v17, 0.0 }
  0xec   : > { %v1569_v20 = vpop.f32.mrf.mxu0  ;;  %v1937_v21 = vpop.f32.mrf.mxu1  ;;  %v945_v24 = vadd.f32 %v944_v22, %v943_v18 }
  0xed   : > { %v1142_v23 = vsel %vm878_vm2, %v1078_v19, 0.0  ;;  %882 = vst.msk [vmem:[%s1925_s30 + $0x18] sm:$0xff] %vm878_vm2, %v1569_v20  ;;  %911 = vst.msk [vmem:[%s1925_s30 + $0x100] sm:$0xff] %vm878_vm2, %v1937_v21  ;;  %v1081_v28 = vmul.f32 %v1569_v20, %v1569_v20  ;;  %v948_v35 = vsel %vm878_vm2, %v1569_v20, 0.0 }
  0xee   : > { %v569_v25 = vpop.f32.mrf.mxu0  ;;  %v1946_v26 = vpop.f32.mrf.mxu1  ;;  %v1144_v31 = vadd.f32 %v1143_v27, %v1142_v23 }
  0xef   : > { %881 = vst.msk [vmem:[%s1925_s30 + $0x10] sm:$0xff] %vm878_vm2, %v569_v25  ;;  %v946_v29 = vsel %vm878_vm2, %v569_v25, 0.0  ;;  %v1080_v30 = vmul.f32 %v569_v25, %v569_v25  ;;  %914 = vst.msk [vmem:[%s1925_s30 + $0x118] sm:$0xff] %vm878_vm2, %v1946_v26  ;;  %v1147_v41 = vsel %vm878_vm2, %v1081_v28, 0.0 }
  0xf0   : > { %v947_v32 = vadd.f32 %v946_v29, %v945_v24  ;;  %v1572_v33 = vpop.f32.mrf.mxu0  ;;  %v1955_v34 = vpop.f32.mrf.mxu1 }
  0xf1   : > { %v1145_v36 = vsel %vm878_vm2, %v1080_v30, 0.0  ;;  %884 = vst.msk [vmem:[%s1925_s30 + $0x28] sm:$0xff] %vm878_vm2, %v1572_v33  ;;  %913 = vst.msk [vmem:[%s1925_s30 + $0x110] sm:$0xff] %vm878_vm2, %v1955_v34  ;;  %v1083_v42 = vmul.f32 %v1572_v33, %v1572_v33  ;;  %v952_v49 = vsel %vm878_vm2, %v1572_v33, 0.0 }
  0xf2   : > { %v1146_v37 = vadd.f32 %v1145_v36, %v1144_v31  ;;  %v579_v38 = vpop.f32.mrf.mxu0  ;;  %v949_v39 = vadd.f32 %v948_v35, %v947_v32  ;;  %v1964_v40 = vpop.f32.mrf.mxu1 }
  0xf3   : > { %883 = vst.msk [vmem:[%s1925_s30 + $0x20] sm:$0xff] %vm878_vm2, %v579_v38  ;;  %v950_v43 = vsel %vm878_vm2, %v579_v38, 0.0  ;;  %v1082_v44 = vmul.f32 %v579_v38, %v579_v38  ;;  %916 = vst.msk [vmem:[%s1925_s30 + $0x128] sm:$0xff] %vm878_vm2, %v1964_v40  ;;  %v1151_v55 = vsel %vm878_vm2, %v1083_v42, 0.0 }
  0xf4   : > { %v951_v45 = vadd.f32 %v950_v43, %v949_v39  ;;  %v1148_v46 = vadd.f32 %v1147_v41, %v1146_v37  ;;  %v1575_v47 = vpop.f32.mrf.mxu0  ;;  %v1973_v48 = vpop.f32.mrf.mxu1 }
  0xf5   : > { %v1149_v50 = vsel %vm878_vm2, %v1082_v44, 0.0  ;;  %886 = vst.msk [vmem:[%s1925_s30 + $0x38] sm:$0xff] %vm878_vm2, %v1575_v47  ;;  %915 = vst.msk [vmem:[%s1925_s30 + $0x120] sm:$0xff] %vm878_vm2, %v1973_v48  ;;  %v1085_v56 = vmul.f32 %v1575_v47, %v1575_v47  ;;  %v956_v63 = vsel %vm878_vm2, %v1575_v47, 0.0 }
  0xf6   : > { %v1150_v51 = vadd.f32 %v1149_v50, %v1148_v46  ;;  %v589_v52 = vpop.f32.mrf.mxu0  ;;  %v953_v53 = vadd.f32 %v952_v49, %v951_v45  ;;  %v1982_v54 = vpop.f32.mrf.mxu1 }
  0xf7   : > { %885 = vst.msk [vmem:[%s1925_s30 + $0x30] sm:$0xff] %vm878_vm2, %v589_v52  ;;  %v954_v57 = vsel %vm878_vm2, %v589_v52, 0.0  ;;  %v1084_v58 = vmul.f32 %v589_v52, %v589_v52  ;;  %918 = vst.msk [vmem:[%s1925_s30 + $0x138] sm:$0xff] %vm878_vm2, %v1982_v54  ;;  %v1155_v5 = vsel %vm878_vm2, %v1085_v56, 0.0 }
  0xf8   : > { %v955_v59 = vadd.f32 %v954_v57, %v953_v53  ;;  %v1152_v60 = vadd.f32 %v1151_v55, %v1150_v51  ;;  %v1578_v61 = vpop.f32.mrf.mxu0  ;;  %v1991_v62 = vpop.f32.mrf.mxu1 }
  0xf9   : > { %v1153_v0 = vsel %vm878_vm2, %v1084_v58, 0.0  ;;  %888 = vst.msk [vmem:[%s1925_s30 + $0x48] sm:$0xff] %vm878_vm2, %v1578_v61  ;;  %917 = vst.msk [vmem:[%s1925_s30 + $0x130] sm:$0xff] %vm878_vm2, %v1991_v62  ;;  %v1087_v6 = vmul.f32 %v1578_v61, %v1578_v61  ;;  %v960_v13 = vsel %vm878_vm2, %v1578_v61, 0.0 }
  0xfa   : > { %v1154_v1 = vadd.f32 %v1153_v0, %v1152_v60  ;;  %v599_v2 = vpop.f32.mrf.mxu0  ;;  %v957_v3 = vadd.f32 %v956_v63, %v955_v59  ;;  %v2000_v4 = vpop.f32.mrf.mxu1 }
  0xfb   : > { %887 = vst.msk [vmem:[%s1925_s30 + $0x40] sm:$0xff] %vm878_vm2, %v599_v2  ;;  %v958_v7 = vsel %vm878_vm2, %v599_v2, 0.0  ;;  %v1086_v8 = vmul.f32 %v599_v2, %v599_v2  ;;  %920 = vst.msk [vmem:[%s1925_s30 + $0x148] sm:$0xff] %vm878_vm2, %v2000_v4  ;;  %v1159_v20 = vsel %vm878_vm2, %v1087_v6, 0.0 }
  0xfc   : > { %v959_v9 = vadd.f32 %v958_v7, %v957_v3  ;;  %v1156_v10 = vadd.f32 %v1155_v5, %v1154_v1  ;;  %v1581_v11 = vpop.f32.mrf.mxu0  ;;  %v2009_v12 = vpop.f32.mrf.mxu1 }
  0xfd   : > { %v1157_v14 = vsel %vm878_vm2, %v1086_v8, 0.0  ;;  %890 = vst.msk [vmem:[%s1925_s30 + $0x58] sm:$0xff] %vm878_vm2, %v1581_v11  ;;  %919 = vst.msk [vmem:[%s1925_s30 + $0x140] sm:$0xff] %vm878_vm2, %v2009_v12  ;;  %v1089_v22 = vmul.f32 %v1581_v11, %v1581_v11  ;;  %v964_v30 = vsel %vm878_vm2, %v1581_v11, 0.0 }
  0xfe   : > { %v1158_v15 = vadd.f32 %v1157_v14, %v1156_v10  ;;  %v609_v17 = vpop.f32.mrf.mxu0  ;;  %v961_v18 = vadd.f32 %v960_v13, %v959_v9  ;;  %v2018_v19 = vpop.f32.mrf.mxu1 }
  0xff   : > { %889 = vst.msk [vmem:[%s1925_s30 + $0x50] sm:$0xff] %vm878_vm2, %v609_v17  ;;  %v962_v23 = vsel %vm878_vm2, %v609_v17, 0.0  ;;  %v1088_v24 = vmul.f32 %v609_v17, %v609_v17  ;;  %922 = vst.msk [vmem:[%s1925_s30 + $0x158] sm:$0xff] %vm878_vm2, %v2018_v19  ;;  %v1163_v37 = vsel %vm878_vm2, %v1089_v22, 0.0 }
 0x100   : > { %v963_v25 = vadd.f32 %v962_v23, %v961_v18  ;;  %v1160_v27 = vadd.f32 %v1159_v20, %v1158_v15  ;;  %v1584_v28 = vpop.f32.mrf.mxu0  ;;  %v2027_v29 = vpop.f32.mrf.mxu1 }
 0x101   : > { %v1161_v31 = vsel %vm878_vm2, %v1088_v24, 0.0  ;;  %892 = vst.msk [vmem:[%s1925_s30 + $0x68] sm:$0xff] %vm878_vm2, %v1584_v28  ;;  %921 = vst.msk [vmem:[%s1925_s30 + $0x150] sm:$0xff] %vm878_vm2, %v2027_v29  ;;  %v1091_v38 = vmul.f32 %v1584_v28, %v1584_v28  ;;  %v968_v46 = vsel %vm878_vm2, %v1584_v28, 0.0 }
 0x102   : > { %v1162_v32 = vadd.f32 %v1161_v31, %v1160_v27  ;;  %v619_v33 = vpop.f32.mrf.mxu0  ;;  %v965_v35 = vadd.f32 %v964_v30, %v963_v25  ;;  %v2036_v36 = vpop.f32.mrf.mxu1 }
 0x103   : > { %891 = vst.msk [vmem:[%s1925_s30 + $0x60] sm:$0xff] %vm878_vm2, %v619_v33  ;;  %v966_v39 = vsel %vm878_vm2, %v619_v33, 0.0  ;;  %v1090_v41 = vmul.f32 %v619_v33, %v619_v33  ;;  %924 = vst.msk [vmem:[%s1925_s30 + $0x168] sm:$0xff] %vm878_vm2, %v2036_v36  ;;  %v1167_v53 = vsel %vm878_vm2, %v1091_v38, 0.0 }
 0x104   : > { %v967_v42 = vadd.f32 %v966_v39, %v965_v35  ;;  %v1164_v43 = vadd.f32 %v1163_v37, %v1162_v32  ;;  %v1587_v44 = vpop.f32.mrf.mxu0  ;;  %v2045_v45 = vpop.f32.mrf.mxu1 }
 0x105   : > { %v1165_v47 = vsel %vm878_vm2, %v1090_v41, 0.0  ;;  %894 = vst.msk [vmem:[%s1925_s30 + $0x78] sm:$0xff] %vm878_vm2, %v1587_v44  ;;  %923 = vst.msk [vmem:[%s1925_s30 + $0x160] sm:$0xff] %vm878_vm2, %v2045_v45  ;;  %v1093_v55 = vmul.f32 %v1587_v44, %v1587_v44  ;;  %v972_v63 = vsel %vm878_vm2, %v1587_v44, 0.0 }
 0x106   : > { %v1166_v49 = vadd.f32 %v1165_v47, %v1164_v43  ;;  %v629_v50 = vpop.f32.mrf.mxu0  ;;  %v969_v51 = vadd.f32 %v968_v46, %v967_v42  ;;  %v2054_v52 = vpop.f32.mrf.mxu1 }
 0x107   : > { %893 = vst.msk [vmem:[%s1925_s30 + $0x70] sm:$0xff] %vm878_vm2, %v629_v50  ;;  %v970_v56 = vsel %vm878_vm2, %v629_v50, 0.0  ;;  %v1092_v57 = vmul.f32 %v629_v50, %v629_v50  ;;  %926 = vst.msk [vmem:[%s1925_s30 + $0x178] sm:$0xff] %vm878_vm2, %v2054_v52  ;;  %v1171_v6 = vsel %vm878_vm2, %v1093_v55, 0.0 }
 0x108   : > { %v971_v58 = vadd.f32 %v970_v56, %v969_v51  ;;  %v1168_v59 = vadd.f32 %v1167_v53, %v1166_v49  ;;  %v1590_v60 = vpop.f32.mrf.mxu0  ;;  %v2063_v61 = vpop.f32.mrf.mxu1 }
 0x109   : > { %v1169_v0 = vsel %vm878_vm2, %v1092_v57, 0.0  ;;  %896 = vst.msk [vmem:[%s1925_s30 + $0x88] sm:$0xff] %vm878_vm2, %v1590_v60  ;;  %925 = vst.msk [vmem:[%s1925_s30 + $0x170] sm:$0xff] %vm878_vm2, %v2063_v61  ;;  %v1095_v7 = vmul.f32 %v1590_v60, %v1590_v60  ;;  %v976_v15 = vsel %vm878_vm2, %v1590_v60, 0.0 }
 0x10a   : > { %v1170_v1 = vadd.f32 %v1169_v0, %v1168_v59  ;;  %v639_v2 = vpop.f32.mrf.mxu0  ;;  %v973_v3 = vadd.f32 %v972_v63, %v971_v58  ;;  %v2072_v5 = vpop.f32.mrf.mxu1 }
 0x10b   : > { %895 = vst.msk [vmem:[%s1925_s30 + $0x80] sm:$0xff] %vm878_vm2, %v639_v2  ;;  %v974_v8 = vsel %vm878_vm2, %v639_v2, 0.0  ;;  %v1094_v9 = vmul.f32 %v639_v2, %v639_v2  ;;  %928 = vst.msk [vmem:[%s1925_s30 + $0x188] sm:$0xff] %vm878_vm2, %v2072_v5  ;;  %v1175_v24 = vsel %vm878_vm2, %v1095_v7, 0.0 }
 0x10c   : > { %v975_v10 = vadd.f32 %v974_v8, %v973_v3  ;;  %v1172_v11 = vadd.f32 %v1171_v6, %v1170_v1  ;;  %v1593_v13 = vpop.f32.mrf.mxu0  ;;  %v2081_v14 = vpop.f32.mrf.mxu1 }
 0x10d   : > { %v1173_v17 = vsel %vm878_vm2, %v1094_v9, 0.0  ;;  %898 = vst.msk [vmem:[%s1925_s30 + $0x98] sm:$0xff] %vm878_vm2, %v1593_v13  ;;  %927 = vst.msk [vmem:[%s1925_s30 + $0x180] sm:$0xff] %vm878_vm2, %v2081_v14  ;;  %v1097_v25 = vmul.f32 %v1593_v13, %v1593_v13  ;;  %v980_v35 = vsel %vm878_vm2, %v1593_v13, 0.0 }
 0x10e   : > { %v1174_v18 = vadd.f32 %v1173_v17, %v1172_v11  ;;  %v649_v20 = vpop.f32.mrf.mxu0  ;;  %v977_v22 = vadd.f32 %v976_v15, %v975_v10  ;;  %v2090_v23 = vpop.f32.mrf.mxu1 }
 0x10f   : > { %897 = vst.msk [vmem:[%s1925_s30 + $0x90] sm:$0xff] %vm878_vm2, %v649_v20  ;;  %v978_v27 = vsel %vm878_vm2, %v649_v20, 0.0  ;;  %v1096_v28 = vmul.f32 %v649_v20, %v649_v20  ;;  %930 = vst.msk [vmem:[%s1925_s30 + $0x198] sm:$0xff] %vm878_vm2, %v2090_v23  ;;  %v1179_v43 = vsel %vm878_vm2, %v1097_v25, 0.0 }
 0x110   : > { %v979_v30 = vadd.f32 %v978_v27, %v977_v22  ;;  %v1176_v31 = vadd.f32 %v1175_v24, %v1174_v18  ;;  %v1596_v32 = vpop.f32.mrf.mxu0  ;;  %v2099_v33 = vpop.f32.mrf.mxu1 }
 0x111   : > { %v1177_v37 = vsel %vm878_vm2, %v1096_v28, 0.0  ;;  %900 = vst.msk [vmem:[%s1925_s30 + $0xa8] sm:$0xff] %vm878_vm2, %v1596_v32  ;;  %929 = vst.msk [vmem:[%s1925_s30 + $0x190] sm:$0xff] %vm878_vm2, %v2099_v33  ;;  %v1099_v44 = vmul.f32 %v1596_v32, %v1596_v32  ;;  %v984_v55 = vsel %vm878_vm2, %v1596_v32, 0.0 }
 0x112   : > { %v1178_v38 = vadd.f32 %v1177_v37, %v1176_v31  ;;  %v659_v39 = vpop.f32.mrf.mxu0  ;;  %v981_v41 = vadd.f32 %v980_v35, %v979_v30  ;;  %v2108_v42 = vpop.f32.mrf.mxu1 }
 0x113   : > { %899 = vst.msk [vmem:[%s1925_s30 + $0xa0] sm:$0xff] %vm878_vm2, %v659_v39  ;;  %v982_v46 = vsel %vm878_vm2, %v659_v39, 0.0  ;;  %v1098_v47 = vmul.f32 %v659_v39, %v659_v39  ;;  %932 = vst.msk [vmem:[%s1925_s30 + $0x1a8] sm:$0xff] %vm878_vm2, %v2108_v42  ;;  %v1183_v63 = vsel %vm878_vm2, %v1099_v44, 0.0 }
 0x114   : > { %v983_v49 = vadd.f32 %v982_v46, %v981_v41  ;;  %v1180_v50 = vadd.f32 %v1179_v43, %v1178_v38  ;;  %v1599_v51 = vpop.f32.mrf.mxu0  ;;  %v2117_v53 = vpop.f32.mrf.mxu1 }
 0x115   : > { %v1181_v56 = vsel %vm878_vm2, %v1098_v47, 0.0  ;;  %902 = vst.msk [vmem:[%s1925_s30 + $0xb8] sm:$0xff] %vm878_vm2, %v1599_v51  ;;  %931 = vst.msk [vmem:[%s1925_s30 + $0x1a0] sm:$0xff] %vm878_vm2, %v2117_v53  ;;  %v1101_v0 = vmul.f32 %v1599_v51, %v1599_v51  ;;  %v988_v9 = vsel %vm878_vm2, %v1599_v51, 0.0 }
 0x116   : > { %v1182_v57 = vadd.f32 %v1181_v56, %v1180_v50  ;;  %v669_v58 = vpop.f32.mrf.mxu0  ;;  %v985_v59 = vadd.f32 %v984_v55, %v983_v49  ;;  %v2126_v60 = vpop.f32.mrf.mxu1 }
 0x117   : > { %901 = vst.msk [vmem:[%s1925_s30 + $0xb0] sm:$0xff] %vm878_vm2, %v669_v58  ;;  %v986_v1 = vsel %vm878_vm2, %v669_v58, 0.0  ;;  %v1100_v2 = vmul.f32 %v669_v58, %v669_v58  ;;  %934 = vst.msk [vmem:[%s1925_s30 + $0x1b8] sm:$0xff] %vm878_vm2, %v2126_v60  ;;  %v1187_v18 = vsel %vm878_vm2, %v1101_v0, 0.0 }
 0x118   : > { %v987_v3 = vadd.f32 %v986_v1, %v985_v59  ;;  %v1184_v6 = vadd.f32 %v1183_v63, %v1182_v57  ;;  %v1602_v7 = vpop.f32.mrf.mxu0  ;;  %v2135_v8 = vpop.f32.mrf.mxu1 }
 0x119   : > { %v1185_v10 = vsel %vm878_vm2, %v1100_v2, 0.0  ;;  %904 = vst.msk [vmem:[%s1925_s30 + $0xc8] sm:$0xff] %vm878_vm2, %v1602_v7  ;;  %933 = vst.msk [vmem:[%s1925_s30 + $0x1b0] sm:$0xff] %vm878_vm2, %v2135_v8  ;;  %v1103_v20 = vmul.f32 %v1602_v7, %v1602_v7  ;;  %v992_v31 = vsel %vm878_vm2, %v1602_v7, 0.0 }
 0x11a   : > { %v1186_v11 = vadd.f32 %v1185_v10, %v1184_v6  ;;  %v679_v13 = vpop.f32.mrf.mxu0  ;;  %v989_v15 = vadd.f32 %v988_v9, %v987_v3  ;;  %v2144_v17 = vpop.f32.mrf.mxu1 }
 0x11b   : > { %903 = vst.msk [vmem:[%s1925_s30 + $0xc0] sm:$0xff] %vm878_vm2, %v679_v13  ;;  %v990_v22 = vsel %vm878_vm2, %v679_v13, 0.0  ;;  %v1102_v24 = vmul.f32 %v679_v13, %v679_v13  ;;  %936 = vst.msk [vmem:[%s1925_s30 + $0x1c8] sm:$0xff] %vm878_vm2, %v2144_v17  ;;  %v1191_v41 = vsel %vm878_vm2, %v1103_v20, 0.0 }
 0x11c   : > { %v991_v25 = vadd.f32 %v990_v22, %v989_v15  ;;  %v1188_v27 = vadd.f32 %v1187_v18, %v1186_v11  ;;  %v1605_v28 = vpop.f32.mrf.mxu0  ;;  %v2153_v30 = vpop.f32.mrf.mxu1 }
 0x11d   : > { %v1189_v32 = vsel %vm878_vm2, %v1102_v24, 0.0  ;;  %906 = vst.msk [vmem:[%s1925_s30 + $0xd8] sm:$0xff] %vm878_vm2, %v1605_v28  ;;  %935 = vst.msk [vmem:[%s1925_s30 + $0x1c0] sm:$0xff] %vm878_vm2, %v2153_v30  ;;  %v1105_v43 = vmul.f32 %v1605_v28, %v1605_v28  ;;  %v996_v55 = vsel %vm878_vm2, %v1605_v28, 0.0 }
 0x11e   : > { %v1190_v35 = vadd.f32 %v1189_v32, %v1188_v27  ;;  %v689_v37 = vpop.f32.mrf.mxu0  ;;  %v993_v38 = vadd.f32 %v992_v31, %v991_v25  ;;  %v2162_v39 = vpop.f32.mrf.mxu1 }
 0x11f   : > { %905 = vst.msk [vmem:[%s1925_s30 + $0xd0] sm:$0xff] %vm878_vm2, %v689_v37  ;;  %v994_v44 = vsel %vm878_vm2, %v689_v37, 0.0  ;;  %v1104_v46 = vmul.f32 %v689_v37, %v689_v37  ;;  %938 = vst.msk [vmem:[%s1925_s30 + $0x1d8] sm:$0xff] %vm878_vm2, %v2162_v39  ;;  %v1195_v0 = vsel %vm878_vm2, %v1105_v43, 0.0 }
 0x120   : > { %v995_v47 = vadd.f32 %v994_v44, %v993_v38  ;;  %v1192_v49 = vadd.f32 %v1191_v41, %v1190_v35  ;;  %v1608_v50 = vpop.f32.mrf.mxu0  ;;  %v2171_v51 = vpop.f32.mrf.mxu1  ;;  %v1110_v41 = vmul.f32 %v1937_v21, %v1937_v21 }
 0x121   : > { %v1193_v56 = vsel %vm878_vm2, %v1104_v46, 0.0  ;;  %908 = vst.msk [vmem:[%s1925_s30 + $0xe8] sm:$0xff] %vm878_vm2, %v1608_v50  ;;  %937 = vst.msk [vmem:[%s1925_s30 + $0x1d0] sm:$0xff] %vm878_vm2, %v2171_v51  ;;  %v1107_v1 = vmul.f32 %v1608_v50, %v1608_v50  ;;  %v1000_v11 = vsel %vm878_vm2, %v1608_v50, 0.0 }
 0x122   : > { %v1194_v57 = vadd.f32 %v1193_v56, %v1192_v49  ;;  %v699_v58 = vpop.f32.mrf.mxu0  ;;  %v997_v59 = vadd.f32 %v996_v55, %v995_v47  ;;  %v2180_v63 = vpop.f32.mrf.mxu1  ;;  %v1111_v47 = vmul.f32 %v1929_v16, %v1929_v16  ;;  %v1006_v49 = vsel %vm878_vm2, %v1937_v21, 0.0 }
 0x123   : > { %907 = vst.msk [vmem:[%s1925_s30 + $0xe0] sm:$0xff] %vm878_vm2, %v699_v58  ;;  %v998_v2 = vsel %vm878_vm2, %v699_v58, 0.0  ;;  %v1106_v3 = vmul.f32 %v699_v58, %v699_v58  ;;  %940 = vst.msk [vmem:[%s1925_s30 + $0x1e8] sm:$0xff] %vm878_vm2, %v2180_v63  ;;  %v1199_v24 = vsel %vm878_vm2, %v1107_v1, 0.0  ;;  %v1008_v56 = vsel %vm878_vm2, %v1929_v16, 0.0 }
 0x124   : > { %v999_v6 = vadd.f32 %v998_v2, %v997_v59  ;;  %v1196_v7 = vadd.f32 %v1195_v0, %v1194_v57  ;;  %v1611_v9 = vpop.f32.mrf.mxu0  ;;  %v2189_v10 = vpop.f32.mrf.mxu1  ;;  %v1205_v57 = vsel %vm878_vm2, %v1110_v41, 0.0  ;;  %v1112_v58 = vmul.f32 %v1955_v34, %v1955_v34 }
 0x125   : > { %v1197_v13 = vsel %vm878_vm2, %v1106_v3, 0.0  ;;  %910 = vst.msk [vmem:[%s1925_s30 + $0xf8] sm:$0xff] %vm878_vm2, %v1611_v9  ;;  %939 = vst.msk [vmem:[%s1925_s30 + $0x1e0] sm:$0xff] %vm878_vm2, %v2189_v10  ;;  %v1109_v25 = vmul.f32 %v1611_v9, %v1611_v9  ;;  %v1004_v37 = vsel %vm878_vm2, %v1611_v9, 0.0  ;;  %v1207_v1 = vsel %vm878_vm2, %v1111_v47, 0.0 }
 0x126   : > { %v1198_v15 = vadd.f32 %v1197_v13, %v1196_v7  ;;  %v709_v18 = vpop.f32.mrf.mxu0  ;;  %v1001_v20 = vadd.f32 %v1000_v11, %v999_v6  ;;  %v2198_v22 = vpop.f32.mrf.mxu1  ;;  %v1113_v2 = vmul.f32 %v1946_v26, %v1946_v26  ;;  %v1010_v21 = vsel %vm878_vm2, %v1955_v34, 0.0 }
 0x127   : > { %909 = vst.msk [vmem:[%s1925_s30 + $0xf0] sm:$0xff] %vm878_vm2, %v709_v18  ;;  %v1002_v27 = vsel %vm878_vm2, %v709_v18, 0.0  ;;  %v1108_v28 = vmul.f32 %v709_v18, %v709_v18  ;;  %942 = vst.msk [vmem:[%s1925_s30 + $0x1f8] sm:$0xff] %vm878_vm2, %v2198_v22  ;;  %v1203_v46 = vsel %vm878_vm2, %v1109_v25, 0.0  ;;  %v1012_v16 = vsel %vm878_vm2, %v1946_v26, 0.0 }
 0x128   : > { %v1003_v31 = vadd.f32 %v1002_v27, %v1001_v20  ;;  %v1200_v32 = vadd.f32 %v1199_v24, %v1198_v15  ;;  %v2207_v35 = vpop.f32.mrf.mxu1  ;;  %v1209_v7 = vsel %vm878_vm2, %v1112_v58, 0.0  ;;  %v1114_v9 = vmul.f32 %v1973_v48, %v1973_v48 }
 0x129   : > { %v1201_v38 = vsel %vm878_vm2, %v1108_v28, 0.0  ;;  %941 = vst.msk [vmem:[%s1925_s30 + $0x1f0] sm:$0xff] %vm878_vm2, %v2207_v35  ;;  %v1211_v15 = vsel %vm878_vm2, %v1113_v2, 0.0  ;;  %v1115_v18 = vmul.f32 %v1964_v40, %v1964_v40  ;;  %v1014_v34 = vsel %vm878_vm2, %v1973_v48, 0.0 }
 0x12a   : > { %v1005_v43 = vadd.f32 %v1004_v37, %v1003_v31  ;;  %v1202_v44 = vadd.f32 %v1201_v38, %v1200_v32  ;;  %v1016_v26 = vsel %vm878_vm2, %v1964_v40, 0.0  ;;  %v1213_v25 = vsel %vm878_vm2, %v1114_v9, 0.0 }
 0x12b   : > { %v1116_v27 = vmul.f32 %v1991_v62, %v1991_v62  ;;  %v1215_v32 = vsel %vm878_vm2, %v1115_v18, 0.0  ;;  %v1117_v37 = vmul.f32 %v1982_v54, %v1982_v54  ;;  %v1018_v48 = vsel %vm878_vm2, %v1991_v62, 0.0 }
 0x12c   : > { %v1204_v50 = vadd.f32 %v1203_v46, %v1202_v44  ;;  %v1007_v55 = vadd.f32 %v1006_v49, %v1005_v43  ;;  %v1020_v40 = vsel %vm878_vm2, %v1982_v54, 0.0  ;;  %v1118_v44 = vmul.f32 %v2009_v12, %v2009_v12 }
 0x12d   : > { %v1217_v43 = vsel %vm878_vm2, %v1116_v27, 0.0  ;;  %v1219_v49 = vsel %vm878_vm2, %v1117_v37, 0.0  ;;  %v1022_v62 = vsel %vm878_vm2, %v2009_v12, 0.0  ;;  %v1024_v54 = vsel %vm878_vm2, %v2000_v4, 0.0 }
 0x12e   : > { %v1206_v59 = vadd.f32 %v1205_v57, %v1204_v50  ;;  %v1009_v0 = vadd.f32 %v1008_v56, %v1007_v55  ;;  %v1119_v50 = vmul.f32 %v2000_v4, %v2000_v4  ;;  %v1221_v57 = vsel %vm878_vm2, %v1118_v44, 0.0 }
 0x12f   : > { %v1120_v58 = vmul.f32 %v2027_v29, %v2027_v29  ;;  %v1121_v2 = vmul.f32 %v2018_v19, %v2018_v19  ;;  %v1026_v12 = vsel %vm878_vm2, %v2027_v29, 0.0  ;;  %v1028_v4 = vsel %vm878_vm2, %v2018_v19, 0.0 }
 0x130   : > { %v1011_v3 = vadd.f32 %v1010_v21, %v1009_v0  ;;  %v1208_v6 = vadd.f32 %v1207_v1, %v1206_v59  ;;  %v1223_v1 = vsel %vm878_vm2, %v1119_v50, 0.0  ;;  %v1030_v29 = vsel %vm878_vm2, %v2045_v45, 0.0 }
 0x131   : > { %v1032_v19 = vsel %vm878_vm2, %v2036_v36, 0.0  ;;  %v1125_v27 = vmul.f32 %v2054_v52, %v2054_v52  ;;  %v1126_v37 = vmul.f32 %v2081_v14, %v2081_v14 }
 0x132   : > { %v1210_v11 = vadd.f32 %v1209_v7, %v1208_v6  ;;  %v1013_v13 = vadd.f32 %v1012_v16, %v1011_v3  ;;  %v1225_v6 = vsel %vm878_vm2, %v1120_v58, 0.0  ;;  %v1122_v16 = vmul.f32 %v2045_v45, %v2045_v45 }
 0x133   : > { %v1034_v45 = vsel %vm878_vm2, %v2063_v61, 0.0  ;;  %v1130_v58 = vmul.f32 %v2117_v53, %v2117_v53 }
 0x134   : > { %v1015_v20 = vadd.f32 %v1014_v34, %v1013_v13  ;;  %v1212_v24 = vadd.f32 %v1211_v15, %v1210_v11  ;;  %v1227_v11 = vsel %vm878_vm2, %v1121_v2, 0.0  ;;  %v1123_v13 = vmul.f32 %v2036_v36, %v2036_v36 }
 0x135   : > { %v1229_v34 = vsel %vm878_vm2, %v1122_v16, 0.0  ;;  %v1036_v36 = vsel %vm878_vm2, %v2054_v52, 0.0  ;;  %v1040_v52 = vsel %vm878_vm2, %v2072_v5, 0.0  ;;  %v1131_v2 = vmul.f32 %v2108_v42, %v2108_v42 }
 0x136   : > { %v1214_v28 = vadd.f32 %v1213_v25, %v1212_v24  ;;  %v1017_v31 = vadd.f32 %v1016_v26, %v1015_v20  ;;  %v1124_v20 = vmul.f32 %v2063_v61, %v2063_v61  ;;  %v1231_v25 = vsel %vm878_vm2, %v1123_v13, 0.0 }
 0x137   : > { %v1038_v61 = vsel %vm878_vm2, %v2081_v14, 0.0  ;;  %v1042_v14 = vsel %vm878_vm2, %v2099_v33, 0.0 }
 0x138   : > { %v1019_v38 = vadd.f32 %v1018_v48, %v1017_v31  ;;  %v1216_v41 = vadd.f32 %v1215_v32, %v1214_v28  ;;  %v1233_v32 = vsel %vm878_vm2, %v1124_v20, 0.0  ;;  %v1135_v20 = vmul.f32 %v2144_v17, %v2144_v17 }
 0x13a   : > { %v1218_v46 = vadd.f32 %v1217_v43, %v1216_v41  ;;  %v1021_v47 = vadd.f32 %v1020_v40, %v1019_v38  ;;  %v1235_v41 = vsel %vm878_vm2, %v1125_v27, 0.0  ;;  %v1127_v40 = vmul.f32 %v2072_v5, %v2072_v5 }
 0x13b   : > { %v1044_v5 = vsel %vm878_vm2, %v2090_v23, 0.0  ;;  %v1136_v27 = vmul.f32 %v2171_v51, %v2171_v51 }
 0x13c   : > { %v1023_v55 = vadd.f32 %v1022_v62, %v1021_v47  ;;  %v1220_v56 = vadd.f32 %v1219_v49, %v1218_v46  ;;  %v1237_v46 = vsel %vm878_vm2, %v1126_v37, 0.0  ;;  %v1128_v47 = vmul.f32 %v2099_v33, %v2099_v33 }
 0x13d   : > { %v1239_v62 = vsel %vm878_vm2, %v1127_v40, 0.0  ;;  %v1046_v33 = vsel %vm878_vm2, %v2117_v53, 0.0  ;;  %v1050_v53 = vsel %vm878_vm2, %v2135_v8, 0.0 }
 0x13e   : > { %v1222_v59 = vadd.f32 %v1221_v57, %v1220_v56  ;;  %v1025_v0 = vadd.f32 %v1024_v54, %v1023_v55  ;;  %v1129_v55 = vmul.f32 %v2090_v23, %v2090_v23  ;;  %v1241_v57 = vsel %vm878_vm2, %v1128_v47, 0.0 }
 0x13f   : > { %v1048_v23 = vsel %vm878_vm2, %v2108_v42, 0.0  ;;  %v1052_v42 = vsel %vm878_vm2, %v2126_v60, 0.0  ;;  %v1140_v47 = vmul.f32 %v2207_v35, %v2207_v35 }
 0x140   : > { %v1027_v21 = vadd.f32 %v1026_v12, %v1025_v0  ;;  %v1224_v3 = vadd.f32 %v1223_v1, %v1222_v59  ;;  %v1243_v1 = vsel %vm878_vm2, %v1129_v55, 0.0  ;;  %v1141_v55 = vmul.f32 %v2198_v22, %v2198_v22 }
 0x142   : > { %v1226_v7 = vadd.f32 %v1225_v6, %v1224_v3  ;;  %v1029_v9 = vadd.f32 %v1028_v4, %v1027_v21  ;;  %v1245_v3 = vsel %vm878_vm2, %v1130_v58, 0.0  ;;  %v1132_v4 = vmul.f32 %v2135_v8, %v2135_v8 }
 0x143   : > { %v1054_v8 = vsel %vm878_vm2, %v2153_v30, 0.0  ;;  %v1267_v58 = vsel %vm878_vm2, %v1141_v55, 0.0 }
 0x144   : > { %v1031_v15 = vadd.f32 %v1030_v29, %v1029_v9  ;;  %v1228_v18 = vadd.f32 %v1227_v11, %v1226_v7  ;;  %v1247_v7 = vsel %vm878_vm2, %v1131_v2, 0.0  ;;  %v1133_v9 = vmul.f32 %v2126_v60, %v2126_v60 }
 0x145   : > { %v1249_v29 = vsel %vm878_vm2, %v1132_v4, 0.0  ;;  %v1056_v60 = vsel %vm878_vm2, %v2144_v17, 0.0  ;;  %v1060_v17 = vsel %vm878_vm2, %v2162_v39, 0.0 }
 0x146   : > { %v1230_v24 = vadd.f32 %v1229_v34, %v1228_v18  ;;  %v1033_v26 = vadd.f32 %v1032_v19, %v1031_v15  ;;  %v1134_v15 = vmul.f32 %v2153_v30, %v2153_v30  ;;  %v1251_v34 = vsel %vm878_vm2, %v1133_v9, 0.0 }
 0x147   : > { %v1058_v30 = vsel %vm878_vm2, %v2171_v51, 0.0  ;;  %v1062_v51 = vsel %vm878_vm2, %v2189_v10, 0.0 }
 0x148   : > { %v1035_v28 = vadd.f32 %v1034_v45, %v1033_v26  ;;  %v1232_v31 = vadd.f32 %v1231_v25, %v1230_v24  ;;  %v1253_v25 = vsel %vm878_vm2, %v1134_v15, 0.0 }
 0x14a   : > { %v1234_v48 = vadd.f32 %v1233_v32, %v1232_v31  ;;  %v1037_v38 = vadd.f32 %v1036_v36, %v1035_v28  ;;  %v1255_v31 = vsel %vm878_vm2, %v1135_v20, 0.0  ;;  %v1137_v36 = vmul.f32 %v2162_v39, %v2162_v39 }
 0x14b   : > { %v1064_v39 = vsel %vm878_vm2, %v2180_v63, 0.0 }
 0x14c   : > { %v1039_v43 = vadd.f32 %v1038_v61, %v1037_v38  ;;  %v1236_v44 = vadd.f32 %v1235_v41, %v1234_v48  ;;  %v1257_v48 = vsel %vm878_vm2, %v1136_v27, 0.0  ;;  %v1138_v38 = vmul.f32 %v2189_v10, %v2189_v10 }
 0x14d   : > { %v1259_v61 = vsel %vm878_vm2, %v1137_v36, 0.0  ;;  %v1066_v10 = vsel %vm878_vm2, %v2207_v35, 0.0 }
 0x14e   : > { %v1238_v49 = vadd.f32 %v1237_v46, %v1236_v44  ;;  %v1041_v50 = vadd.f32 %v1040_v52, %v1039_v43  ;;  %v1139_v43 = vmul.f32 %v2180_v63, %v2180_v63  ;;  %v1261_v46 = vsel %vm878_vm2, %v1138_v38, 0.0 }
 0x14f   : > { %v1068_v63 = vsel %vm878_vm2, %v2198_v22, 0.0 }
 0x150   : > { %v1043_v56 = vadd.f32 %v1042_v14, %v1041_v50  ;;  %v1240_v54 = vadd.f32 %v1239_v62, %v1238_v49  ;;  %v1263_v62 = vsel %vm878_vm2, %v1139_v43, 0.0 }
 0x152   : > { %v1242_v59 = vadd.f32 %v1241_v57, %v1240_v54  ;;  %v1045_v0 = vadd.f32 %v1044_v5, %v1043_v56  ;;  %v1265_v54 = vsel %vm878_vm2, %v1140_v47, 0.0 }
 0x154   : > { %v1047_v12 = vadd.f32 %v1046_v33, %v1045_v0  ;;  %v1244_v21 = vadd.f32 %v1243_v1, %v1242_v59 }
 0x156   : > { %v1246_v6 = vadd.f32 %v1245_v3, %v1244_v21  ;;  %v1049_v16 = vadd.f32 %v1048_v23, %v1047_v12 }
 0x158   : > { %v1051_v11 = vadd.f32 %v1050_v53, %v1049_v16  ;;  %v1248_v13 = vadd.f32 %v1247_v7, %v1246_v6 }
 0x15a   : > { %v1250_v18 = vadd.f32 %v1249_v29, %v1248_v13  ;;  %v1053_v19 = vadd.f32 %v1052_v42, %v1051_v11 }
 0x15c   : > { %v1055_v24 = vadd.f32 %v1054_v8, %v1053_v19  ;;  %v1252_v26 = vadd.f32 %v1251_v34, %v1250_v18 }
 0x15e   : > { %v1254_v45 = vadd.f32 %v1253_v25, %v1252_v26  ;;  %v1057_v28 = vadd.f32 %v1056_v60, %v1055_v24 }
 0x160   : > { %v1059_v32 = vadd.f32 %v1058_v30, %v1057_v28  ;;  %v1256_v37 = vadd.f32 %v1255_v31, %v1254_v45 }
 0x162   : > { %v1258_v41 = vadd.f32 %v1257_v48, %v1256_v37  ;;  %v1061_v40 = vadd.f32 %v1060_v17, %v1059_v32 }
 0x164   : > { %v1063_v44 = vadd.f32 %v1062_v51, %v1061_v40  ;;  %v1260_v52 = vadd.f32 %v1259_v61, %v1258_v41 }
 0x166   : > { %v1262_v49 = vadd.f32 %v1261_v46, %v1260_v52  ;;  %v1065_v50 = vadd.f32 %v1064_v39, %v1063_v44 }
 0x168   : > { %v1067_v14 = vadd.f32 %v1066_v10, %v1065_v50  ;;  %v1264_v56 = vadd.f32 %v1263_v62, %v1262_v49 }
 0x16a   : > { %v1069_v5 = vadd.f32 %v1068_v63, %v1067_v14  ;;  %v1266_v57 = vadd.f32 %v1265_v54, %v1264_v56 }
 0x16c   : > { %v1070_v59 = vrot.slane %v1069_v5, 4  ;;  %v1268_v0 = vadd.f32 %v1267_v58, %v1266_v57 }
 0x16e   : > { %v1071_v1 = vadd.f32 %v1070_v59, %v1069_v5  ;;  %v1269_v2 = vrot.slane %v1268_v0, 4 }
 0x170   : > { %v1072_v33 = vrot.slane %v1071_v1, 2  ;;  %v1270_v12 = vadd.f32 %v1269_v2, %v1268_v0 }
 0x172   : > { %v1073_v35 = vadd.f32 %v1072_v33, %v1071_v1  ;;  %v1271_v21 = vrot.slane %v1270_v12, 2 }
 0x174   : > { %v1074_v23 = vrot.slane %v1073_v35, 1  ;;  %v1272_v3 = vadd.f32 %v1271_v21, %v1270_v12 }
 0x176   : > { %v1075_v22 = vadd.f32 %v1074_v23, %v1073_v35  ;;  %v1273_v4 = vrot.slane %v1272_v3, 1 }
 0x178   : > { %1077 = vst.msk [vmem:[%s214_s5] sm:$0x1] %vm1076_vm3, %v1075_v22  ;;  %v1274_v6 = vadd.f32 %v1273_v4, %v1272_v3 }
 0x17a   : > { %1275 = vst.msk [vmem:[%s217_s8] sm:$0x1] %vm1076_vm3, %v1274_v6 }
 0x17b PF: > { %s15_s15 = sadd.s32 1, %s1702_s15  }
 0x17c   : > { %p12_p5 = scmp.ge.s32.totalorder %s15_s15, 4  }
 0x17e   :  { %14 = sbr.rel (!%p12_p5) target bundleno = 1 (0x1), region = 82 }

// kernel: tile.23
= control target key start
LH: loop header
LB: loop body
LE: loop exit
PB: predicated region body
PF: predicated region fallthrough
CT: control target
= control target key end

     0   :  { %s40_s0 = inlined_call_operand.vmem [shape: f32[8], index: 0, kind: input, shape index: {}]   ;;  %s41_s1 = inlined_call_operand.vmem [shape: f32[27,8], index: 1, kind: output, shape index: {}]  }
   0x1   :  { %v4_v0 = vld [vmem:[%s40_s0] ss:$0 sm:$0xff] }
   0x2   :  { %5 = vst [vmem:[%s41_s1] sm:$0xff] %v4_v0  ;;  %12 = vst [vmem:[%s41_s1 + $0x8] sm:$0xff] %v4_v0 }
   0x3   :  { %13 = vst [vmem:[%s41_s1 + $0x10] sm:$0xff] %v4_v0  ;;  %14 = vst [vmem:[%s41_s1 + $0x18] sm:$0xff] %v4_v0 }

// kernel: tile.28
= control target key start
LH: loop header
LB: loop body
LE: loop exit
PB: predicated region body
PF: predicated region fallthrough
CT: control target
= control target key end

     0   :  { %s151_s10 = smov 120   ;;  %s152_s11 = smov 104   ;;  %vm4_vm0 = vcmask 64512   ;;  %vm10_vm1 = vcmask 1048512   ;;  %vm16_vm2 = vcmask 982912   ;;  %vm22_vm3 = vcmask 917312   ;;  %s230_s0 = inlined_call_operand.vmem [shape: f32[27,8], index: 0, kind: input, shape index: {}]   ;;  %s231_s1 = inlined_call_operand.vmem [shape: f32[1,216], index: 1, kind: output, shape index: {}]  }
   0x1   :  { %v120_v0 = vld [vmem:[%s230_s0 + $0xf] sm:$0x1]   ;;  %v122_v1 = vld [vmem:[%s230_s0 + $0xd] sm:$0x1]   ;;  %v121_v2 = vld [vmem:[%s230_s0 + $0xe] sm:$0x1]  }
   0x2   :  { %8 = vrot.lane.b32.xlu0 %v120_v0, %s151_s10  ;;  %20 = vrot.lane.b32.xlu1 %v122_v1, %s152_s11  ;;  %v123_v3 = vld [vmem:[%s230_s0 + $0xc] sm:$0x1]   ;;  %s37_s16 = smov 3  ;;  %s153_s17 = smov 112   ;;  %v124_v4 = vld [vmem:[%s230_s0 + $0xb] sm:$0x1]  }
   0x3   :  { %s154_s18 = smov 96   ;;  %v125_v5 = vld [vmem:[%s230_s0 + $0xa] ss:$16 sm:%s37_s16]   ;;  %s44_s23 = smov 3  ;;  %vm28_vm4 = vcmask 851712   ;;  %vm34_vm5 = vcmask 786112  }
   0x4   :  { %s51_s24 = smov 3  ;;  %s155_s25 = smov 88   ;;  %v126_v6 = vld [vmem:[%s230_s0 + $0x9] ss:$16 sm:%s44_s23]   ;;  %vm41_vm6 = vcmask 720512   ;;  %vm48_vm7 = vcmask 654912  }
   0x5   :  { %s156_s26 = smov 80   ;;  %v127_v7 = vld [vmem:[%s230_s0 + $0x8] ss:$16 sm:%s51_s24]   ;;  %s58_s2 = smov 3  ;;  %vm55_vm8 = vcmask 589312   ;;  %vm62_vm9 = vcmask 523712  }
   0x6   :  { %14 = vrot.lane.b32.xlu0 %v121_v2, %s153_s17  ;;  %26 = vrot.lane.b32.xlu1 %v123_v3, %s154_s18  ;;  %s65_s3 = smov 3  ;;  %s2_s4 = smov 3  ;;  %v128_v9 = vld [vmem:[%s230_s0 + $0x7] ss:$16 sm:%s58_s2]   ;;  %vm69_vm10 = vcmask 458112   ;;  %vm76_vm11 = vcmask 392512  }
   0x7   :  { %s157_s5 = smov 72   ;;  %s158_s6 = smov 64   ;;  %v3_v8 = vld [vmem:[%s230_s0] ss:$16 sm:%s2_s4]   ;;  %v129_v10 = vld [vmem:[%s230_s0 + $0x6] ss:$16 sm:%s65_s3]  }
   0x8   :  { %5 = vst.msk [vmem:[#allocation0] ss:$8 sm:$0x3] %vm4_vm0, %v3_v8   ;;  %s72_s13 = smov 3  ;;  %s79_s14 = smov 3  ;;  %vm83_vm12 = vcmask 326912  }
   0x9   :  { %s159_s15 = smov 56   ;;  %s160_s16 = smov 48   ;;  %v130_v11 = vld [vmem:[%s230_s0 + $0x5] ss:$16 sm:%s72_s13]   ;;  %v131_v12 = vld [vmem:[%s230_s0 + $0x4] ss:$16 sm:%s79_s14]  }
   0xa   :  { %32 = vrot.lane.b32.xlu0 %v124_v4, %s155_s25  ;;  %39 = vrot.lane.b32.xlu1 %v125_v5, %s156_s26  ;;  %s86_s21 = smov 3  ;;  %s93_s22 = smov 3  ;;  %vm90_vm13 = vcmask 261312   ;;  %vm97_vm14 = vcmask 195712   ;;  %vm104_vm15 = vcmask 130112  }
   0xb   :  { %s161_s23 = smov 40   ;;  %s162_s24 = smov 32   ;;  %v132_v13 = vld [vmem:[%s230_s0 + $0x3] ss:$16 sm:%s86_s21]   ;;  %v133_v14 = vld [vmem:[%s230_s0 + $0x2] ss:$16 sm:%s93_s22]  }
   0xc   :  { %s100_s29 = smov 3  ;;  %s163_s30 = smov 24  }
   0xd   :  { %s164_s2 = smov 16   ;;  %v134_v15 = vld [vmem:[%s230_s0 + $0x1] ss:$16 sm:%s100_s29]   ;;  %s165_s0 = smov 8  }
   0xe   :  { %46 = vrot.lane.b32.xlu0 %v126_v6, %s157_s5  ;;  %53 = vrot.lane.b32.xlu1 %v127_v7, %s158_s6 }
  0x12   :  { %60 = vrot.lane.b32.xlu0 %v128_v9, %s159_s15  ;;  %67 = vrot.lane.b32.xlu1 %v129_v10, %s160_s16 }
  0x16   :  { %74 = vrot.lane.b32.xlu0 %v130_v11, %s161_s23  ;;  %81 = vrot.lane.b32.xlu1 %v131_v12, %s162_s24 }
  0x1a   :  { %88 = vrot.lane.b32.xlu0 %v132_v13, %s163_s30  ;;  %95 = vrot.lane.b32.xlu1 %v133_v14, %s164_s2 }
  0x1e   :  { %102 = vrot.lane.b32.xlu0 %v134_v15, %s165_s0 }
  0x74   :  { %v9_v16 = vpop.permute.xlu0 %8   ;;  %v21_v17 = vpop.permute.xlu1 %20  }
  0x75   :  { %11 = vst.msk [vmem:[#allocation0] sm:$0x1] %vm10_vm1, %v9_v16  }
  0x78   :  { %v15_v18 = vpop.permute.xlu0 %14   ;;  %v27_v19 = vpop.permute.xlu1 %26  }
  0x79   :  { %17 = vst.msk [vmem:[#allocation0] sm:$0x1] %vm16_vm2, %v15_v18  }
  0x7a   :  { %23 = vst.msk [vmem:[#allocation0] sm:$0x1] %vm22_vm3, %v21_v17  }
  0x7b   :  { %29 = vst.msk [vmem:[#allocation0] sm:$0x1] %vm28_vm4, %v27_v19  }
  0x7c   :  { %v33_v20 = vpop.permute.xlu0 %32   ;;  %v40_v21 = vpop.permute.xlu1 %39  }
  0x7d   :  { %35 = vst.msk [vmem:[#allocation0] sm:$0x1] %vm34_vm5, %v33_v20  }
  0x7e   :  { %42 = vst.msk [vmem:[#allocation0] ss:$8 sm:$0x3] %vm41_vm6, %v40_v21  }
  0x80   :  { %v47_v22 = vpop.permute.xlu0 %46   ;;  %v54_v23 = vpop.permute.xlu1 %53  }
  0x81   :  { %49 = vst.msk [vmem:[#allocation0] ss:$8 sm:$0x3] %vm48_vm7, %v47_v22  }
  0x82   :  { %56 = vst.msk [vmem:[#allocation0] ss:$8 sm:$0x3] %vm55_vm8, %v54_v23  }
  0x84   :  { %v61_v24 = vpop.permute.xlu0 %60   ;;  %v68_v25 = vpop.permute.xlu1 %67  }
  0x85   :  { %63 = vst.msk [vmem:[#allocation0] ss:$8 sm:$0x3] %vm62_vm9, %v61_v24  }
  0x86   :  { %70 = vst.msk [vmem:[#allocation0] ss:$8 sm:$0x3] %vm69_vm10, %v68_v25  }
  0x88   :  { %v75_v26 = vpop.permute.xlu0 %74   ;;  %v82_v27 = vpop.permute.xlu1 %81  }
  0x89   :  { %77 = vst.msk [vmem:[#allocation0] ss:$8 sm:$0x3] %vm76_vm11, %v75_v26  }
  0x8a   :  { %84 = vst.msk [vmem:[#allocation0] ss:$8 sm:$0x3] %vm83_vm12, %v82_v27  }
  0x8c   :  { %v89_v28 = vpop.permute.xlu0 %88   ;;  %v96_v29 = vpop.permute.xlu1 %95  }
  0x8d   :  { %91 = vst.msk [vmem:[#allocation0] ss:$8 sm:$0x3] %vm90_vm13, %v89_v28  }
  0x8e   :  { %98 = vst.msk [vmem:[#allocation0] ss:$8 sm:$0x3] %vm97_vm14, %v96_v29  }
  0x90   :  { %v103_v30 = vpop.permute.xlu0 %102  }
  0x91   :  { %105 = vst.msk [vmem:[#allocation0] ss:$8 sm:$0x3] %vm104_vm15, %v103_v30  }
  0x98   :  { %v110_v31 = vld [vmem:[#allocation0] sm:$0x1]  ;;  %v115_v32 = vld [vmem:[#allocation0 + $0x8] sm:$0x1] }
  0x99   :  { %113 = vst [vmem:[%s231_s1] sm:$0x1] %v110_v31  ;;  %135 = vst [vmem:[%s231_s1 + $0x1] sm:$0x1] %v115_v32 }

// kernel: tile.33
= control target key start
LH: loop header
LB: loop body
LE: loop exit
PB: predicated region body
PF: predicated region fallthrough
CT: control target
= control target key end

     0   :  { %s28_s0 = inlined_call_operand.vmem [shape: f32[8], index: 0, kind: input, shape index: {}]   ;;  %s29_s1 = inlined_call_operand.vmem [shape: f32[16,8], index: 1, kind: output, shape index: {}]  }
   0x1   :  { %v4_v0 = vld [vmem:[%s28_s0] ss:$0 sm:$0xff] }
   0x2   :  { %5 = vst [vmem:[%s29_s1] sm:$0xff] %v4_v0  ;;  %8 = vst [vmem:[%s29_s1 + $0x8] sm:$0xff] %v4_v0 }

// kernel: tile.34
= control target key start
LH: loop header
LB: loop body
LE: loop exit
PB: predicated region body
PF: predicated region fallthrough
CT: control target
= control target key end

     0   :  { %s133_s10 = smov 120   ;;  %s134_s11 = smov 104   ;;  %vm3_vm0 = vcmask 64512   ;;  %vm9_vm1 = vcmask 1048512   ;;  %vm15_vm2 = vcmask 982912   ;;  %vm21_vm3 = vcmask 917312   ;;  %s209_s0 = inlined_call_operand.vmem [shape: f32[16,8], index: 0, kind: input, shape index: {}]   ;;  %s210_s1 = inlined_call_operand.vmem [shape: f32[1,128], index: 1, kind: output, shape index: {}]  }
   0x1   :  { %v103_v0 = vld [vmem:[%s209_s0 + $0xf] sm:$0x1]   ;;  %v105_v1 = vld [vmem:[%s209_s0 + $0xd] sm:$0x1]   ;;  %v104_v2 = vld [vmem:[%s209_s0 + $0xe] sm:$0x1]  }
   0x2   :  { %7 = vrot.lane.b32.xlu0 %v103_v0, %s133_s10  ;;  %19 = vrot.lane.b32.xlu1 %v105_v1, %s134_s11  ;;  %v106_v3 = vld [vmem:[%s209_s0 + $0xc] sm:$0x1]   ;;  %s135_s16 = smov 112   ;;  %s136_s17 = smov 96   ;;  %v107_v4 = vld [vmem:[%s209_s0 + $0xb] sm:$0x1]  }
   0x3   :  { %v108_v5 = vld [vmem:[%s209_s0 + $0xa] sm:$0x1]   ;;  %v2_v6 = vld [vmem:[%s209_s0] sm:$0x1]   ;;  %s137_s24 = smov 88   ;;  %s138_s25 = smov 80  }
   0x4   :  { %4 = vst.msk [vmem:[#allocation0] sm:$0x1] %vm3_vm0, %v2_v6   ;;  %v109_v7 = vld [vmem:[%s209_s0 + $0x9] sm:$0x1]   ;;  %v110_v8 = vld [vmem:[%s209_s0 + $0x8] sm:$0x1]  }
   0x5   :  { %s139_s30 = smov 72   ;;  %s140_s2 = smov 64   ;;  %v111_v9 = vld [vmem:[%s209_s0 + $0x7] sm:$0x1]   ;;  %v112_v10 = vld [vmem:[%s209_s0 + $0x6] sm:$0x1]  }
   0x6   :  { %13 = vrot.lane.b32.xlu0 %v104_v2, %s135_s16  ;;  %25 = vrot.lane.b32.xlu1 %v106_v3, %s136_s17  ;;  %s141_s7 = smov 56   ;;  %s142_s8 = smov 48   ;;  %v113_v11 = vld [vmem:[%s209_s0 + $0x5] sm:$0x1]   ;;  %v114_v12 = vld [vmem:[%s209_s0 + $0x4] sm:$0x1]  }
   0x7   :  { %s143_s13 = smov 40   ;;  %s144_s14 = smov 32   ;;  %v115_v13 = vld [vmem:[%s209_s0 + $0x3] sm:$0x1]   ;;  %v116_v14 = vld [vmem:[%s209_s0 + $0x2] sm:$0x1]  }
   0x8   :  { %s145_s19 = smov 24   ;;  %s146_s20 = smov 16   ;;  %v117_v15 = vld [vmem:[%s209_s0 + $0x1] sm:$0x1]   ;;  %vm27_vm4 = vcmask 851712   ;;  %vm33_vm5 = vcmask 786112  }
   0x9   :  { %s147_s0 = smov 8   ;;  %vm39_vm6 = vcmask 720512   ;;  %vm45_vm7 = vcmask 654912   ;;  %vm51_vm8 = vcmask 589312   ;;  %vm57_vm9 = vcmask 523712  }
   0xa   :  { %31 = vrot.lane.b32.xlu0 %v107_v4, %s137_s24  ;;  %37 = vrot.lane.b32.xlu1 %v108_v5, %s138_s25  ;;  %vm63_vm10 = vcmask 458112   ;;  %vm69_vm11 = vcmask 392512   ;;  %vm75_vm12 = vcmask 326912   ;;  %vm81_vm13 = vcmask 261312  }
   0xb   :  { %vm87_vm14 = vcmask 195712   ;;  %vm93_vm15 = vcmask 130112  }
   0xe   :  { %43 = vrot.lane.b32.xlu0 %v109_v7, %s139_s30  ;;  %49 = vrot.lane.b32.xlu1 %v110_v8, %s140_s2 }
  0x12   :  { %55 = vrot.lane.b32.xlu0 %v111_v9, %s141_s7  ;;  %61 = vrot.lane.b32.xlu1 %v112_v10, %s142_s8 }
  0x16   :  { %67 = vrot.lane.b32.xlu0 %v113_v11, %s143_s13  ;;  %73 = vrot.lane.b32.xlu1 %v114_v12, %s144_s14 }
  0x1a   :  { %79 = vrot.lane.b32.xlu0 %v115_v13, %s145_s19  ;;  %85 = vrot.lane.b32.xlu1 %v116_v14, %s146_s20 }
  0x1e   :  { %91 = vrot.lane.b32.xlu0 %v117_v15, %s147_s0 }
  0x74   :  { %v8_v16 = vpop.permute.xlu0 %7   ;;  %v20_v17 = vpop.permute.xlu1 %19  }
  0x75   :  { %10 = vst.msk [vmem:[#allocation0] sm:$0x1] %vm9_vm1, %v8_v16  }
  0x78   :  { %v14_v18 = vpop.permute.xlu0 %13   ;;  %v26_v19 = vpop.permute.xlu1 %25  }
  0x79   :  { %16 = vst.msk [vmem:[#allocation0] sm:$0x1] %vm15_vm2, %v14_v18  }
  0x7a   :  { %22 = vst.msk [vmem:[#allocation0] sm:$0x1] %vm21_vm3, %v20_v17  }
  0x7b   :  { %28 = vst.msk [vmem:[#allocation0] sm:$0x1] %vm27_vm4, %v26_v19  }
  0x7c   :  { %v32_v20 = vpop.permute.xlu0 %31   ;;  %v38_v21 = vpop.permute.xlu1 %37  }
  0x7d   :  { %34 = vst.msk [vmem:[#allocation0] sm:$0x1] %vm33_vm5, %v32_v20  }
  0x7e   :  { %40 = vst.msk [vmem:[#allocation0] sm:$0x1] %vm39_vm6, %v38_v21  }
  0x80   :  { %v44_v22 = vpop.permute.xlu0 %43   ;;  %v50_v23 = vpop.permute.xlu1 %49  }
  0x81   :  { %46 = vst.msk [vmem:[#allocation0] sm:$0x1] %vm45_vm7, %v44_v22  }
  0x82   :  { %52 = vst.msk [vmem:[#allocation0] sm:$0x1] %vm51_vm8, %v50_v23  }
  0x84   :  { %v56_v24 = vpop.permute.xlu0 %55   ;;  %v62_v25 = vpop.permute.xlu1 %61  }
  0x85   :  { %58 = vst.msk [vmem:[#allocation0] sm:$0x1] %vm57_vm9, %v56_v24  }
  0x86   :  { %64 = vst.msk [vmem:[#allocation0] sm:$0x1] %vm63_vm10, %v62_v25  }
  0x88   :  { %v68_v26 = vpop.permute.xlu0 %67   ;;  %v74_v27 = vpop.permute.xlu1 %73  }
  0x89   :  { %70 = vst.msk [vmem:[#allocation0] sm:$0x1] %vm69_vm11, %v68_v26  }
  0x8a   :  { %76 = vst.msk [vmem:[#allocation0] sm:$0x1] %vm75_vm12, %v74_v27  }
  0x8c   :  { %v80_v28 = vpop.permute.xlu0 %79   ;;  %v86_v29 = vpop.permute.xlu1 %85  }
  0x8d   :  { %82 = vst.msk [vmem:[#allocation0] sm:$0x1] %vm81_vm13, %v80_v28  }
  0x8e   :  { %88 = vst.msk [vmem:[#allocation0] sm:$0x1] %vm87_vm14, %v86_v29  }
  0x90   :  { %v92_v30 = vpop.permute.xlu0 %91  }
  0x91   :  { %94 = vst.msk [vmem:[#allocation0] sm:$0x1] %vm93_vm15, %v92_v30  }
  0x98   :  { %v99_v31 = vld [vmem:[#allocation0] sm:$0x1] }
  0x99   :  { %102 = vst [vmem:[%s210_s1] sm:$0x1] %v99_v31 }

// kernel: double_conv.4
= control target key start
LH: loop header
LB: loop body
LE: loop exit
PB: predicated region body
PF: predicated region fallthrough
CT: control target
= control target key end

     0   :  { %s2104_s21 = smov 0   ;;  %s3335_s0 = inlined_call_operand.vmem [shape: f32[1024,216], index: 0, kind: input, shape index: {}]   ;;  %s3336_s1 = inlined_call_operand.vmem [shape: f32[1,216], index: 1, kind: input, shape index: {}]   ;;  %s3337_s2 = inlined_call_operand.vmem [shape: f32[1,216], index: 2, kind: input, shape index: {}]   ;;  %s3338_s3 = inlined_call_operand.vmem [shape: f32[216,8], index: 3, kind: input, shape index: {}]   ;;  %s3339_s4 = inlined_call_operand.vmem [shape: f32[1024,8], index: 4, kind: output, shape index: {0}]   ;;  %s3340_s5 = inlined_call_operand.vmem [shape: f32[2,1,8], index: 5, kind: output, shape index: {1}]   ;;  %s3341_s6 = inlined_call_operand.vmem [shape: f32[2,1,8], index: 6, kind: output, shape index: {2}]  }
   0x1 LB: > { %s2110_s22 = sadd.s32 4294967295, %s2066_s21   ;;  %p1924_p0 = scmp.ge.s32.totalorder %s2066_s21, 1  ;;  %s2066_s21 = sphi %s2104_s21, %s17_s21  }
   0x2   : > { %p219_p1 = scmp.lt.s32.totalorder %s2066_s21, 3 }
   0x4   : > { %p220_p2 = pnand %p1924_p0, %p219_p1 }
   0x5   : > { %s1925_s25 = sshll.u32 (!%p220_p2), %s2110_s22, 6  ;;  %p269_p4 = scmp.lt.s32.totalorder (!%p220_p2), %s2110_s22, 1 }
   0x6   : > { %223 = sbr.rel (%p220_p2) target bundleno = 465 (0x1d1), region = 36  ;;  %p257_p3 = scmp.lt.s32.totalorder (!%p220_p2), %s1925_s25, 127 }
   0xb   : > { %v826_v0 = vld [vmem:[%s3338_s3 + $0x78] sm:$0xff]  ;;  %v405_v1 = vlaneseq  ;;  %v2068_v2 = vmov 0.0   ;;  %v825_v3 = vld [vmem:[%s3338_s3 + $0x70] sm:$0xff]  ;;  %v824_v5 = vld [vmem:[%s3338_s3 + $0x68] sm:$0xff]  ;;  %s3343_s25 = smov (!%p257_p3, %s1925_s25), 127  ;;  %vm838_vm0 = vcmask 719872  }
   0xc   : > { %1031 = vmatprep.subr.mxu0 %v2068_v2  ;;  %1997 = vmatprep.subr.mxu1 %v2068_v2  ;;  %v823_v6 = vld [vmem:[%s3338_s3 + $0x60] sm:$0xff]  ;;  %s1996_s8 = sshll.u32 %s3343_s25, 4  ;;  %v822_v8 = vld [vmem:[%s3338_s3 + $0x58] sm:$0xff]  ;;  %v821_v9 = vld [vmem:[%s3338_s3 + $0x50] sm:$0xff]  ;;  %vm1416_vm1 = vcmask 64512   ;;  %s3345_s22 = smov (!%p269_p4, %s2110_s22), 1 }
   0xd   : > { %1032 = vmatpush1.msra.mxu0 %v826_v0  ;;  %v2123_v4 = vshrl.u32 %v405_v1, 7  ;;  %2024 = vmatpush1.msra.mxu1 %v826_v0  ;;  %s2141_s11 = scalar_lea.vmem %s3335_s0, %s1996_s8  ;;  %v2157_v11 = vld [vmem:[%s3336_s1] sm:$0x3]  ;;  %v820_v15 = vld [vmem:[%s3338_s3 + $0x48] sm:$0xff]  ;;  %v818_v19 = vld [vmem:[%s3338_s3 + $0x38] sm:$0xff]  ;;  %s271_s29 = scalar_lea.vmem %s3340_s5, %s3345_s22  ;;  %vm1614_vm2 = vcmask 57344  }
   0xe   : > { %1033 = vmatprep.subr.mxu0 %v2068_v2  ;;  %1998 = vmatprep.subr.mxu1 %v2068_v2  ;;  %v276_v10 = vld [vmem:[%s2141_s11 + $0x8] sm:$0xff]  ;;  %v2162_v12 = vld [vmem:[%s3337_s2] sm:$0x3]  ;;  %v817_v21 = vld [vmem:[%s3338_s3 + $0x30] sm:$0xff]  ;;  %s274_s8 = scalar_lea.vmem %s3341_s6, %s3345_s22 }
   0xf   : > { %1034 = vmatpush1.msra.mxu0 %v825_v3  ;;  %2025 = vmatpush1.msra.mxu1 %v825_v3  ;;  %v411_v7 = vsub.s32 1, %v2123_v4  ;;  %v819_v17 = vld [vmem:[%s3338_s3 + $0x40] sm:$0xff]  ;;  %v816_v22 = vld [vmem:[%s3338_s3 + $0x28] sm:$0xff]  ;;  %v814_v24 = vld [vmem:[%s3338_s3 + $0x18] sm:$0xff]  ;;  %v407_v31 = vsub.s32 0, %v2123_v4 }
  0x10   : > { %1035 = vmatprep.subr.mxu0 %v2068_v2  ;;  %1999 = vmatprep.subr.mxu1 %v2068_v2  ;;  %v815_v23 = vld [vmem:[%s3338_s3 + $0x20] sm:$0xff]  ;;  %v813_v25 = vld [vmem:[%s3338_s3 + $0x10] sm:$0xff]  ;;  %v812_v26 = vld [vmem:[%s3338_s3 + $0x8] sm:$0xff] }
  0x11   : > { %1036 = vmatpush1.msra.mxu0 %v824_v5  ;;  %2026 = vmatpush1.msra.mxu1 %v824_v5  ;;  %v2166_v13 = vrot.slane %v2157_v11, %v411_v7  ;;  %v2169_v14 = vrot.slane %v2162_v12, %v411_v7  ;;  %v811_v27 = vld [vmem:[%s3338_s3] sm:$0xff]  ;;  %v837_v28 = vld [vmem:[%s3338_s3 + $0xd0] sm:$0xff]  ;;  %v836_v29 = vld [vmem:[%s3338_s3 + $0xc8] sm:$0xff]  ;;  %v2247_v34 = vrot.slane %v2157_v11, %v407_v31 }
  0x12   : > { %1037 = vmatprep.subr.mxu0 %v2068_v2  ;;  %2000 = vmatprep.subr.mxu1 %v2068_v2  ;;  %v835_v30 = vld [vmem:[%s3338_s3 + $0xc0] sm:$0xff]  ;;  %v834_v32 = vld [vmem:[%s3338_s3 + $0xb8] sm:$0xff]  ;;  %v833_v33 = vld [vmem:[%s3338_s3 + $0xb0] sm:$0xff]  ;;  %v2263_v40 = vrot.slane %v2162_v12, %v407_v31 }
  0x13   : > { %1038 = vmatpush1.msra.mxu0 %v823_v6  ;;  %2027 = vmatpush1.msra.mxu1 %v823_v6  ;;  %v416_v16 = vmul.f32 %v2166_v13, %v276_v10  ;;  %v275_v35 = vld [vmem:[%s2141_s11] sm:$0xff]  ;;  %v832_v36 = vld [vmem:[%s3338_s3 + $0xa8] sm:$0xff]  ;;  %v278_v37 = vld [vmem:[%s2141_s11 + $0x18] sm:$0xff] }
  0x14   : > { %1039 = vmatprep.subr.mxu0 %v2068_v2  ;;  %2001 = vmatprep.subr.mxu1 %v2068_v2  ;;  %v340_v38 = vld [vmem:[%s2141_s11 + $0x208] sm:$0xff]  ;;  %v831_v39 = vld [vmem:[%s3338_s3 + $0xa0] sm:$0xff]  ;;  %v415_v41 = vmul.f32 %v2247_v34, %v275_v35  ;;  %v418_v42 = vmul.f32 %v2166_v13, %v278_v37  ;;  %v277_v43 = vld [vmem:[%s2141_s11 + $0x10] sm:$0xff] }
  0x15   : > { %1040 = vmatpush1.msra.mxu0 %v822_v8  ;;  %2028 = vmatpush1.msra.mxu1 %v822_v8  ;;  %v556_v18 = vadd.f32 %v2169_v14, %v416_v16  ;;  %v830_v44 = vld [vmem:[%s3338_s3 + $0x98] sm:$0xff]  ;;  %v280_v45 = vld [vmem:[%s2141_s11 + $0x28] sm:$0xff]  ;;  %v480_v46 = vmul.f32 %v2166_v13, %v340_v38  ;;  %v339_v47 = vld [vmem:[%s2141_s11 + $0x200] sm:$0xff]  ;;  %v417_v50 = vmul.f32 %v2247_v34, %v277_v43 }
  0x16   : > { %1041 = vmatprep.subr.mxu0 %v2068_v2  ;;  %2002 = vmatprep.subr.mxu1 %v2068_v2  ;;  %v829_v48 = vld [vmem:[%s3338_s3 + $0x90] sm:$0xff]  ;;  %v555_v49 = vadd.f32 %v2263_v40, %v415_v41  ;;  %v342_v51 = vld [vmem:[%s2141_s11 + $0x218] sm:$0xff]  ;;  %v558_v52 = vadd.f32 %v2169_v14, %v418_v42  ;;  %v420_v53 = vmul.f32 %v2166_v13, %v280_v45  ;;  %v279_v54 = vld [vmem:[%s2141_s11 + $0x20] sm:$0xff] }
  0x17   : > { %1042 = vmatpush1.msra.mxu0 %v821_v9  ;;  %v684_v20 = vmax.f32 %v556_v18, 0.0  ;;  %2029 = vmatpush1.msra.mxu1 %v821_v9  ;;  %v828_v55 = vld [vmem:[%s3338_s3 + $0x88] sm:$0xff]  ;;  %v282_v56 = vld [vmem:[%s2141_s11 + $0x38] sm:$0xff]  ;;  %v620_v57 = vadd.f32 %v2169_v14, %v480_v46  ;;  %v479_v58 = vmul.f32 %v2247_v34, %v339_v47  ;;  %v482_v59 = vmul.f32 %v2166_v13, %v342_v51  ;;  %v341_v60 = vld [vmem:[%s2141_s11 + $0x210] sm:$0xff] }
  0x18   : > { %1043 = vmatprep.subr.mxu0 %v2068_v2  ;;  %2003 = vmatprep.subr.mxu1 %v2068_v2  ;;  %v827_v61 = vld [vmem:[%s3338_s3 + $0x80] sm:$0xff]  ;;  %v683_v62 = vmax.f32 %v555_v49, 0.0  ;;  %v557_v63 = vadd.f32 %v2263_v40, %v417_v50  ;;  %v419_v0 = vmul.f32 %v2247_v34, %v279_v54  ;;  %v344_v1 = vld [vmem:[%s2141_s11 + $0x228] sm:$0xff]  ;;  %v686_v3 = vmax.f32 %v558_v52, 0.0  ;;  %v281_v6 = vld [vmem:[%s2141_s11 + $0x30] sm:$0xff] }
  0x19   : > { %1044 = vmatpush1.msra.mxu0 %v820_v15  ;;  %1930 = vmatprep.mubr.msk.f32.mxu0 %vm838_vm0, %v684_v20  ;;  %v560_v4 = vadd.f32 %v2169_v14, %v420_v53  ;;  %v422_v5 = vmul.f32 %v2166_v13, %v282_v56  ;;  %v284_v7 = vld [vmem:[%s2141_s11 + $0x48] sm:$0xff]  ;;  %v748_v8 = vmax.f32 %v620_v57, 0.0  ;;  %v619_v9 = vadd.f32 %v2263_v40, %v479_v58  ;;  %v345_v31 = vld [vmem:[%s2141_s11 + $0x230] sm:$0xff]  ;;  %v350_v52 = vld [vmem:[%s2141_s11 + $0x258] sm:$0xff] }
  0x1a   : > { %1045 = vmatprep.subr.mxu0 %v2068_v2  ;;  %2030 = vmatpush1.msra.mxu1 %v820_v15  ;;  %v481_v10 = vmul.f32 %v2247_v34, %v341_v60  ;;  %v622_v11 = vadd.f32 %v2169_v14, %v482_v59  ;;  %v484_v12 = vmul.f32 %v2166_v13, %v344_v1  ;;  %v343_v15 = vld [vmem:[%s2141_s11 + $0x220] sm:$0xff]  ;;  %v685_v16 = vmax.f32 %v557_v63, 0.0  ;;  %v285_v41 = vld [vmem:[%s2141_s11 + $0x50] sm:$0xff]  ;;  %v288_v42 = vld [vmem:[%s2141_s11 + $0x68] sm:$0xff] }
  0x1b   : > { %1046 = vmatpush1.msra.mxu0 %v819_v17  ;;  %2004 = vmatprep.subr.mxu1 %v2068_v2  ;;  %v421_v18 = vmul.f32 %v2247_v34, %v281_v6  ;;  %v688_v20 = vmax.f32 %v560_v4, 0.0  ;;  %v425_v51 = vmul.f32 %v2247_v34, %v285_v41  ;;  %v287_v56 = vld [vmem:[%s2141_s11 + $0x60] sm:$0xff]  ;;  %v290_v57 = vld [vmem:[%s2141_s11 + $0x78] sm:$0xff]  ;;  %v490_v63 = vmul.f32 %v2166_v13, %v350_v52  ;;  %v356_v41 = vld [vmem:[%s2141_s11 + $0x288] sm:$0xff] }
  0x1c   : > { %1047 = vmatprep.subr.mxu0 %v2068_v2  ;;  %2031 = vmatpush1.msra.mxu1 %v819_v17  ;;  %v559_v17 = vadd.f32 %v2263_v40, %v419_v0  ;;  %v349_v0 = vld [vmem:[%s2141_s11 + $0x250] sm:$0xff]  ;;  %v427_v4 = vmul.f32 %v2247_v34, %v287_v56  ;;  %v355_v52 = vld [vmem:[%s2141_s11 + $0x280] sm:$0xff]  ;;  %v358_v56 = vld [vmem:[%s2141_s11 + $0x298] sm:$0xff] }
  0x1d   : > { %1048 = vmatpush1.msra.mxu0 %v818_v19  ;;  %2005 = vmatprep.subr.mxu1 %v2068_v2 }
  0x1e   : > { %1049 = vmatprep.subr.mxu0 %v2068_v2  ;;  %2032 = vmatpush1.msra.mxu1 %v818_v19  ;;  %v346_v19 = vld [vmem:[%s2141_s11 + $0x238] sm:$0xff] }
  0x1f   : > { %1050 = vmatpush1.msra.mxu0 %v817_v21  ;;  %2006 = vmatprep.subr.mxu1 %v2068_v2 }
  0x20   : > { %1051 = vmatprep.subr.mxu0 %v2068_v2  ;;  %2033 = vmatpush1.msra.mxu1 %v817_v21  ;;  %v562_v21 = vadd.f32 %v2169_v14, %v422_v5  ;;  %v352_v5 = vld [vmem:[%s2141_s11 + $0x268] sm:$0xff] }
  0x21   : > { %1052 = vmatpush1.msra.mxu0 %v816_v22  ;;  %2007 = vmatprep.subr.mxu1 %v2068_v2 }
  0x22   : > { %1053 = vmatprep.subr.mxu0 %v2068_v2  ;;  %2034 = vmatpush1.msra.mxu1 %v816_v22  ;;  %v424_v22 = vmul.f32 %v2166_v13, %v284_v7  ;;  %v690_v37 = vmax.f32 %v562_v21, 0.0  ;;  %v567_v21 = vadd.f32 %v2263_v40, %v427_v4  ;;  %v498_v4 = vmul.f32 %v2166_v13, %v358_v56  ;;  %v363_v56 = vld [vmem:[%s2141_s11 + $0x2c0] sm:$0xff] }
  0x23   : > { %1054 = vmatpush1.msra.mxu0 %v815_v23  ;;  %2008 = vmatprep.subr.mxu1 %v2068_v2 }
  0x24   : > { %1055 = vmatprep.subr.mxu0 %v2068_v2  ;;  %2035 = vmatpush1.msra.mxu1 %v815_v23  ;;  %v283_v23 = vld [vmem:[%s2141_s11 + $0x40] sm:$0xff]  ;;  %v564_v38 = vadd.f32 %v2169_v14, %v424_v22 }
  0x25   : > { %1056 = vmatpush1.msra.mxu0 %v814_v24  ;;  %2009 = vmatprep.subr.mxu1 %v2068_v2  ;;  %v423_v35 = vmul.f32 %v2247_v34, %v283_v23  ;;  %v354_v23 = vld [vmem:[%s2141_s11 + $0x278] sm:$0xff] }
  0x26   : > { %1057 = vmatprep.subr.mxu0 %v2068_v2  ;;  %2036 = vmatpush1.msra.mxu1 %v814_v24  ;;  %v286_v24 = vld [vmem:[%s2141_s11 + $0x58] sm:$0xff]  ;;  %v692_v53 = vmax.f32 %v564_v38, 0.0 }
  0x27   : > { %1058 = vmatpush1.msra.mxu0 %v813_v25  ;;  %2010 = vmatprep.subr.mxu1 %v2068_v2  ;;  %v563_v50 = vadd.f32 %v2263_v40, %v423_v35  ;;  %v494_v35 = vmul.f32 %v2166_v13, %v354_v23  ;;  %v359_v23 = vld [vmem:[%s2141_s11 + $0x2a0] sm:$0xff] }
  0x28   : > { %1059 = vmatprep.subr.mxu0 %v2068_v2  ;;  %2037 = vmatpush1.msra.mxu1 %v813_v25  ;;  %v747_v25 = vmax.f32 %v619_v9, 0.0  ;;  %v289_v9 = vld [vmem:[%s2141_s11 + $0x70] sm:$0xff] }
  0x29   : > { %1060 = vmatpush1.msra.mxu0 %v812_v26  ;;  %2011 = vmatprep.subr.mxu1 %v2068_v2  ;;  %v691_v1 = vmax.f32 %v563_v50, 0.0  ;;  %v429_v22 = vmul.f32 %v2247_v34, %v289_v9  ;;  %v634_v50 = vadd.f32 %v2169_v14, %v494_v35  ;;  %v360_v9 = vld [vmem:[%s2141_s11 + $0x2a8] sm:$0xff] }
  0x2a   : > { %1061 = vmatprep.subr.mxu0 %v2068_v2  ;;  %2038 = vmatpush1.msra.mxu1 %v812_v26  ;;  %v621_v26 = vadd.f32 %v2263_v40, %v481_v10  ;;  %v292_v10 = vld [vmem:[%s2141_s11 + $0x88] sm:$0xff] }
  0x2b   : > { %1062 = vmatpush1.msra.mxu0 %v811_v27  ;;  %2012 = vmatprep.subr.mxu1 %v2068_v2  ;;  %v569_v38 = vadd.f32 %v2263_v40, %v429_v22  ;;  %v500_v22 = vmul.f32 %v2166_v13, %v360_v9  ;;  %v365_v9 = vld [vmem:[%s2141_s11 + $0x2d0] sm:$0xff] }
  0x2c   : > { %1073 = vmatprep.subr.mxu0 %v2068_v2  ;;  %2039 = vmatpush1.msra.mxu1 %v811_v27  ;;  %v483_v27 = vmul.f32 %v2247_v34, %v343_v15  ;;  %v749_v43 = vmax.f32 %v621_v26, 0.0  ;;  %v489_v15 = vmul.f32 %v2247_v34, %v349_v0  ;;  %v432_v26 = vmul.f32 %v2166_v13, %v292_v10 }
  0x2d   : > { %1074 = vmatpush2.msra.mxu0 %v837_v28  ;;  %2013 = vmatprep.subr.mxu1 %v2068_v2  ;;  %v495_v0 = vmul.f32 %v2247_v34, %v355_v52 }
  0x2e   : > { %1075 = vmatprep.subr.mxu0 %v2068_v2  ;;  %2040 = vmatpush2.msra.mxu1 %v837_v28  ;;  %v750_v28 = vmax.f32 %v622_v11, 0.0 }
  0x2f   : > { %1076 = vmatpush2.msra.mxu0 %v836_v29  ;;  %2014 = vmatprep.subr.mxu1 %v2068_v2 }
  0x30   : > { %1077 = vmatprep.subr.mxu0 %v2068_v2  ;;  %2041 = vmatpush2.msra.mxu1 %v836_v29  ;;  %v624_v29 = vadd.f32 %v2169_v14, %v484_v12 }
  0x31   : > { %1078 = vmatpush2.msra.mxu0 %v835_v30  ;;  %2015 = vmatprep.subr.mxu1 %v2068_v2 }
  0x32   : > { %1079 = vmatprep.subr.mxu0 %v2068_v2  ;;  %2042 = vmatpush2.msra.mxu1 %v835_v30  ;;  %v486_v30 = vmul.f32 %v2166_v13, %v346_v19  ;;  %v752_v45 = vmax.f32 %v624_v29, 0.0  ;;  %v351_v19 = vld [vmem:[%s2141_s11 + $0x260] sm:$0xff] }
  0x33   : > { %1080 = vmatpush2.msra.mxu0 %v834_v32  ;;  %2016 = vmatprep.subr.mxu1 %v2068_v2 }
  0x34   : > { %1081 = vmatprep.subr.mxu0 %v2068_v2  ;;  %2043 = vmatpush2.msra.mxu1 %v834_v32  ;;  %v687_v32 = vmax.f32 %v559_v17, 0.0  ;;  %v626_v46 = vadd.f32 %v2169_v14, %v486_v30  ;;  %v630_v17 = vadd.f32 %v2169_v14, %v490_v63  ;;  %v629_v30 = vadd.f32 %v2263_v40, %v489_v15  ;;  %v297_v15 = vld [vmem:[%s2141_s11 + $0xb0] sm:$0xff] }
  0x35   : > { %1082 = vmatpush2.msra.mxu0 %v833_v33  ;;  %2017 = vmatprep.subr.mxu1 %v2068_v2 }
  0x36   : > { %1083 = vmatprep.subr.mxu0 %v2068_v2  ;;  %2044 = vmatpush2.msra.mxu1 %v833_v33  ;;  %v561_v33 = vadd.f32 %v2263_v40, %v421_v18  ;;  %v492_v18 = vmul.f32 %v2166_v13, %v352_v5  ;;  %v357_v5 = vld [vmem:[%s2141_s11 + $0x290] sm:$0xff] }
  0x37   : > { %1084 = vmatpush2.msra.mxu0 %v832_v36  ;;  %2018 = vmatprep.subr.mxu1 %v2068_v2 }
  0x38   : > { %1085 = vmatprep.subr.mxu0 %v2068_v2  ;;  %2045 = vmatpush2.msra.mxu1 %v832_v36  ;;  %v348_v36 = vld [vmem:[%s2141_s11 + $0x248] sm:$0xff]  ;;  %v689_v49 = vmax.f32 %v561_v33, 0.0  ;;  %v632_v33 = vadd.f32 %v2169_v14, %v492_v18  ;;  %v635_v18 = vadd.f32 %v2263_v40, %v495_v0  ;;  %v303_v0 = vld [vmem:[%s2141_s11 + $0xe0] sm:$0xff] }
  0x39   : > { %1086 = vmatpush2.msra.mxu0 %v831_v39  ;;  %2019 = vmatprep.subr.mxu1 %v2068_v2  ;;  %v488_v47 = vmul.f32 %v2166_v13, %v348_v36  ;;  %v353_v36 = vld [vmem:[%s2141_s11 + $0x270] sm:$0xff] }
  0x3a   : > { %1087 = vmatprep.subr.mxu0 %v2068_v2  ;;  %2046 = vmatpush2.msra.mxu1 %v831_v39  ;;  %v426_v39 = vmul.f32 %v2166_v13, %v286_v24 }
  0x3b   : > { %1088 = vmatpush2.msra.mxu0 %v830_v44  ;;  %2020 = vmatprep.subr.mxu1 %v2068_v2 }
  0x3c   : > { %1089 = vmatprep.subr.mxu0 %v2068_v2  ;;  %2047 = vmatpush2.msra.mxu1 %v830_v44  ;;  %v623_v44 = vadd.f32 %v2263_v40, %v483_v27  ;;  %v566_v54 = vadd.f32 %v2169_v14, %v426_v39  ;;  %v291_v27 = vld [vmem:[%s2141_s11 + $0x80] sm:$0xff] }
  0x3d   : > { %1090 = vmatpush2.msra.mxu0 %v829_v48  ;;  %2021 = vmatprep.subr.mxu1 %v2068_v2  ;;  %v431_v39 = vmul.f32 %v2247_v34, %v291_v27  ;;  %v362_v27 = vld [vmem:[%s2141_s11 + $0x2b8] sm:$0xff] }
  0x3e   : > { %1091 = vmatprep.subr.mxu0 %v2068_v2  ;;  %2048 = vmatpush2.msra.mxu1 %v829_v48  ;;  %v347_v48 = vld [vmem:[%s2141_s11 + $0x240] sm:$0xff]  ;;  %v751_v58 = vmax.f32 %v623_v44, 0.0  ;;  %v694_v6 = vmax.f32 %v566_v54, 0.0 }
  0x3f   : > { %1092 = vmatpush2.msra.mxu0 %v828_v55  ;;  %2022 = vmatprep.subr.mxu1 %v2068_v2  ;;  %v487_v60 = vmul.f32 %v2247_v34, %v347_v48  ;;  %v493_v48 = vmul.f32 %v2247_v34, %v353_v36  ;;  %v571_v54 = vadd.f32 %v2263_v40, %v431_v39 }
  0x40   : > { %1093 = vmatprep.subr.mxu0 %v2068_v2  ;;  %1962 = vmatprep.mubr.msk.f32.mxu1 %vm838_vm0, %v748_v8  ;;  %v430_v8 = vmul.f32 %v2166_v13, %v290_v57  ;;  %v499_v36 = vmul.f32 %v2247_v34, %v359_v23  ;;  %v502_v39 = vmul.f32 %v2166_v13, %v362_v27  ;;  %v367_v27 = vld [vmem:[%s2141_s11 + $0x2e0] sm:$0xff] }
  0x41   : > { %1094 = vmatpush2.msra.mxu0 %v827_v61  ;;  %2049 = vmatpush2.msra.mxu1 %v828_v55  ;;  %v428_v55 = vmul.f32 %v2166_v13, %v288_v42  ;;  %v627_v12 = vadd.f32 %v2263_v40, %v487_v60  ;;  %v295_v60 = vld [vmem:[%s2141_s11 + $0xa0] sm:$0xff]  ;;  %v633_v63 = vadd.f32 %v2263_v40, %v493_v48  ;;  %v301_v48 = vld [vmem:[%s2141_s11 + $0xd0] sm:$0xff] }
  0x42   : > { %1096 = vmatmul.mubr.f32.vlgmr.msra.gmra.mxu0 %v683_v62  ;;  %2023 = vmatprep.subr.mxu1 %v2068_v2  ;;  %v485_v2 = vmul.f32 %v2247_v34, %v345_v31  ;;  %v628_v62 = vadd.f32 %v2169_v14, %v488_v47  ;;  %v491_v31 = vmul.f32 %v2247_v34, %v351_v19 }
  0x43   : > { %1931 = vmatprep.mubr.msk.f32.mxu0 %vm838_vm0, %v686_v3  ;;  %2050 = vmatpush2.msra.mxu1 %v827_v61  ;;  %v754_v61 = vmax.f32 %v626_v46, 0.0  ;;  %v565_v3 = vadd.f32 %v2263_v40, %v425_v51  ;;  %v568_v7 = vadd.f32 %v2169_v14, %v428_v55  ;;  %v755_v29 = vmax.f32 %v627_v12, 0.0 }
  0x44   : > { %1256 = vmatmul.mubr.f32.vlgmr.msra.gmra.mxu1 %v747_v25  ;;  %v625_v59 = vadd.f32 %v2263_v40, %v485_v2  ;;  %v570_v25 = vadd.f32 %v2169_v14, %v430_v8  ;;  %v293_v2 = vld [vmem:[%s2141_s11 + $0x90] sm:$0xff]  ;;  %v757_v46 = vmax.f32 %v629_v30, 0.0  ;;  %v631_v47 = vadd.f32 %v2263_v40, %v491_v31  ;;  %v299_v31 = vld [vmem:[%s2141_s11 + $0xc0] sm:$0xff] }
  0x45   : > { %1963 = vmatprep.mubr.msk.f32.mxu1 %vm838_vm0, %v750_v28  ;;  %v696_v24 = vmax.f32 %v568_v7, 0.0  ;;  %v294_v28 = vld [vmem:[%s2141_s11 + $0x98] sm:$0xff]  ;;  %v496_v51 = vmul.f32 %v2166_v13, %v356_v41  ;;  %v433_v55 = vmul.f32 %v2247_v34, %v293_v2  ;;  %v435_v8 = vmul.f32 %v2247_v34, %v295_v60  ;;  %v361_v41 = vld [vmem:[%s2141_s11 + $0x2b0] sm:$0xff]  ;;  %v364_v2 = vld [vmem:[%s2141_s11 + $0x2c8] sm:$0xff] }
  0x46   : > { %1101 = vmatmul.mubr.f32.gmra.mxu0 %v685_v16  ;;  %v753_v11 = vmax.f32 %v625_v59, 0.0  ;;  %v756_v16 = vmax.f32 %v628_v62, 0.0  ;;  %v698_v42 = vmax.f32 %v570_v25, 0.0  ;;  %v434_v44 = vmul.f32 %v2166_v13, %v294_v28  ;;  %v366_v60 = vld [vmem:[%s2141_s11 + $0x2d8] sm:$0xff] }
  0x47   : > { %1932 = vmatprep.mubr.msk.f32.mxu0 %vm838_vm0, %v688_v20  ;;  %v693_v20 = vmax.f32 %v565_v3, 0.0  ;;  %v759_v62 = vmax.f32 %v631_v47, 0.0  ;;  %v636_v3 = vadd.f32 %v2169_v14, %v496_v51  ;;  %v573_v7 = vadd.f32 %v2263_v40, %v433_v55 }
  0x48   : > { %1261 = vmatmul.mubr.f32.gmra.mxu1 %v749_v43  ;;  %v572_v43 = vadd.f32 %v2169_v14, %v432_v26  ;;  %v497_v19 = vmul.f32 %v2247_v34, %v357_v5  ;;  %v575_v25 = vadd.f32 %v2263_v40, %v435_v8  ;;  %v437_v26 = vmul.f32 %v2247_v34, %v297_v15  ;;  %v368_v15 = vld [vmem:[%s2141_s11 + $0x2e8] sm:$0xff] }
  0x49   : > { %1964 = vmatprep.mubr.msk.f32.mxu1 %vm838_vm0, %v752_v45  ;;  %v296_v45 = vld [vmem:[%s2141_s11 + $0xa8] sm:$0xff]  ;;  %v639_v51 = vadd.f32 %v2263_v40, %v499_v36  ;;  %v501_v52 = vmul.f32 %v2247_v34, %v361_v41  ;;  %v504_v55 = vmul.f32 %v2166_v13, %v364_v2  ;;  %v503_v5 = vmul.f32 %v2247_v34, %v363_v56  ;;  %v307_v36 = vld [vmem:[%s2141_s11 + $0x100] sm:$0xff]  ;;  %v369_v2 = vld [vmem:[%s2141_s11 + $0x2f0] sm:$0xff] }
  0x4a   : > { %1106 = vmatmul.mubr.f32.gmra.mxu0 %v687_v32  ;;  %v758_v32 = vmax.f32 %v630_v17, 0.0  ;;  %v700_v57 = vmax.f32 %v572_v43, 0.0  ;;  %v436_v59 = vmul.f32 %v2166_v13, %v296_v45  ;;  %v761_v17 = vmax.f32 %v633_v63, 0.0 }
  0x4b   : > { %1933 = vmatprep.mubr.msk.f32.mxu0 %vm838_vm0, %v690_v37  ;;  %v695_v37 = vmax.f32 %v567_v21, 0.0  ;;  %v638_v21 = vadd.f32 %v2169_v14, %v498_v4  ;;  %v637_v35 = vadd.f32 %v2263_v40, %v497_v19  ;;  %v577_v43 = vadd.f32 %v2263_v40, %v437_v26  ;;  %v305_v19 = vld [vmem:[%s2141_s11 + $0xf0] sm:$0xff] }
  0x4c   : > { %1266 = vmatmul.mubr.f32.gmra.mxu1 %v751_v58  ;;  %v574_v58 = vadd.f32 %v2169_v14, %v434_v44  ;;  %v439_v44 = vmul.f32 %v2247_v34, %v299_v31  ;;  %v641_v4 = vadd.f32 %v2263_v40, %v501_v52  ;;  %v506_v8 = vmul.f32 %v2166_v13, %v366_v60  ;;  %v370_v31 = vld [vmem:[%s2141_s11 + $0x2f8] sm:$0xff]  ;;  %v309_v52 = vld [vmem:[%s2141_s11 + $0x110] sm:$0xff]  ;;  %v371_v60 = vld [vmem:[%s2141_s11 + $0x300] sm:$0xff] }
  0x4d   : > { %1965 = vmatprep.mubr.msk.f32.mxu1 %vm838_vm0, %v754_v61  ;;  %v298_v61 = vld [vmem:[%s2141_s11 + $0xb8] sm:$0xff]  ;;  %v505_v23 = vmul.f32 %v2247_v34, %v365_v9  ;;  %v508_v26 = vmul.f32 %v2166_v13, %v368_v15  ;;  %v507_v41 = vmul.f32 %v2247_v34, %v367_v27  ;;  %v509_v56 = vmul.f32 %v2247_v34, %v369_v2  ;;  %v373_v15 = vld [vmem:[%s2141_s11 + $0x310] sm:$0xff] }
  0x4e   : > { %1111 = vmatmul.mubr.f32.gmra.mxu0 %v689_v49  ;;  %v760_v49 = vmax.f32 %v632_v33, 0.0  ;;  %v702_v10 = vmax.f32 %v574_v58, 0.0  ;;  %v438_v12 = vmul.f32 %v2166_v13, %v298_v61  ;;  %v763_v33 = vmax.f32 %v635_v18, 0.0 }
  0x4f   : > { %1934 = vmatprep.mubr.msk.f32.mxu0 %vm838_vm0, %v692_v53  ;;  %v697_v53 = vmax.f32 %v569_v38, 0.0  ;;  %v640_v38 = vadd.f32 %v2169_v14, %v500_v22  ;;  %v579_v58 = vadd.f32 %v2263_v40, %v439_v44  ;;  %v643_v22 = vadd.f32 %v2263_v40, %v503_v5  ;;  %v311_v5 = vld [vmem:[%s2141_s11 + $0x120] sm:$0xff] }
  0x50   : > { %1271 = vmatmul.mubr.f32.gmra.mxu1 %v753_v11  ;;  %v576_v11 = vadd.f32 %v2169_v14, %v436_v59  ;;  %v441_v59 = vmul.f32 %v2247_v34, %v301_v48  ;;  %v510_v44 = vmul.f32 %v2166_v13, %v370_v31  ;;  %v372_v48 = vld [vmem:[%s2141_s11 + $0x308] sm:$0xff]  ;;  %v511_v9 = vmul.f32 %v2247_v34, %v371_v60  ;;  %v375_v31 = vld [vmem:[%s2141_s11 + $0x320] sm:$0xff] }
  0x51   : > { %1966 = vmatprep.mubr.msk.f32.mxu1 %vm838_vm0, %v756_v16  ;;  %v300_v16 = vld [vmem:[%s2141_s11 + $0xc8] sm:$0xff]  ;;  %v513_v27 = vmul.f32 %v2247_v34, %v373_v15  ;;  %v515_v2 = vmul.f32 %v2247_v34, %v375_v31 }
  0x52   : > { %1116 = vmatmul.mubr.f32.gmra.mxu0 %v691_v1  ;;  %v762_v1 = vmax.f32 %v634_v50, 0.0  ;;  %v704_v28 = vmax.f32 %v576_v11, 0.0  ;;  %v440_v30 = vmul.f32 %v2166_v13, %v300_v16  ;;  %v765_v50 = vmax.f32 %v637_v35, 0.0 }
  0x53   : > { %1935 = vmatprep.mubr.msk.f32.mxu0 %vm838_vm0, %v694_v6  ;;  %v699_v6 = vmax.f32 %v571_v54, 0.0  ;;  %v642_v54 = vadd.f32 %v2169_v14, %v502_v39  ;;  %v581_v11 = vadd.f32 %v2263_v40, %v441_v59  ;;  %v645_v39 = vadd.f32 %v2263_v40, %v505_v23  ;;  %v313_v23 = vld [vmem:[%s2141_s11 + $0x130] sm:$0xff] }
  0x54   : > { %1276 = vmatmul.mubr.f32.gmra.mxu1 %v755_v29  ;;  %v578_v29 = vadd.f32 %v2169_v14, %v438_v12  ;;  %v443_v12 = vmul.f32 %v2247_v34, %v303_v0  ;;  %v512_v59 = vmul.f32 %v2166_v13, %v372_v48  ;;  %v374_v0 = vld [vmem:[%s2141_s11 + $0x318] sm:$0xff]  ;;  %v377_v48 = vld [vmem:[%s2141_s11 + $0x330] sm:$0xff] }
  0x55   : > { %1967 = vmatprep.mubr.msk.f32.mxu1 %vm838_vm0, %v758_v32  ;;  %v302_v32 = vld [vmem:[%s2141_s11 + $0xd8] sm:$0xff]  ;;  %v517_v60 = vmul.f32 %v2247_v34, %v377_v48 }
  0x56   : > { %1121 = vmatmul.mubr.f32.gmra.mxu0 %v693_v20  ;;  %v764_v20 = vmax.f32 %v636_v3, 0.0  ;;  %v706_v45 = vmax.f32 %v578_v29, 0.0  ;;  %v442_v47 = vmul.f32 %v2166_v13, %v302_v32  ;;  %v767_v3 = vmax.f32 %v639_v51, 0.0 }
  0x57   : > { %1936 = vmatprep.mubr.msk.f32.mxu0 %vm838_vm0, %v696_v24  ;;  %v701_v24 = vmax.f32 %v573_v7, 0.0  ;;  %v644_v7 = vadd.f32 %v2169_v14, %v504_v55  ;;  %v583_v29 = vadd.f32 %v2263_v40, %v443_v12  ;;  %v647_v55 = vadd.f32 %v2263_v40, %v507_v41  ;;  %v315_v41 = vld [vmem:[%s2141_s11 + $0x140] sm:$0xff] }
  0x58   : > { %1281 = vmatmul.mubr.f32.gmra.mxu1 %v757_v46  ;;  %v580_v46 = vadd.f32 %v2169_v14, %v440_v30  ;;  %v445_v30 = vmul.f32 %v2247_v34, %v305_v19  ;;  %v514_v12 = vmul.f32 %v2166_v13, %v374_v0  ;;  %v376_v19 = vld [vmem:[%s2141_s11 + $0x328] sm:$0xff]  ;;  %v379_v0 = vld [vmem:[%s2141_s11 + $0x340] sm:$0xff] }
  0x59   : > { %1968 = vmatprep.mubr.msk.f32.mxu1 %vm838_vm0, %v760_v49  ;;  %v304_v49 = vld [vmem:[%s2141_s11 + $0xe8] sm:$0xff]  ;;  %v519_v15 = vmul.f32 %v2247_v34, %v379_v0 }
  0x5a   : > { %1126 = vmatmul.mubr.f32.gmra.mxu0 %v695_v37  ;;  %v766_v37 = vmax.f32 %v638_v21, 0.0  ;;  %v708_v61 = vmax.f32 %v580_v46, 0.0  ;;  %v444_v63 = vmul.f32 %v2166_v13, %v304_v49  ;;  %v769_v21 = vmax.f32 %v641_v4, 0.0 }
  0x5b   : > { %1937 = vmatprep.mubr.msk.f32.mxu0 %vm838_vm0, %v698_v42  ;;  %v703_v42 = vmax.f32 %v575_v25, 0.0  ;;  %v646_v25 = vadd.f32 %v2169_v14, %v506_v8  ;;  %v585_v46 = vadd.f32 %v2263_v40, %v445_v30  ;;  %v649_v8 = vadd.f32 %v2263_v40, %v509_v56  ;;  %v317_v56 = vld [vmem:[%s2141_s11 + $0x150] sm:$0xff] }
  0x5c   : > { %1286 = vmatmul.mubr.f32.gmra.mxu1 %v759_v62  ;;  %v582_v62 = vadd.f32 %v2169_v14, %v442_v47  ;;  %v447_v47 = vmul.f32 %v2247_v34, %v307_v36  ;;  %v516_v30 = vmul.f32 %v2166_v13, %v376_v19  ;;  %v378_v36 = vld [vmem:[%s2141_s11 + $0x338] sm:$0xff]  ;;  %v381_v19 = vld [vmem:[%s2141_s11 + $0x350] sm:$0xff] }
  0x5d   : > { %1969 = vmatprep.mubr.msk.f32.mxu1 %vm838_vm0, %v762_v1  ;;  %v306_v1 = vld [vmem:[%s2141_s11 + $0xf8] sm:$0xff]  ;;  %v521_v31 = vmul.f32 %v2247_v34, %v381_v19 }
  0x5e   : > { %1131 = vmatmul.mubr.f32.gmra.mxu0 %v697_v53  ;;  %v768_v53 = vmax.f32 %v640_v38, 0.0  ;;  %v710_v16 = vmax.f32 %v582_v62, 0.0  ;;  %v446_v18 = vmul.f32 %v2166_v13, %v306_v1  ;;  %v771_v38 = vmax.f32 %v643_v22, 0.0 }
  0x5f   : > { %1938 = vmatprep.mubr.msk.f32.mxu0 %vm838_vm0, %v700_v57  ;;  %v705_v57 = vmax.f32 %v577_v43, 0.0  ;;  %v648_v43 = vadd.f32 %v2169_v14, %v508_v26  ;;  %v587_v62 = vadd.f32 %v2263_v40, %v447_v47  ;;  %v651_v26 = vadd.f32 %v2263_v40, %v511_v9  ;;  %v319_v9 = vld [vmem:[%s2141_s11 + $0x160] sm:$0xff] }
  0x60   : > { %1291 = vmatmul.mubr.f32.gmra.mxu1 %v761_v17  ;;  %v584_v17 = vadd.f32 %v2169_v14, %v444_v63  ;;  %v449_v63 = vmul.f32 %v2247_v34, %v309_v52  ;;  %v518_v47 = vmul.f32 %v2166_v13, %v378_v36  ;;  %v380_v52 = vld [vmem:[%s2141_s11 + $0x348] sm:$0xff]  ;;  %v383_v36 = vld [vmem:[%s2141_s11 + $0x360] sm:$0xff] }
  0x61   : > { %1970 = vmatprep.mubr.msk.f32.mxu1 %vm838_vm0, %v764_v20  ;;  %v308_v20 = vld [vmem:[%s2141_s11 + $0x108] sm:$0xff]  ;;  %v523_v48 = vmul.f32 %v2247_v34, %v383_v36 }
  0x62   : > { %1136 = vmatmul.mubr.f32.gmra.mxu0 %v699_v6  ;;  %v770_v6 = vmax.f32 %v642_v54, 0.0  ;;  %v712_v32 = vmax.f32 %v584_v17, 0.0  ;;  %v448_v35 = vmul.f32 %v2166_v13, %v308_v20  ;;  %v773_v54 = vmax.f32 %v645_v39, 0.0 }
  0x63   : > { %1939 = vmatprep.mubr.msk.f32.mxu0 %vm838_vm0, %v702_v10  ;;  %v707_v10 = vmax.f32 %v579_v58, 0.0  ;;  %v650_v58 = vadd.f32 %v2169_v14, %v510_v44  ;;  %v589_v17 = vadd.f32 %v2263_v40, %v449_v63  ;;  %v653_v44 = vadd.f32 %v2263_v40, %v513_v27  ;;  %v321_v27 = vld [vmem:[%s2141_s11 + $0x170] sm:$0xff] }
  0x64   : > { %1296 = vmatmul.mubr.f32.gmra.mxu1 %v763_v33  ;;  %v586_v33 = vadd.f32 %v2169_v14, %v446_v18  ;;  %v451_v18 = vmul.f32 %v2247_v34, %v311_v5  ;;  %v520_v63 = vmul.f32 %v2166_v13, %v380_v52  ;;  %v382_v5 = vld [vmem:[%s2141_s11 + $0x358] sm:$0xff]  ;;  %v385_v52 = vld [vmem:[%s2141_s11 + $0x370] sm:$0xff] }
  0x65   : > { %1971 = vmatprep.mubr.msk.f32.mxu1 %vm838_vm0, %v766_v37  ;;  %v310_v37 = vld [vmem:[%s2141_s11 + $0x118] sm:$0xff]  ;;  %v525_v0 = vmul.f32 %v2247_v34, %v385_v52 }
  0x66   : > { %1141 = vmatmul.mubr.f32.gmra.mxu0 %v701_v24  ;;  %v772_v24 = vmax.f32 %v644_v7, 0.0  ;;  %v714_v49 = vmax.f32 %v586_v33, 0.0  ;;  %v450_v51 = vmul.f32 %v2166_v13, %v310_v37  ;;  %v775_v7 = vmax.f32 %v647_v55, 0.0 }
  0x67   : > { %1940 = vmatprep.mubr.msk.f32.mxu0 %vm838_vm0, %v704_v28  ;;  %v709_v28 = vmax.f32 %v581_v11, 0.0  ;;  %v652_v11 = vadd.f32 %v2169_v14, %v512_v59  ;;  %v591_v33 = vadd.f32 %v2263_v40, %v451_v18  ;;  %v655_v59 = vadd.f32 %v2263_v40, %v515_v2  ;;  %v323_v2 = vld [vmem:[%s2141_s11 + $0x180] sm:$0xff] }
  0x68   : > { %1301 = vmatmul.mubr.f32.gmra.mxu1 %v765_v50  ;;  %v588_v50 = vadd.f32 %v2169_v14, %v448_v35  ;;  %v453_v35 = vmul.f32 %v2247_v34, %v313_v23  ;;  %v522_v18 = vmul.f32 %v2166_v13, %v382_v5  ;;  %v384_v23 = vld [vmem:[%s2141_s11 + $0x368] sm:$0xff]  ;;  %v387_v5 = vld [vmem:[%s2141_s11 + $0x380] sm:$0xff] }
  0x69   : > { %1972 = vmatprep.mubr.msk.f32.mxu1 %vm838_vm0, %v768_v53  ;;  %v312_v53 = vld [vmem:[%s2141_s11 + $0x128] sm:$0xff]  ;;  %v527_v19 = vmul.f32 %v2247_v34, %v387_v5 }
  0x6a   : > { %1146 = vmatmul.mubr.f32.gmra.mxu0 %v703_v42  ;;  %v774_v42 = vmax.f32 %v646_v25, 0.0  ;;  %v716_v1 = vmax.f32 %v588_v50, 0.0  ;;  %v452_v4 = vmul.f32 %v2166_v13, %v312_v53  ;;  %v777_v25 = vmax.f32 %v649_v8, 0.0 }
  0x6b   : > { %1941 = vmatprep.mubr.msk.f32.mxu0 %vm838_vm0, %v706_v45  ;;  %v711_v45 = vmax.f32 %v583_v29, 0.0  ;;  %v654_v29 = vadd.f32 %v2169_v14, %v514_v12  ;;  %v593_v50 = vadd.f32 %v2263_v40, %v453_v35  ;;  %v657_v12 = vadd.f32 %v2263_v40, %v517_v60  ;;  %v325_v60 = vld [vmem:[%s2141_s11 + $0x190] sm:$0xff] }
  0x6c   : > { %1306 = vmatmul.mubr.f32.gmra.mxu1 %v767_v3  ;;  %v590_v3 = vadd.f32 %v2169_v14, %v450_v51  ;;  %v455_v51 = vmul.f32 %v2247_v34, %v315_v41  ;;  %v524_v35 = vmul.f32 %v2166_v13, %v384_v23  ;;  %v386_v41 = vld [vmem:[%s2141_s11 + $0x378] sm:$0xff]  ;;  %v389_v23 = vld [vmem:[%s2141_s11 + $0x390] sm:$0xff] }
  0x6d   : > { %1973 = vmatprep.mubr.msk.f32.mxu1 %vm838_vm0, %v770_v6  ;;  %v314_v6 = vld [vmem:[%s2141_s11 + $0x138] sm:$0xff]  ;;  %v529_v36 = vmul.f32 %v2247_v34, %v389_v23 }
  0x6e   : > { %1151 = vmatmul.mubr.f32.gmra.mxu0 %v705_v57  ;;  %v776_v57 = vmax.f32 %v648_v43, 0.0  ;;  %v718_v20 = vmax.f32 %v590_v3, 0.0  ;;  %v454_v22 = vmul.f32 %v2166_v13, %v314_v6  ;;  %v779_v43 = vmax.f32 %v651_v26, 0.0 }
  0x6f   : > { %1942 = vmatprep.mubr.msk.f32.mxu0 %vm838_vm0, %v708_v61  ;;  %v713_v61 = vmax.f32 %v585_v46, 0.0  ;;  %v656_v46 = vadd.f32 %v2169_v14, %v516_v30  ;;  %v595_v3 = vadd.f32 %v2263_v40, %v455_v51  ;;  %v659_v30 = vadd.f32 %v2263_v40, %v519_v15  ;;  %v327_v15 = vld [vmem:[%s2141_s11 + $0x1a0] sm:$0xff] }
  0x70   : > { %1311 = vmatmul.mubr.f32.gmra.mxu1 %v769_v21  ;;  %v592_v21 = vadd.f32 %v2169_v14, %v452_v4  ;;  %v457_v4 = vmul.f32 %v2247_v34, %v317_v56  ;;  %v526_v51 = vmul.f32 %v2166_v13, %v386_v41  ;;  %v388_v56 = vld [vmem:[%s2141_s11 + $0x388] sm:$0xff]  ;;  %v391_v41 = vld [vmem:[%s2141_s11 + $0x3a0] sm:$0xff] }
  0x71   : > { %1974 = vmatprep.mubr.msk.f32.mxu1 %vm838_vm0, %v772_v24  ;;  %v316_v24 = vld [vmem:[%s2141_s11 + $0x148] sm:$0xff]  ;;  %v531_v52 = vmul.f32 %v2247_v34, %v391_v41 }
  0x72   : > { %1156 = vmatmul.mubr.f32.gmra.mxu0 %v707_v10  ;;  %v778_v10 = vmax.f32 %v650_v58, 0.0  ;;  %v720_v37 = vmax.f32 %v592_v21, 0.0  ;;  %v456_v39 = vmul.f32 %v2166_v13, %v316_v24  ;;  %v781_v58 = vmax.f32 %v653_v44, 0.0 }
  0x73   : > { %1943 = vmatprep.mubr.msk.f32.mxu0 %vm838_vm0, %v710_v16  ;;  %v715_v16 = vmax.f32 %v587_v62, 0.0  ;;  %v658_v62 = vadd.f32 %v2169_v14, %v518_v47  ;;  %v597_v21 = vadd.f32 %v2263_v40, %v457_v4  ;;  %v661_v47 = vadd.f32 %v2263_v40, %v521_v31  ;;  %v329_v31 = vld [vmem:[%s2141_s11 + $0x1b0] sm:$0xff] }
  0x74   : > { %1316 = vmatmul.mubr.f32.gmra.mxu1 %v771_v38  ;;  %v594_v38 = vadd.f32 %v2169_v14, %v454_v22  ;;  %v459_v22 = vmul.f32 %v2247_v34, %v319_v9  ;;  %v528_v4 = vmul.f32 %v2166_v13, %v388_v56  ;;  %v390_v9 = vld [vmem:[%s2141_s11 + $0x398] sm:$0xff]  ;;  %v393_v56 = vld [vmem:[%s2141_s11 + $0x3b0] sm:$0xff] }
  0x75   : > { %1975 = vmatprep.mubr.msk.f32.mxu1 %vm838_vm0, %v774_v42  ;;  %v318_v42 = vld [vmem:[%s2141_s11 + $0x158] sm:$0xff]  ;;  %v533_v5 = vmul.f32 %v2247_v34, %v393_v56  ;;  %v401_v56 = vld [vmem:[%s2141_s11 + $0x3f0] sm:$0xff] }
  0x76   : > { %1161 = vmatmul.mubr.f32.gmra.mxu0 %v709_v28  ;;  %v780_v28 = vmax.f32 %v652_v11, 0.0  ;;  %v722_v53 = vmax.f32 %v594_v38, 0.0  ;;  %v458_v55 = vmul.f32 %v2166_v13, %v318_v42  ;;  %v783_v11 = vmax.f32 %v655_v59, 0.0 }
  0x77   : > { %1944 = vmatprep.mubr.msk.f32.mxu0 %vm838_vm0, %v712_v32  ;;  %v717_v32 = vmax.f32 %v589_v17, 0.0  ;;  %v660_v17 = vadd.f32 %v2169_v14, %v520_v63  ;;  %v599_v38 = vadd.f32 %v2263_v40, %v459_v22  ;;  %v663_v63 = vadd.f32 %v2263_v40, %v523_v48  ;;  %v331_v48 = vld [vmem:[%s2141_s11 + $0x1c0] sm:$0xff] }
  0x78   : > { %1321 = vmatmul.mubr.f32.gmra.mxu1 %v773_v54  ;;  %v596_v54 = vadd.f32 %v2169_v14, %v456_v39  ;;  %v461_v39 = vmul.f32 %v2247_v34, %v321_v27  ;;  %v530_v22 = vmul.f32 %v2166_v13, %v390_v9  ;;  %v392_v27 = vld [vmem:[%s2141_s11 + $0x3a8] sm:$0xff]  ;;  %v395_v9 = vld [vmem:[%s2141_s11 + $0x3c0] sm:$0xff] }
  0x79   : > { %1976 = vmatprep.mubr.msk.f32.mxu1 %vm838_vm0, %v776_v57  ;;  %v320_v57 = vld [vmem:[%s2141_s11 + $0x168] sm:$0xff]  ;;  %v535_v23 = vmul.f32 %v2247_v34, %v395_v9 }
  0x7a   : > { %1166 = vmatmul.mubr.f32.gmra.mxu0 %v711_v45  ;;  %v782_v45 = vmax.f32 %v654_v29, 0.0  ;;  %v724_v6 = vmax.f32 %v596_v54, 0.0  ;;  %v460_v8 = vmul.f32 %v2166_v13, %v320_v57  ;;  %v785_v29 = vmax.f32 %v657_v12, 0.0 }
  0x7b   : > { %1945 = vmatprep.mubr.msk.f32.mxu0 %vm838_vm0, %v714_v49  ;;  %v719_v49 = vmax.f32 %v591_v33, 0.0  ;;  %v662_v33 = vadd.f32 %v2169_v14, %v522_v18  ;;  %v601_v54 = vadd.f32 %v2263_v40, %v461_v39  ;;  %v665_v18 = vadd.f32 %v2263_v40, %v525_v0  ;;  %v333_v0 = vld [vmem:[%s2141_s11 + $0x1d0] sm:$0xff] }
  0x7c   : > { %1326 = vmatmul.mubr.f32.gmra.mxu1 %v775_v7  ;;  %v598_v7 = vadd.f32 %v2169_v14, %v458_v55  ;;  %v463_v55 = vmul.f32 %v2247_v34, %v323_v2  ;;  %v532_v39 = vmul.f32 %v2166_v13, %v392_v27  ;;  %v394_v2 = vld [vmem:[%s2141_s11 + $0x3b8] sm:$0xff]  ;;  %v397_v27 = vld [vmem:[%s2141_s11 + $0x3d0] sm:$0xff] }
  0x7d   : > { %1977 = vmatprep.mubr.msk.f32.mxu1 %vm838_vm0, %v778_v10  ;;  %v322_v10 = vld [vmem:[%s2141_s11 + $0x178] sm:$0xff] }
  0x7e   : > { %1171 = vmatmul.mubr.f32.gmra.mxu0 %v713_v61  ;;  %v784_v61 = vmax.f32 %v656_v46, 0.0  ;;  %v726_v24 = vmax.f32 %v598_v7, 0.0  ;;  %v462_v26 = vmul.f32 %v2166_v13, %v322_v10  ;;  %v787_v46 = vmax.f32 %v659_v30, 0.0 }
  0x7f   : > { %1946 = vmatprep.mubr.msk.f32.mxu0 %vm838_vm0, %v716_v1  ;;  %v721_v1 = vmax.f32 %v593_v50, 0.0  ;;  %v664_v50 = vadd.f32 %v2169_v14, %v524_v35  ;;  %v603_v7 = vadd.f32 %v2263_v40, %v463_v55  ;;  %v667_v35 = vadd.f32 %v2263_v40, %v527_v19  ;;  %v335_v19 = vld [vmem:[%s2141_s11 + $0x1e0] sm:$0xff] }
  0x80   : > { %1331 = vmatmul.mubr.f32.gmra.mxu1 %v777_v25  ;;  %v600_v25 = vadd.f32 %v2169_v14, %v460_v8  ;;  %v465_v8 = vmul.f32 %v2247_v34, %v325_v60  ;;  %v534_v55 = vmul.f32 %v2166_v13, %v394_v2  ;;  %v396_v60 = vld [vmem:[%s2141_s11 + $0x3c8] sm:$0xff] }
  0x81   : > { %1978 = vmatprep.mubr.msk.f32.mxu1 %vm838_vm0, %v780_v28  ;;  %v324_v28 = vld [vmem:[%s2141_s11 + $0x188] sm:$0xff] }
  0x82   : > { %1176 = vmatmul.mubr.f32.gmra.mxu0 %v715_v16  ;;  %v786_v16 = vmax.f32 %v658_v62, 0.0  ;;  %v728_v42 = vmax.f32 %v600_v25, 0.0  ;;  %v464_v44 = vmul.f32 %v2166_v13, %v324_v28  ;;  %v789_v62 = vmax.f32 %v661_v47, 0.0 }
  0x83   : > { %1947 = vmatprep.mubr.msk.f32.mxu0 %vm838_vm0, %v718_v20  ;;  %v723_v20 = vmax.f32 %v595_v3, 0.0  ;;  %v666_v3 = vadd.f32 %v2169_v14, %v526_v51  ;;  %v605_v25 = vadd.f32 %v2263_v40, %v465_v8  ;;  %v669_v51 = vadd.f32 %v2263_v40, %v529_v36  ;;  %v337_v36 = vld [vmem:[%s2141_s11 + $0x1f0] sm:$0xff] }
  0x84   : > { %1336 = vmatmul.mubr.f32.gmra.mxu1 %v779_v43  ;;  %v602_v43 = vadd.f32 %v2169_v14, %v462_v26  ;;  %v467_v26 = vmul.f32 %v2247_v34, %v327_v15  ;;  %v536_v8 = vmul.f32 %v2166_v13, %v396_v60  ;;  %v398_v15 = vld [vmem:[%s2141_s11 + $0x3d8] sm:$0xff] }
  0x85   : > { %1979 = vmatprep.mubr.msk.f32.mxu1 %vm838_vm0, %v782_v45  ;;  %v326_v45 = vld [vmem:[%s2141_s11 + $0x198] sm:$0xff] }
  0x86   : > { %1181 = vmatmul.mubr.f32.gmra.mxu0 %v717_v32  ;;  %v788_v32 = vmax.f32 %v660_v17, 0.0  ;;  %v730_v57 = vmax.f32 %v602_v43, 0.0  ;;  %v466_v59 = vmul.f32 %v2166_v13, %v326_v45  ;;  %v791_v17 = vmax.f32 %v663_v63, 0.0 }
  0x87   : > { %1948 = vmatprep.mubr.msk.f32.mxu0 %vm838_vm0, %v720_v37  ;;  %v725_v37 = vmax.f32 %v597_v21, 0.0  ;;  %v668_v21 = vadd.f32 %v2169_v14, %v528_v4  ;;  %v607_v43 = vadd.f32 %v2263_v40, %v467_v26  ;;  %v671_v4 = vadd.f32 %v2263_v40, %v531_v52 }
  0x88   : > { %1341 = vmatmul.mubr.f32.gmra.mxu1 %v781_v58  ;;  %v604_v58 = vadd.f32 %v2169_v14, %v464_v44  ;;  %v469_v44 = vmul.f32 %v2247_v34, %v329_v31  ;;  %v538_v26 = vmul.f32 %v2166_v13, %v398_v15  ;;  %v400_v31 = vld [vmem:[%s2141_s11 + $0x3e8] sm:$0xff] }
  0x89   : > { %1980 = vmatprep.mubr.msk.f32.mxu1 %vm838_vm0, %v784_v61  ;;  %v328_v61 = vld [vmem:[%s2141_s11 + $0x1a8] sm:$0xff] }
  0x8a   : > { %1186 = vmatmul.mubr.f32.gmra.mxu0 %v719_v49  ;;  %v790_v49 = vmax.f32 %v662_v33, 0.0  ;;  %v732_v10 = vmax.f32 %v604_v58, 0.0  ;;  %v468_v12 = vmul.f32 %v2166_v13, %v328_v61  ;;  %v793_v33 = vmax.f32 %v665_v18, 0.0 }
  0x8b   : > { %1949 = vmatprep.mubr.msk.f32.mxu0 %vm838_vm0, %v722_v53  ;;  %v727_v53 = vmax.f32 %v599_v38, 0.0  ;;  %v670_v38 = vadd.f32 %v2169_v14, %v530_v22  ;;  %v609_v58 = vadd.f32 %v2263_v40, %v469_v44  ;;  %v673_v22 = vadd.f32 %v2263_v40, %v533_v5  ;;  %v399_v44 = vld [vmem:[%s2141_s11 + $0x3e0] sm:$0xff] }
  0x8c   : > { %1346 = vmatmul.mubr.f32.gmra.mxu1 %v783_v11  ;;  %v606_v11 = vadd.f32 %v2169_v14, %v466_v59  ;;  %v471_v59 = vmul.f32 %v2247_v34, %v331_v48  ;;  %v539_v52 = vmul.f32 %v2247_v34, %v399_v44 }
  0x8d   : > { %1981 = vmatprep.mubr.msk.f32.mxu1 %vm838_vm0, %v786_v16  ;;  %v330_v16 = vld [vmem:[%s2141_s11 + $0x1b8] sm:$0xff] }
  0x8e   : > { %1191 = vmatmul.mubr.f32.gmra.mxu0 %v721_v1  ;;  %v792_v1 = vmax.f32 %v664_v50, 0.0  ;;  %v734_v28 = vmax.f32 %v606_v11, 0.0  ;;  %v470_v30 = vmul.f32 %v2166_v13, %v330_v16  ;;  %v795_v50 = vmax.f32 %v667_v35, 0.0 }
  0x8f   : > { %1950 = vmatprep.mubr.msk.f32.mxu0 %vm838_vm0, %v724_v6  ;;  %v729_v6 = vmax.f32 %v601_v54, 0.0  ;;  %v672_v54 = vadd.f32 %v2169_v14, %v532_v39  ;;  %v611_v11 = vadd.f32 %v2263_v40, %v471_v59  ;;  %v537_v39 = vmul.f32 %v2247_v34, %v397_v27 }
  0x90   : > { %1351 = vmatmul.mubr.f32.gmra.mxu1 %v785_v29  ;;  %v608_v29 = vadd.f32 %v2169_v14, %v468_v12  ;;  %v473_v12 = vmul.f32 %v2247_v34, %v333_v0 }
  0x91   : > { %1982 = vmatprep.mubr.msk.f32.mxu1 %vm838_vm0, %v788_v32  ;;  %v332_v32 = vld [vmem:[%s2141_s11 + $0x1c8] sm:$0xff] }
  0x92   : > { %1196 = vmatmul.mubr.f32.gmra.mxu0 %v723_v20  ;;  %v794_v20 = vmax.f32 %v666_v3, 0.0  ;;  %v736_v45 = vmax.f32 %v608_v29, 0.0  ;;  %v472_v47 = vmul.f32 %v2166_v13, %v332_v32  ;;  %v797_v3 = vmax.f32 %v669_v51, 0.0 }
  0x93   : > { %1951 = vmatprep.mubr.msk.f32.mxu0 %vm838_vm0, %v726_v24  ;;  %v731_v24 = vmax.f32 %v603_v7, 0.0  ;;  %v674_v7 = vadd.f32 %v2169_v14, %v534_v55  ;;  %v613_v29 = vadd.f32 %v2263_v40, %v473_v12  ;;  %v677_v51 = vadd.f32 %v2263_v40, %v537_v39 }
  0x94   : > { %1356 = vmatmul.mubr.f32.gmra.mxu1 %v787_v46  ;;  %v610_v46 = vadd.f32 %v2169_v14, %v470_v30  ;;  %v475_v30 = vmul.f32 %v2247_v34, %v335_v19 }
  0x95   : > { %1983 = vmatprep.mubr.msk.f32.mxu1 %vm838_vm0, %v790_v49  ;;  %v334_v49 = vld [vmem:[%s2141_s11 + $0x1d8] sm:$0xff]  ;;  %v741_v2 = vmax.f32 %v613_v29, 0.0  ;;  %v805_v60 = vmax.f32 %v677_v51, 0.0 }
  0x96   : > { %1201 = vmatmul.mubr.f32.gmra.mxu0 %v725_v37  ;;  %v796_v37 = vmax.f32 %v668_v21, 0.0  ;;  %v738_v61 = vmax.f32 %v610_v46, 0.0  ;;  %v474_v63 = vmul.f32 %v2166_v13, %v334_v49  ;;  %v799_v21 = vmax.f32 %v671_v4, 0.0 }
  0x97   : > { %1952 = vmatprep.mubr.msk.f32.mxu0 %vm838_vm0, %v728_v42  ;;  %v733_v42 = vmax.f32 %v605_v25, 0.0  ;;  %v676_v25 = vadd.f32 %v2169_v14, %v536_v8  ;;  %v477_v46 = vmul.f32 %v2247_v34, %v337_v36 }
  0x98   : > { %1361 = vmatmul.mubr.f32.gmra.mxu1 %v789_v62  ;;  %v612_v62 = vadd.f32 %v2169_v14, %v472_v47  ;;  %v402_v47 = vld [vmem:[%s2141_s11 + $0x3f8] sm:$0xff] }
  0x99   : > { %1984 = vmatprep.mubr.msk.f32.mxu1 %vm838_vm0, %v792_v1  ;;  %v336_v1 = vld [vmem:[%s2141_s11 + $0x1e8] sm:$0xff]  ;;  %v804_v41 = vmax.f32 %v676_v25, 0.0  ;;  %v542_v55 = vmul.f32 %v2166_v13, %v402_v47 }
  0x9a   : > { %1206 = vmatmul.mubr.f32.gmra.mxu0 %v727_v53  ;;  %v798_v53 = vmax.f32 %v670_v38, 0.0  ;;  %v740_v16 = vmax.f32 %v612_v62, 0.0  ;;  %v476_v18 = vmul.f32 %v2166_v13, %v336_v1  ;;  %v675_v38 = vadd.f32 %v2263_v40, %v535_v23 }
  0x9b   : > { %1953 = vmatprep.mubr.msk.f32.mxu0 %vm838_vm0, %v730_v57  ;;  %v735_v57 = vmax.f32 %v607_v43, 0.0  ;;  %v540_v43 = vmul.f32 %v2166_v13, %v400_v31  ;;  %v541_v62 = vmul.f32 %v2247_v34, %v401_v56 }
  0x9c   : > { %1366 = vmatmul.mubr.f32.gmra.mxu1 %v791_v17  ;;  %v614_v17 = vadd.f32 %v2169_v14, %v474_v63 }
  0x9d   : > { %1985 = vmatprep.mubr.msk.f32.mxu1 %vm838_vm0, %v794_v20  ;;  %v338_v20 = vld [vmem:[%s2141_s11 + $0x1f8] sm:$0xff]  ;;  %s1929_s11 = sshll.u32 %s3343_s25, 3 }
  0x9e   : > { %1211 = vmatmul.mubr.f32.gmra.mxu0 %v729_v6  ;;  %v800_v6 = vmax.f32 %v672_v54, 0.0  ;;  %v742_v32 = vmax.f32 %v614_v17, 0.0  ;;  %v478_v35 = vmul.f32 %v2166_v13, %v338_v20  ;;  %v680_v54 = vadd.f32 %v2169_v14, %v540_v43  ;;  %s2736_s27 = scalar_lea.vmem %s3339_s4, %s1929_s11 }
  0x9f   : > { %1954 = vmatprep.mubr.msk.f32.mxu0 %vm838_vm0, %v732_v10  ;;  %v737_v10 = vmax.f32 %v609_v58, 0.0  ;;  %v617_v58 = vadd.f32 %v2263_v40, %v477_v46  ;;  %v682_v13 = vadd.f32 %v2169_v14, %v542_v55 }
  0xa0   : > { %1371 = vmatmul.mubr.f32.gmra.mxu1 %v793_v33  ;;  %v616_v33 = vadd.f32 %v2169_v14, %v476_v18  ;;  %v618_v49 = vadd.f32 %v2169_v14, %v478_v35  ;;  %v808_v63 = vmax.f32 %v680_v54, 0.0 }
  0xa1   : > { %1986 = vmatprep.mubr.msk.f32.mxu1 %vm838_vm0, %v796_v37  ;;  %v801_v37 = vmax.f32 %v673_v22, 0.0  ;;  %v745_v0 = vmax.f32 %v617_v58, 0.0  ;;  %v810_v4 = vmax.f32 %v682_v13, 0.0 }
  0xa2   : > { %1216 = vmatmul.mubr.f32.gmra.mxu0 %v731_v24  ;;  %v802_v24 = vmax.f32 %v674_v7, 0.0  ;;  %v744_v48 = vmax.f32 %v616_v33, 0.0  ;;  %v746_v59 = vmax.f32 %v618_v49, 0.0 }
  0xa3   : > { %1955 = vmatprep.mubr.msk.f32.mxu0 %vm838_vm0, %v734_v28  ;;  %v739_v28 = vmax.f32 %v611_v11, 0.0 }
  0xa4   : > { %1376 = vmatmul.mubr.f32.gmra.mxu1 %v795_v50  ;;  %v803_v50 = vmax.f32 %v675_v38, 0.0 }
  0xa5   : > { %1987 = vmatprep.mubr.msk.f32.mxu1 %vm838_vm0, %v798_v53 }
  0xa6   : > { %1221 = vmatmul.mubr.f32.gmra.mxu0 %v733_v42  ;;  %v678_v42 = vadd.f32 %v2169_v14, %v538_v26 }
  0xa7   : > { %1956 = vmatprep.mubr.msk.f32.mxu0 %vm838_vm0, %v736_v45  ;;  %v615_v45 = vadd.f32 %v2263_v40, %v475_v30 }
  0xa8   : > { %1381 = vmatmul.mubr.f32.gmra.mxu1 %v797_v3  ;;  %v806_v53 = vmax.f32 %v678_v42, 0.0  ;;  %v681_v3 = vadd.f32 %v2263_v40, %v541_v62 }
  0xa9   : > { %1988 = vmatprep.mubr.msk.f32.mxu1 %vm838_vm0, %v800_v6 }
  0xaa   : > { %1226 = vmatmul.mubr.f32.gmra.mxu0 %v735_v57  ;;  %v743_v57 = vmax.f32 %v615_v45, 0.0  ;;  %v809_v34 = vmax.f32 %v681_v3, 0.0 }
  0xab   : > { %1957 = vmatprep.mubr.msk.f32.mxu0 %vm838_vm0, %v738_v61  ;;  %v679_v61 = vadd.f32 %v2263_v40, %v539_v52 }
  0xac   : > { %1386 = vmatmul.mubr.f32.gmra.mxu1 %v799_v21 }
  0xad   : > { %1989 = vmatprep.mubr.msk.f32.mxu1 %vm838_vm0, %v802_v24  ;;  %v807_v1 = vmax.f32 %v679_v61, 0.0 }
  0xae   : > { %1231 = vmatmul.mubr.f32.gmra.mxu0 %v737_v10 }
  0xaf   : > { %1958 = vmatprep.mubr.msk.f32.mxu0 %vm838_vm0, %v740_v16 }
  0xb0   : > { %1391 = vmatmul.mubr.f32.gmra.mxu1 %v801_v37 }
  0xb1   : > { %1990 = vmatprep.mubr.msk.f32.mxu1 %vm838_vm0, %v804_v41 }
  0xb2   : > { %1236 = vmatmul.mubr.f32.gmra.mxu0 %v739_v28 }
  0xb3   : > { %1959 = vmatprep.mubr.msk.f32.mxu0 %vm838_vm0, %v742_v32 }
  0xb4   : > { %1396 = vmatmul.mubr.f32.gmra.mxu1 %v803_v50 }
  0xb5   : > { %1991 = vmatprep.mubr.msk.f32.mxu1 %vm838_vm0, %v806_v53 }
  0xb6   : > { %1241 = vmatmul.mubr.f32.gmra.mxu0 %v741_v2 }
  0xb7   : > { %1960 = vmatprep.mubr.msk.f32.mxu0 %vm838_vm0, %v744_v48 }
  0xb8   : > { %1401 = vmatmul.mubr.f32.gmra.mxu1 %v805_v60 }
  0xb9   : > { %1992 = vmatprep.mubr.msk.f32.mxu1 %vm838_vm0, %v808_v63 }
  0xba   : > { %1246 = vmatmul.mubr.f32.gmra.mxu0 %v743_v57 }
  0xbb   : > { %1961 = vmatprep.mubr.msk.f32.mxu0 %vm838_vm0, %v746_v59 }
  0xbc   : > { %1406 = vmatmul.mubr.f32.gmra.mxu1 %v807_v1 }
  0xbd   : > { %1993 = vmatprep.mubr.msk.f32.mxu1 %vm838_vm0, %v810_v4 }
  0xbe   : > { %1251 = vmatmul.mubr.f32.gmra.mxu0 %v745_v0 }
  0xc0   : > { %1411 = vmatmul.mubr.f32.gmra.mxu1 %v809_v34 }
 0x102   : > { %v2738_v14 = vpop.f32.mrf.mxu0 }
 0x103   : > { %1417 = vst.msk [vmem:[%s2736_s27] sm:$0xff] %vm1416_vm1, %v2738_v14  ;;  %v1616_v4 = vmul.f32 %v2738_v14, %v2738_v14 }
 0x104   : > { %v1099_v40 = vpop.f32.mrf.mxu0  ;;  %v2748_v7 = vpop.f32.mrf.mxu1 }
 0x105   : > { %1449 = vst.msk [vmem:[%s2736_s27 + $0x100] sm:$0xff] %vm1416_vm1, %v2748_v7 }
 0x106   : > { %v2743_v5 = vpop.f32.mrf.mxu0  ;;  %v1259_v9 = vpop.f32.mrf.mxu1 }
 0x107   : > { %1418 = vst.msk [vmem:[%s2736_s27 + $0x8] sm:$0xff] %vm1416_vm1, %v2743_v5  ;;  %v1617_v0 = vmul.f32 %v2743_v5, %v2743_v5  ;;  %v1482_v34 = vsel %vm1416_vm1, %v2743_v5, 0.0 }
 0x108   : > { %v1104_v6 = vpop.f32.mrf.mxu0  ;;  %v2758_v11 = vpop.f32.mrf.mxu1 }
 0x109   : > { %1450 = vst.msk [vmem:[%s2736_s27 + $0x108] sm:$0xff] %vm1416_vm1, %v2758_v11 }
 0x10a   : > { %v2753_v8 = vpop.f32.mrf.mxu0  ;;  %v1264_v15 = vpop.f32.mrf.mxu1 }
 0x10b   : > { %1419 = vst.msk [vmem:[%s2736_s27 + $0x10] sm:$0xff] %vm1416_vm1, %v2753_v8  ;;  %v1618_v40 = vmul.f32 %v2753_v8, %v2753_v8  ;;  %v1681_v15 = vsel %vm1416_vm1, %v1617_v0, 0.0 }
 0x10c   : > { %v1109_v10 = vpop.f32.mrf.mxu0  ;;  %v2768_v17 = vpop.f32.mrf.mxu1 }
 0x10d   : > { %1451 = vst.msk [vmem:[%s2736_s27 + $0x110] sm:$0xff] %vm1416_vm1, %v2768_v17  ;;  %v1481_v10 = vsel %vm1416_vm1, %v2738_v14, 0.0  ;;  %v1683_v14 = vsel %vm1416_vm1, %v1618_v40, 0.0 }
 0x10e   : > { %v2763_v12 = vpop.f32.mrf.mxu0  ;;  %v1269_v19 = vpop.f32.mrf.mxu1 }
 0x10f   : > { %1420 = vst.msk [vmem:[%s2736_s27 + $0x18] sm:$0xff] %vm1416_vm1, %v2763_v12  ;;  %v1619_v5 = vmul.f32 %v2763_v12, %v2763_v12  ;;  %v1483_v19 = vadd.f32 %v1482_v34, %v1481_v10 }
 0x110   : > { %v1114_v16 = vpop.f32.mrf.mxu0  ;;  %v2778_v21 = vpop.f32.mrf.mxu1 }
 0x111   : > { %1452 = vst.msk [vmem:[%s2736_s27 + $0x118] sm:$0xff] %vm1416_vm1, %v2778_v21  ;;  %v1484_v16 = vsel %vm1416_vm1, %v2753_v8, 0.0 }
 0x112   : > { %v2773_v18 = vpop.f32.mrf.mxu0  ;;  %v1274_v23 = vpop.f32.mrf.mxu1 }
 0x113   : > { %1421 = vst.msk [vmem:[%s2736_s27 + $0x20] sm:$0xff] %vm1416_vm1, %v2773_v18  ;;  %v1620_v8 = vmul.f32 %v2773_v18, %v2773_v18 }
 0x114   : > { %v1119_v20 = vpop.f32.mrf.mxu0  ;;  %v2788_v25 = vpop.f32.mrf.mxu1 }
 0x115   : > { %1453 = vst.msk [vmem:[%s2736_s27 + $0x120] sm:$0xff] %vm1416_vm1, %v2788_v25 }
 0x116   : > { %v2783_v22 = vpop.f32.mrf.mxu0  ;;  %v1279_v27 = vpop.f32.mrf.mxu1 }
 0x117   : > { %1422 = vst.msk [vmem:[%s2736_s27 + $0x28] sm:$0xff] %vm1416_vm1, %v2783_v22  ;;  %v1486_v27 = vsel %vm1416_vm1, %v2763_v12, 0.0  ;;  %v1621_v12 = vmul.f32 %v2783_v22, %v2783_v22 }
 0x118   : > { %v1124_v24 = vpop.f32.mrf.mxu0  ;;  %v2798_v29 = vpop.f32.mrf.mxu1 }
 0x119   : > { %1454 = vst.msk [vmem:[%s2736_s27 + $0x128] sm:$0xff] %vm1416_vm1, %v2798_v29  ;;  %v1680_v24 = vsel %vm1416_vm1, %v1616_v4, 0.0 }
 0x11a   : > { %v2793_v26 = vpop.f32.mrf.mxu0  ;;  %v1284_v31 = vpop.f32.mrf.mxu1 }
 0x11b   : > { %1423 = vst.msk [vmem:[%s2736_s27 + $0x30] sm:$0xff] %vm1416_vm1, %v2793_v26  ;;  %v1485_v31 = vadd.f32 %v1484_v16, %v1483_v19 }
 0x11c   : > { %v1129_v28 = vpop.f32.mrf.mxu0  ;;  %v2808_v33 = vpop.f32.mrf.mxu1 }
 0x11d   : > { %1455 = vst.msk [vmem:[%s2736_s27 + $0x130] sm:$0xff] %vm1416_vm1, %v2808_v33  ;;  %v1682_v28 = vadd.f32 %v1681_v15, %v1680_v24 }
 0x11e   : > { %v2803_v30 = vpop.f32.mrf.mxu0  ;;  %v1289_v36 = vpop.f32.mrf.mxu1 }
 0x11f   : > { %1424 = vst.msk [vmem:[%s2736_s27 + $0x38] sm:$0xff] %vm1416_vm1, %v2803_v30 }
 0x120   : > { %v1134_v32 = vpop.f32.mrf.mxu0  ;;  %v2818_v38 = vpop.f32.mrf.mxu1 }
 0x121   : > { %1456 = vst.msk [vmem:[%s2736_s27 + $0x138] sm:$0xff] %vm1416_vm1, %v2818_v38 }
 0x122   : > { %v2813_v35 = vpop.f32.mrf.mxu0  ;;  %v1294_v41 = vpop.f32.mrf.mxu1 }
 0x123   : > { %1425 = vst.msk [vmem:[%s2736_s27 + $0x40] sm:$0xff] %vm1416_vm1, %v2813_v35  ;;  %v1488_v41 = vsel %vm1416_vm1, %v2773_v18, 0.0  ;;  %v1622_v18 = vmul.f32 %v2793_v26, %v2793_v26 }
 0x124   : > { %v1139_v37 = vpop.f32.mrf.mxu0  ;;  %v2828_v43 = vpop.f32.mrf.mxu1 }
 0x125   : > { %1457 = vst.msk [vmem:[%s2736_s27 + $0x140] sm:$0xff] %vm1416_vm1, %v2828_v43  ;;  %v1685_v37 = vsel %vm1416_vm1, %v1619_v5, 0.0  ;;  %v1691_v40 = vsel %vm1416_vm1, %v1622_v18, 0.0 }
 0x126   : > { %v2823_v39 = vpop.f32.mrf.mxu0  ;;  %v1299_v2 = vpop.f32.mrf.mxu1 }
 0x127   : > { %1426 = vst.msk [vmem:[%s2736_s27 + $0x48] sm:$0xff] %vm1416_vm1, %v2823_v39  ;;  %v1487_v2 = vadd.f32 %v1486_v27, %v1485_v31  ;;  %v1498_v31 = vsel %vm1416_vm1, %v2823_v39, 0.0 }
 0x128   : > { %v1144_v42 = vpop.f32.mrf.mxu0  ;;  %v2838_v46 = vpop.f32.mrf.mxu1 }
 0x129   : > { %1458 = vst.msk [vmem:[%s2736_s27 + $0x148] sm:$0xff] %vm1416_vm1, %v2838_v46  ;;  %v1684_v42 = vadd.f32 %v1683_v14, %v1682_v28 }
 0x12a   : > { %v2833_v44 = vpop.f32.mrf.mxu0  ;;  %v1304_v48 = vpop.f32.mrf.mxu1 }
 0x12b   : > { %1427 = vst.msk [vmem:[%s2736_s27 + $0x50] sm:$0xff] %vm1416_vm1, %v2833_v44 }
 0x12c   : > { %v1149_v45 = vpop.f32.mrf.mxu0  ;;  %v2848_v50 = vpop.f32.mrf.mxu1 }
 0x12d   : > { %1459 = vst.msk [vmem:[%s2736_s27 + $0x150] sm:$0xff] %vm1416_vm1, %v2848_v50 }
 0x12e   : > { %v2843_v47 = vpop.f32.mrf.mxu0  ;;  %v1309_v52 = vpop.f32.mrf.mxu1 }
 0x12f   : > { %1428 = vst.msk [vmem:[%s2736_s27 + $0x58] sm:$0xff] %vm1416_vm1, %v2843_v47  ;;  %v1490_v52 = vsel %vm1416_vm1, %v2783_v22, 0.0  ;;  %v1623_v22 = vmul.f32 %v2803_v30, %v2803_v30 }
 0x130   : > { %v1154_v49 = vpop.f32.mrf.mxu0  ;;  %v2858_v54 = vpop.f32.mrf.mxu1 }
 0x131   : > { %1460 = vst.msk [vmem:[%s2736_s27 + $0x158] sm:$0xff] %vm1416_vm1, %v2858_v54  ;;  %v1687_v49 = vsel %vm1416_vm1, %v1620_v8, 0.0  ;;  %v1693_v19 = vsel %vm1416_vm1, %v1623_v22, 0.0 }
 0x132   : > { %v2853_v51 = vpop.f32.mrf.mxu0  ;;  %v1314_v56 = vpop.f32.mrf.mxu1 }
 0x133   : > { %1429 = vst.msk [vmem:[%s2736_s27 + $0x60] sm:$0xff] %vm1416_vm1, %v2853_v51  ;;  %v1489_v56 = vadd.f32 %v1488_v41, %v1487_v2  ;;  %v1500_v2 = vsel %vm1416_vm1, %v2833_v44, 0.0 }
 0x134   : > { %v1159_v53 = vpop.f32.mrf.mxu0  ;;  %v2868_v58 = vpop.f32.mrf.mxu1 }
 0x135   : > { %1461 = vst.msk [vmem:[%s2736_s27 + $0x160] sm:$0xff] %vm1416_vm1, %v2868_v58  ;;  %v1686_v53 = vadd.f32 %v1685_v37, %v1684_v42 }
 0x136   : > { %v2863_v55 = vpop.f32.mrf.mxu0  ;;  %v1319_v60 = vpop.f32.mrf.mxu1 }
 0x137   : > { %1430 = vst.msk [vmem:[%s2736_s27 + $0x68] sm:$0xff] %vm1416_vm1, %v2863_v55  ;;  %v1688_v0 = vadd.f32 %v1687_v49, %v1686_v53 }
 0x138   : > { %v1164_v57 = vpop.f32.mrf.mxu0  ;;  %v2878_v62 = vpop.f32.mrf.mxu1 }
 0x139   : > { %1462 = vst.msk [vmem:[%s2736_s27 + $0x168] sm:$0xff] %vm1416_vm1, %v2878_v62 }
 0x13a   : > { %v2873_v59 = vpop.f32.mrf.mxu0  ;;  %v1324_v13 = vpop.f32.mrf.mxu1 }
 0x13b   : > { %1431 = vst.msk [vmem:[%s2736_s27 + $0x70] sm:$0xff] %vm1416_vm1, %v2873_v59  ;;  %v1492_v13 = vsel %vm1416_vm1, %v2793_v26, 0.0  ;;  %v1624_v26 = vmul.f32 %v2813_v35, %v2813_v35 }
 0x13c   : > { %v1169_v61 = vpop.f32.mrf.mxu0  ;;  %v2890_v3 = vpop.f32.mrf.mxu1 }
 0x13d   : > { %1463 = vst.msk [vmem:[%s2736_s27 + $0x170] sm:$0xff] %vm1416_vm1, %v2890_v3  ;;  %v1689_v61 = vsel %vm1416_vm1, %v1621_v12, 0.0  ;;  %v1695_v28 = vsel %vm1416_vm1, %v1624_v26, 0.0 }
 0x13e   : > { %v2883_v63 = vpop.f32.mrf.mxu0  ;;  %v1329_v9 = vpop.f32.mrf.mxu1  ;;  %v1690_v10 = vadd.f32 %v1689_v61, %v1688_v0 }
 0x13f   : > { %1432 = vst.msk [vmem:[%s2736_s27 + $0x78] sm:$0xff] %vm1416_vm1, %v2883_v63  ;;  %v1494_v9 = vsel %vm1416_vm1, %v2803_v30, 0.0  ;;  %v1625_v30 = vmul.f32 %v2823_v39, %v2823_v39  ;;  %v1627_v39 = vmul.f32 %v2843_v47, %v2843_v47 }
 0x140   : > { %v1174_v1 = vpop.f32.mrf.mxu0  ;;  %v2913_v23 = vpop.f32.mrf.mxu1  ;;  %v1692_v24 = vadd.f32 %v1691_v40, %v1690_v10 }
 0x141   : > { %1464 = vst.msk [vmem:[%s2736_s27 + $0x178] sm:$0xff] %vm1416_vm1, %v2913_v23  ;;  %v1491_v1 = vadd.f32 %v1490_v52, %v1489_v56  ;;  %v1697_v42 = vsel %vm1416_vm1, %v1625_v30, 0.0  ;;  %v1502_v56 = vsel %vm1416_vm1, %v2843_v47, 0.0  ;;  %v1701_v0 = vsel %vm1416_vm1, %v1627_v39, 0.0 }
 0x142   : > { %v2901_v6 = vpop.f32.mrf.mxu0  ;;  %v1334_v36 = vpop.f32.mrf.mxu1  ;;  %v1629_v47 = vmul.f32 %v2863_v55, %v2863_v55 }
 0x143   : > { %1433 = vst.msk [vmem:[%s2736_s27 + $0x80] sm:$0xff] %vm1416_vm1, %v2901_v6  ;;  %v1493_v15 = vadd.f32 %v1492_v13, %v1491_v1  ;;  %v1694_v36 = vadd.f32 %v1693_v19, %v1692_v24  ;;  %v1504_v1 = vsel %vm1416_vm1, %v2853_v51, 0.0 }
 0x144   : > { %v1179_v20 = vpop.f32.mrf.mxu0  ;;  %v2934_v48 = vpop.f32.mrf.mxu1  ;;  %v1705_v24 = vsel %vm1416_vm1, %v1629_v47, 0.0 }
 0x145   : > { %1465 = vst.msk [vmem:[%s2736_s27 + $0x180] sm:$0xff] %vm1416_vm1, %v2934_v48  ;;  %v1496_v20 = vsel %vm1416_vm1, %v2813_v35, 0.0  ;;  %v1495_v14 = vadd.f32 %v1494_v9, %v1493_v15  ;;  %v1626_v35 = vmul.f32 %v2833_v44, %v2833_v44  ;;  %v1628_v44 = vmul.f32 %v2853_v51, %v2853_v51 }
 0x146   : > { %v2924_v32 = vpop.f32.mrf.mxu0  ;;  %v1339_v60 = vpop.f32.mrf.mxu1  ;;  %v1506_v15 = vsel %vm1416_vm1, %v2863_v55, 0.0  ;;  %v1630_v51 = vmul.f32 %v2873_v59, %v2873_v59  ;;  %v1631_v55 = vmul.f32 %v2883_v63, %v2883_v63 }
 0x147   : > { %1434 = vst.msk [vmem:[%s2736_s27 + $0x88] sm:$0xff] %vm1416_vm1, %v2924_v32  ;;  %v1497_v37 = vadd.f32 %v1496_v20, %v1495_v14  ;;  %v1699_v53 = vsel %vm1416_vm1, %v1626_v35, 0.0  ;;  %v1703_v10 = vsel %vm1416_vm1, %v1628_v44, 0.0  ;;  %v1508_v14 = vsel %vm1416_vm1, %v2873_v59, 0.0 }
 0x148   : > { %v1184_v45 = vpop.f32.mrf.mxu0  ;;  %v2954_v34 = vpop.f32.mrf.mxu1  ;;  %v1632_v59 = vmul.f32 %v2901_v6, %v2901_v6 }
 0x149   : > { %1466 = vst.msk [vmem:[%s2736_s27 + $0x188] sm:$0xff] %vm1416_vm1, %v2954_v34  ;;  %v1696_v45 = vadd.f32 %v1695_v28, %v1694_v36  ;;  %v1499_v49 = vadd.f32 %v1498_v31, %v1497_v37  ;;  %v1707_v36 = vsel %vm1416_vm1, %v1630_v51, 0.0  ;;  %v1510_v37 = vsel %vm1416_vm1, %v2883_v63, 0.0 }
 0x14a   : > { %v2944_v57 = vpop.f32.mrf.mxu0  ;;  %v1344_v5 = vpop.f32.mrf.mxu1 }
 0x14b   : > { %1435 = vst.msk [vmem:[%s2736_s27 + $0x90] sm:$0xff] %vm1416_vm1, %v2944_v57  ;;  %v1698_v60 = vadd.f32 %v1697_v42, %v1696_v45  ;;  %v1501_v61 = vadd.f32 %v1500_v2, %v1499_v49  ;;  %v1709_v45 = vsel %vm1416_vm1, %v1631_v55, 0.0  ;;  %v1512_v49 = vsel %vm1416_vm1, %v2901_v6, 0.0 }
 0x14c   : > { %v1189_v4 = vpop.f32.mrf.mxu0  ;;  %v2974_v8 = vpop.f32.mrf.mxu1 }
 0x14d   : > { %1467 = vst.msk [vmem:[%s2736_s27 + $0x190] sm:$0xff] %vm1416_vm1, %v2974_v8  ;;  %v1700_v4 = vadd.f32 %v1699_v53, %v1698_v60  ;;  %v1503_v40 = vadd.f32 %v1502_v56, %v1501_v61  ;;  %v1711_v60 = vsel %vm1416_vm1, %v1632_v59, 0.0  ;;  %v1514_v61 = vsel %vm1416_vm1, %v2924_v32, 0.0 }
 0x14e   : > { %v2964_v16 = vpop.f32.mrf.mxu0  ;;  %v1349_v12 = vpop.f32.mrf.mxu1 }
 0x14f   : > { %1436 = vst.msk [vmem:[%s2736_s27 + $0x98] sm:$0xff] %vm1416_vm1, %v2964_v16  ;;  %v1702_v5 = vadd.f32 %v1701_v0, %v1700_v4  ;;  %v1505_v19 = vadd.f32 %v1504_v1, %v1503_v40  ;;  %v1516_v40 = vsel %vm1416_vm1, %v2944_v57, 0.0 }
 0x150   : > { %v1194_v27 = vpop.f32.mrf.mxu0  ;;  %v2994_v18 = vpop.f32.mrf.mxu1 }
 0x151   : > { %1468 = vst.msk [vmem:[%s2736_s27 + $0x198] sm:$0xff] %vm1416_vm1, %v2994_v18  ;;  %v1704_v27 = vadd.f32 %v1703_v10, %v1702_v5  ;;  %v1507_v28 = vadd.f32 %v1506_v15, %v1505_v19  ;;  %v1518_v19 = vsel %vm1416_vm1, %v2964_v16, 0.0 }
 0x152   : > { %v2984_v41 = vpop.f32.mrf.mxu0  ;;  %v1354_v22 = vpop.f32.mrf.mxu1 }
 0x153   : > { %1437 = vst.msk [vmem:[%s2736_s27 + $0xa0] sm:$0xff] %vm1416_vm1, %v2984_v41  ;;  %v1706_v12 = vadd.f32 %v1705_v24, %v1704_v27  ;;  %v1509_v42 = vadd.f32 %v1508_v14, %v1507_v28  ;;  %v1634_v22 = vmul.f32 %v2944_v57, %v2944_v57  ;;  %v1520_v28 = vsel %vm1416_vm1, %v2984_v41, 0.0 }
 0x154   : > { %v1199_v52 = vpop.f32.mrf.mxu0  ;;  %v3014_v26 = vpop.f32.mrf.mxu1 }
 0x155   : > { %1469 = vst.msk [vmem:[%s2736_s27 + $0x1a0] sm:$0xff] %vm1416_vm1, %v3014_v26  ;;  %v1633_v52 = vmul.f32 %v2924_v32, %v2924_v32  ;;  %v1708_v63 = vadd.f32 %v1707_v36, %v1706_v12  ;;  %v1511_v53 = vadd.f32 %v1510_v37, %v1509_v42  ;;  %v1715_v5 = vsel %vm1416_vm1, %v1634_v22, 0.0 }
 0x156   : > { %v3004_v13 = vpop.f32.mrf.mxu0  ;;  %v1359_v30 = vpop.f32.mrf.mxu1 }
 0x157   : > { %1438 = vst.msk [vmem:[%s2736_s27 + $0xa8] sm:$0xff] %vm1416_vm1, %v3004_v13  ;;  %v1710_v6 = vadd.f32 %v1709_v45, %v1708_v63  ;;  %v1513_v0 = vadd.f32 %v1512_v49, %v1511_v53  ;;  %v1713_v4 = vsel %vm1416_vm1, %v1633_v52, 0.0  ;;  %v1636_v30 = vmul.f32 %v2984_v41, %v2984_v41 }
 0x158   : > { %v1204_v9 = vpop.f32.mrf.mxu0  ;;  %v3034_v35 = vpop.f32.mrf.mxu1  ;;  %v1522_v42 = vsel %vm1416_vm1, %v3004_v13, 0.0 }
 0x159   : > { %1470 = vst.msk [vmem:[%s2736_s27 + $0x1a8] sm:$0xff] %vm1416_vm1, %v3034_v35  ;;  %v1635_v9 = vmul.f32 %v2964_v16, %v2964_v16  ;;  %v1712_v32 = vadd.f32 %v1711_v60, %v1710_v6  ;;  %v1515_v10 = vadd.f32 %v1514_v61, %v1513_v0  ;;  %v1719_v12 = vsel %vm1416_vm1, %v1636_v30, 0.0 }
 0x15a   : > { %v3024_v20 = vpop.f32.mrf.mxu0  ;;  %v1364_v39 = vpop.f32.mrf.mxu1 }
 0x15b   : > { %1439 = vst.msk [vmem:[%s2736_s27 + $0xb0] sm:$0xff] %vm1416_vm1, %v3024_v20  ;;  %v1714_v57 = vadd.f32 %v1713_v4, %v1712_v32  ;;  %v1517_v24 = vadd.f32 %v1516_v40, %v1515_v10  ;;  %v1717_v27 = vsel %vm1416_vm1, %v1635_v9, 0.0  ;;  %v1638_v39 = vmul.f32 %v3024_v20, %v3024_v20 }
 0x15c   : > { %v1209_v31 = vpop.f32.mrf.mxu0  ;;  %v3051_v44 = vpop.f32.mrf.mxu1  ;;  %v1524_v53 = vsel %vm1416_vm1, %v3024_v20, 0.0 }
 0x15d   : > { %1471 = vst.msk [vmem:[%s2736_s27 + $0x1b0] sm:$0xff] %vm1416_vm1, %v3051_v44  ;;  %v1637_v31 = vmul.f32 %v3004_v13, %v3004_v13  ;;  %v1716_v16 = vadd.f32 %v1715_v5, %v1714_v57  ;;  %v1519_v36 = vadd.f32 %v1518_v19, %v1517_v24  ;;  %v1723_v6 = vsel %vm1416_vm1, %v1638_v39, 0.0 }
 0x15e   : > { %v1212_v2 = vpop.f32.mrf.mxu0  ;;  %v1369_v47 = vpop.f32.mrf.mxu1 }
 0x15f   : > { %1440 = vst.msk [vmem:[%s2736_s27 + $0xb8] sm:$0xff] %vm1416_vm1, %v1212_v2  ;;  %v1718_v41 = vadd.f32 %v1717_v27, %v1716_v16  ;;  %v1521_v45 = vadd.f32 %v1520_v28, %v1519_v36  ;;  %v1721_v63 = vsel %vm1416_vm1, %v1637_v31, 0.0  ;;  %v1526_v0 = vsel %vm1416_vm1, %v1212_v2, 0.0 }
 0x160   : > { %v1214_v56 = vpop.f32.mrf.mxu0  ;;  %v3068_v51 = vpop.f32.mrf.mxu1 }
 0x161   : > { %1472 = vst.msk [vmem:[%s2736_s27 + $0x1b8] sm:$0xff] %vm1416_vm1, %v3068_v51  ;;  %v1639_v56 = vmul.f32 %v1212_v2, %v1212_v2  ;;  %v1720_v13 = vadd.f32 %v1719_v12, %v1718_v41  ;;  %v1523_v60 = vadd.f32 %v1522_v42, %v1521_v45 }
 0x162   : > { %v1217_v1 = vpop.f32.mrf.mxu0  ;;  %v1374_v55 = vpop.f32.mrf.mxu1 }
 0x163   : > { %1441 = vst.msk [vmem:[%s2736_s27 + $0xc0] sm:$0xff] %vm1416_vm1, %v1217_v1  ;;  %v1640_v47 = vmul.f32 %v1217_v1, %v1217_v1  ;;  %v1722_v4 = vadd.f32 %v1721_v63, %v1720_v13  ;;  %v1525_v20 = vadd.f32 %v1524_v53, %v1523_v60  ;;  %v1725_v32 = vsel %vm1416_vm1, %v1639_v56, 0.0 }
 0x164   : > { %v1219_v15 = vpop.f32.mrf.mxu0  ;;  %v3085_v59 = vpop.f32.mrf.mxu1  ;;  %v1528_v10 = vsel %vm1416_vm1, %v1217_v1, 0.0 }
 0x165   : > { %1473 = vst.msk [vmem:[%s2736_s27 + $0x1c0] sm:$0xff] %vm1416_vm1, %v3085_v59  ;;  %v1724_v5 = vadd.f32 %v1723_v6, %v1722_v4  ;;  %v1527_v19 = vadd.f32 %v1526_v0, %v1525_v20  ;;  %v1727_v57 = vsel %vm1416_vm1, %v1640_v47, 0.0 }
 0x166   : > { %v1222_v14 = vpop.f32.mrf.mxu0  ;;  %v1379_v52 = vpop.f32.mrf.mxu1 }
 0x167   : > { %1442 = vst.msk [vmem:[%s2736_s27 + $0xc8] sm:$0xff] %vm1416_vm1, %v1222_v14  ;;  %v1641_v15 = vmul.f32 %v1222_v14, %v1222_v14  ;;  %v1530_v24 = vsel %vm1416_vm1, %v1222_v14, 0.0  ;;  %v1726_v27 = vadd.f32 %v1725_v32, %v1724_v5  ;;  %v1529_v1 = vadd.f32 %v1528_v10, %v1527_v19 }
 0x168   : > { %v1224_v37 = vpop.f32.mrf.mxu0  ;;  %v3100_v22 = vpop.f32.mrf.mxu1 }
 0x169   : > { %1474 = vst.msk [vmem:[%s2736_s27 + $0x1c8] sm:$0xff] %vm1416_vm1, %v3100_v22  ;;  %v1729_v16 = vsel %vm1416_vm1, %v1641_v15, 0.0  ;;  %v1728_v12 = vadd.f32 %v1727_v57, %v1726_v27  ;;  %v1531_v42 = vadd.f32 %v1530_v24, %v1529_v1 }
 0x16a   : > { %v1227_v49 = vpop.f32.mrf.mxu0  ;;  %v1384_v9 = vpop.f32.mrf.mxu1 }
 0x16b   : > { %1443 = vst.msk [vmem:[%s2736_s27 + $0xd0] sm:$0xff] %vm1416_vm1, %v1227_v49  ;;  %v1642_v55 = vmul.f32 %v1227_v49, %v1227_v49  ;;  %v1532_v36 = vsel %vm1416_vm1, %v1227_v49, 0.0  ;;  %v1730_v63 = vadd.f32 %v1729_v16, %v1728_v12 }
 0x16c   : > { %v1229_v61 = vpop.f32.mrf.mxu0  ;;  %v3111_v30 = vpop.f32.mrf.mxu1  ;;  %v1533_v49 = vadd.f32 %v1532_v36, %v1531_v42 }
 0x16d   : > { %1475 = vst.msk [vmem:[%s2736_s27 + $0x1d0] sm:$0xff] %vm1416_vm1, %v3111_v30  ;;  %v1731_v41 = vsel %vm1416_vm1, %v1642_v55, 0.0 }
 0x16e   : > { %v1232_v40 = vpop.f32.mrf.mxu0  ;;  %v1389_v31 = vpop.f32.mrf.mxu1  ;;  %v1732_v6 = vadd.f32 %v1731_v41, %v1730_v63  ;;  %v1544_v63 = vsel %vm1416_vm1, %v2748_v7, 0.0 }
 0x16f   : > { %1444 = vst.msk [vmem:[%s2736_s27 + $0xd8] sm:$0xff] %vm1416_vm1, %v1232_v40  ;;  %v1643_v37 = vmul.f32 %v1232_v40, %v1232_v40  ;;  %v1534_v45 = vsel %vm1416_vm1, %v1232_v40, 0.0 }
 0x170   : > { %v1234_v2 = vpop.f32.mrf.mxu0  ;;  %v3122_v39 = vpop.f32.mrf.mxu1  ;;  %v1535_v0 = vadd.f32 %v1534_v45, %v1533_v49  ;;  %v1649_v49 = vmul.f32 %v2758_v11, %v2758_v11 }
 0x171   : > { %1476 = vst.msk [vmem:[%s2736_s27 + $0x1d8] sm:$0xff] %vm1416_vm1, %v3122_v39  ;;  %v1733_v13 = vsel %vm1416_vm1, %v1643_v37, 0.0  ;;  %v1648_v37 = vmul.f32 %v2748_v7, %v2748_v7  ;;  %v1650_v7 = vmul.f32 %v2768_v17, %v2768_v17 }
 0x172   : > { %v1237_v28 = vpop.f32.mrf.mxu0  ;;  %v1394_v56 = vpop.f32.mrf.mxu1  ;;  %v1734_v9 = vadd.f32 %v1733_v13, %v1732_v6  ;;  %v1546_v6 = vsel %vm1416_vm1, %v2758_v11, 0.0 }
 0x173   : > { %1445 = vst.msk [vmem:[%s2736_s27 + $0xe0] sm:$0xff] %vm1416_vm1, %v1237_v28  ;;  %v1644_v52 = vmul.f32 %v1237_v28, %v1237_v28  ;;  %v1536_v60 = vsel %vm1416_vm1, %v1237_v28, 0.0 }
 0x174   : > { %v1239_v14 = vpop.f32.mrf.mxu0  ;;  %v3133_v4 = vpop.f32.mrf.mxu1  ;;  %v1537_v32 = vadd.f32 %v1536_v60, %v1535_v0 }
 0x175   : > { %v1735_v20 = vsel %vm1416_vm1, %v1644_v52, 0.0  ;;  %1477 = vst.msk [vmem:[%s2736_s27 + $0x1e0] sm:$0xff] %vm1416_vm1, %v3133_v4 }
 0x176   : > { %v1242_v53 = vpop.f32.mrf.mxu0  ;;  %v1399_v15 = vpop.f32.mrf.mxu1  ;;  %v1736_v57 = vadd.f32 %v1735_v20, %v1734_v9  ;;  %v1548_v9 = vsel %vm1416_vm1, %v2768_v17, 0.0 }
 0x177   : > { %1446 = vst.msk [vmem:[%s2736_s27 + $0xe8] sm:$0xff] %vm1416_vm1, %v1242_v53  ;;  %v1645_v61 = vmul.f32 %v1242_v53, %v1242_v53  ;;  %v1538_v40 = vsel %vm1416_vm1, %v1242_v53, 0.0 }
 0x178   : > { %v1244_v47 = vpop.f32.mrf.mxu0  ;;  %v1539_v24 = vadd.f32 %v1538_v40, %v1537_v32  ;;  %v3144_v27 = vpop.f32.mrf.mxu1  ;;  %v1745_v40 = vsel %vm1416_vm1, %v1649_v49, 0.0  ;;  %v1651_v32 = vmul.f32 %v2778_v21, %v2778_v21  ;;  %v1656_v49 = vmul.f32 %v2828_v43, %v2828_v43 }
 0x179   : > { %v1737_v5 = vsel %vm1416_vm1, %v1645_v61, 0.0  ;;  %1478 = vst.msk [vmem:[%s2736_s27 + $0x1e8] sm:$0xff] %vm1416_vm1, %v3144_v27  ;;  %v1743_v61 = vsel %vm1416_vm1, %v1648_v37, 0.0 }
 0x17a   : > { %v1247_v10 = vpop.f32.mrf.mxu0  ;;  %v1738_v28 = vadd.f32 %v1737_v5, %v1736_v57  ;;  %v1404_v36 = vpop.f32.mrf.mxu1  ;;  %v1747_v5 = vsel %vm1416_vm1, %v1650_v7, 0.0  ;;  %v1749_v17 = vsel %vm1416_vm1, %v1651_v32, 0.0  ;;  %v1759_v7 = vsel %vm1416_vm1, %v1656_v49, 0.0 }
 0x17b   : > { %1447 = vst.msk [vmem:[%s2736_s27 + $0xf0] sm:$0xff] %vm1416_vm1, %v1247_v10  ;;  %v1540_v19 = vsel %vm1416_vm1, %v1247_v10, 0.0  ;;  %v1646_v2 = vmul.f32 %v1247_v10, %v1247_v10  ;;  %v1654_v36 = vmul.f32 %v2808_v33, %v2808_v33  ;;  %v1659_v32 = vmul.f32 %v2858_v54, %v2858_v54 }
 0x17c   : > { %v1249_v55 = vpop.f32.mrf.mxu0  ;;  %v1541_v31 = vadd.f32 %v1540_v19, %v1539_v24  ;;  %v3155_v52 = vpop.f32.mrf.mxu1  ;;  %v1550_v19 = vsel %vm1416_vm1, %v2778_v21, 0.0  ;;  %v1554_v21 = vsel %vm1416_vm1, %v2798_v29, 0.0 }
 0x17d   : > { %v1739_v1 = vsel %vm1416_vm1, %v1646_v2, 0.0  ;;  %1479 = vst.msk [vmem:[%s2736_s27 + $0x1f0] sm:$0xff] %vm1416_vm1, %v3155_v52  ;;  %v1652_v2 = vmul.f32 %v2788_v25, %v2788_v25  ;;  %v1552_v55 = vsel %vm1416_vm1, %v2788_v25, 0.0  ;;  %v1556_v25 = vsel %vm1416_vm1, %v2808_v33, 0.0 }
 0x17e   : > { %v1252_v16 = vpop.f32.mrf.mxu0  ;;  %v1740_v14 = vadd.f32 %v1739_v1, %v1738_v28  ;;  %v1409_v60 = vpop.f32.mrf.mxu1  ;;  %v1653_v1 = vmul.f32 %v2798_v29, %v2798_v29  ;;  %v1558_v29 = vsel %vm1416_vm1, %v2818_v38, 0.0  ;;  %v1560_v33 = vsel %vm1416_vm1, %v2828_v43, 0.0 }
 0x17f   : > { %1448 = vst.msk [vmem:[%s2736_s27 + $0xf8] sm:$0xff] %vm1416_vm1, %v1252_v16  ;;  %v1542_v12 = vsel %vm1416_vm1, %v1252_v16, 0.0  ;;  %v1647_v42 = vmul.f32 %v1252_v16, %v1252_v16  ;;  %v1751_v16 = vsel %vm1416_vm1, %v1652_v2, 0.0  ;;  %v1657_v60 = vmul.f32 %v2838_v46, %v2838_v46 }
 0x180   : > { %v1543_v41 = vadd.f32 %v1542_v12, %v1541_v31  ;;  %v1254_v45 = vpop.f32.mrf.mxu0  ;;  %v3170_v20 = vpop.f32.mrf.mxu1  ;;  %v1564_v43 = vsel %vm1416_vm1, %v2848_v50, 0.0 }
 0x181   : > { %v1741_v53 = vsel %vm1416_vm1, %v1647_v42, 0.0  ;;  %1480 = vst.msk [vmem:[%s2736_s27 + $0x1f8] sm:$0xff] %vm1416_vm1, %v3170_v20  ;;  %v1753_v42 = vsel %vm1416_vm1, %v1653_v1, 0.0 }
 0x182   : > { %v1545_v56 = vadd.f32 %v1544_v63, %v1543_v41  ;;  %v1742_v13 = vadd.f32 %v1741_v53, %v1740_v14  ;;  %v1414_v15 = vpop.f32.mrf.mxu1  ;;  %v1655_v14 = vmul.f32 %v2818_v38, %v2818_v38  ;;  %v1755_v63 = vsel %vm1416_vm1, %v1654_v36, 0.0 }
 0x183   : > { %v1562_v38 = vsel %vm1416_vm1, %v2838_v46, 0.0  ;;  %v1566_v46 = vsel %vm1416_vm1, %v2858_v54, 0.0  ;;  %v1570_v54 = vsel %vm1416_vm1, %v2878_v62, 0.0  ;;  %v1663_v36 = vmul.f32 %v2913_v23, %v2913_v23 }
 0x184   : > { %v1547_v0 = vadd.f32 %v1546_v6, %v1545_v56  ;;  %v1744_v47 = vadd.f32 %v1743_v61, %v1742_v13  ;;  %v1757_v13 = vsel %vm1416_vm1, %v1655_v14, 0.0 }
 0x186   : > { %v1549_v10 = vadd.f32 %v1548_v9, %v1547_v0  ;;  %v1746_v11 = vadd.f32 %v1745_v40, %v1744_v47  ;;  %v1658_v0 = vmul.f32 %v2848_v50, %v2848_v50  ;;  %v1761_v9 = vsel %vm1416_vm1, %v1657_v60, 0.0 }
 0x187   : > { %v1568_v50 = vsel %vm1416_vm1, %v2868_v58, 0.0 }
 0x188   : > { %v1551_v57 = vadd.f32 %v1550_v19, %v1549_v10  ;;  %v1748_v24 = vadd.f32 %v1747_v5, %v1746_v11  ;;  %v1763_v15 = vsel %vm1416_vm1, %v1658_v0, 0.0  ;;  %v1660_v5 = vmul.f32 %v2868_v58, %v2868_v58 }
 0x189   : > { %v1572_v58 = vsel %vm1416_vm1, %v2890_v3, 0.0  ;;  %v1668_v0 = vmul.f32 %v3014_v26, %v3014_v26 }
 0x18a   : > { %v1553_v28 = vadd.f32 %v1552_v55, %v1551_v57  ;;  %v1750_v31 = vadd.f32 %v1749_v17, %v1748_v24  ;;  %v1765_v57 = vsel %vm1416_vm1, %v1659_v32, 0.0  ;;  %v1661_v24 = vmul.f32 %v2878_v62, %v2878_v62 }
 0x18b   : > { %v1767_v1 = vsel %vm1416_vm1, %v1660_v5, 0.0  ;;  %v1574_v62 = vsel %vm1416_vm1, %v2913_v23, 0.0  ;;  %v1578_v23 = vsel %vm1416_vm1, %v2954_v34, 0.0 }
 0x18c   : > { %v1555_v37 = vadd.f32 %v1554_v21, %v1553_v28  ;;  %v1752_v12 = vadd.f32 %v1751_v16, %v1750_v31  ;;  %v1662_v28 = vmul.f32 %v2890_v3, %v2890_v3  ;;  %v1769_v21 = vsel %vm1416_vm1, %v1661_v24, 0.0 }
 0x18d   : > { %v1576_v3 = vsel %vm1416_vm1, %v2934_v48, 0.0 }
 0x18e   : > { %v1557_v41 = vadd.f32 %v1556_v25, %v1555_v37  ;;  %v1754_v45 = vadd.f32 %v1753_v42, %v1752_v12  ;;  %v1771_v42 = vsel %vm1416_vm1, %v1662_v28, 0.0  ;;  %v1664_v25 = vmul.f32 %v2934_v48, %v2934_v48 }
 0x18f   : > { %v1580_v48 = vsel %vm1416_vm1, %v2974_v8, 0.0  ;;  %v1673_v28 = vmul.f32 %v3100_v22, %v3100_v22 }
 0x190   : > { %v1559_v53 = vadd.f32 %v1558_v29, %v1557_v41  ;;  %v1756_v56 = vadd.f32 %v1755_v63, %v1754_v45  ;;  %v1773_v45 = vsel %vm1416_vm1, %v1663_v36, 0.0  ;;  %v1665_v63 = vmul.f32 %v2954_v34, %v2954_v34 }
 0x191   : > { %v1582_v34 = vsel %vm1416_vm1, %v2994_v18, 0.0 }
 0x192   : > { %v1758_v61 = vadd.f32 %v1757_v13, %v1756_v56  ;;  %v1561_v6 = vadd.f32 %v1560_v33, %v1559_v53  ;;  %v1775_v53 = vsel %vm1416_vm1, %v1664_v25, 0.0  ;;  %v1666_v56 = vmul.f32 %v2974_v8, %v2974_v8 }
 0x193   : > { %v1777_v60 = vsel %vm1416_vm1, %v1665_v63, 0.0  ;;  %v1584_v8 = vsel %vm1416_vm1, %v3014_v26, 0.0  ;;  %v1588_v26 = vsel %vm1416_vm1, %v3051_v44, 0.0 }
 0x194   : > { %v1563_v47 = vadd.f32 %v1562_v38, %v1561_v6  ;;  %v1760_v40 = vadd.f32 %v1759_v7, %v1758_v61  ;;  %v1667_v61 = vmul.f32 %v2994_v18, %v2994_v18  ;;  %v1779_v38 = vsel %vm1416_vm1, %v1666_v56, 0.0 }
 0x195   : > { %v1586_v18 = vsel %vm1416_vm1, %v3034_v35, 0.0  ;;  %v1678_v56 = vmul.f32 %v3155_v52, %v3155_v52 }
 0x196   : > { %v1565_v10 = vadd.f32 %v1564_v43, %v1563_v47  ;;  %v1762_v11 = vadd.f32 %v1761_v9, %v1760_v40  ;;  %v1781_v9 = vsel %vm1416_vm1, %v1667_v61, 0.0  ;;  %v1669_v43 = vmul.f32 %v3034_v35, %v3034_v35 }
 0x197   : > { %v1590_v35 = vsel %vm1416_vm1, %v3068_v51, 0.0  ;;  %v1606_v61 = vsel %vm1416_vm1, %v3170_v20, 0.0 }
 0x198   : > { %v1567_v19 = vadd.f32 %v1566_v46, %v1565_v10  ;;  %v1764_v2 = vadd.f32 %v1763_v15, %v1762_v11  ;;  %v1783_v11 = vsel %vm1416_vm1, %v1668_v0, 0.0  ;;  %v1670_v15 = vmul.f32 %v3051_v44, %v3051_v44 }
 0x199   : > { %v1592_v44 = vsel %vm1416_vm1, %v3085_v59, 0.0 }
 0x19a   : > { %v1569_v17 = vadd.f32 %v1568_v50, %v1567_v19  ;;  %v1766_v55 = vadd.f32 %v1765_v57, %v1764_v2  ;;  %v1785_v19 = vsel %vm1416_vm1, %v1669_v43, 0.0  ;;  %v1671_v2 = vmul.f32 %v3068_v51, %v3068_v51 }
 0x19b   : > { %v1787_v24 = vsel %vm1416_vm1, %v1670_v15, 0.0  ;;  %v1594_v51 = vsel %vm1416_vm1, %v3100_v22, 0.0  ;;  %v1598_v22 = vsel %vm1416_vm1, %v3122_v39, 0.0 }
 0x19c   : > { %v1571_v31 = vadd.f32 %v1570_v54, %v1569_v17  ;;  %v1768_v16 = vadd.f32 %v1767_v1, %v1766_v55  ;;  %v1672_v17 = vmul.f32 %v3085_v59, %v3085_v59  ;;  %v1789_v54 = vsel %vm1416_vm1, %v1671_v2, 0.0 }
 0x19d   : > { %v1596_v59 = vsel %vm1416_vm1, %v3111_v30, 0.0 }
 0x19e   : > { %v1573_v37 = vadd.f32 %v1572_v58, %v1571_v31  ;;  %v1770_v12 = vadd.f32 %v1769_v21, %v1768_v16  ;;  %v1791_v21 = vsel %vm1416_vm1, %v1672_v17, 0.0  ;;  %v1674_v58 = vmul.f32 %v3111_v30, %v3111_v30 }
 0x19f   : > { %v1600_v30 = vsel %vm1416_vm1, %v3133_v4, 0.0 }
 0x1a0   : > { %v1575_v14 = vadd.f32 %v1574_v62, %v1573_v37  ;;  %v1772_v41 = vadd.f32 %v1771_v42, %v1770_v12  ;;  %v1793_v12 = vsel %vm1416_vm1, %v1673_v28, 0.0  ;;  %v1675_v42 = vmul.f32 %v3122_v39, %v3122_v39 }
 0x1a1   : > { %v1602_v39 = vsel %vm1416_vm1, %v3144_v27, 0.0 }
 0x1a2   : > { %v1577_v29 = vadd.f32 %v1576_v3, %v1575_v14  ;;  %v1774_v49 = vadd.f32 %v1773_v45, %v1772_v41  ;;  %v1795_v14 = vsel %vm1416_vm1, %v1674_v58, 0.0  ;;  %v1676_v41 = vmul.f32 %v3133_v4, %v3133_v4 }
 0x1a3   : > { %v1797_v63 = vsel %vm1416_vm1, %v1675_v42, 0.0 }
 0x1a4   : > { %v1776_v13 = vadd.f32 %v1775_v53, %v1774_v49  ;;  %v1579_v33 = vadd.f32 %v1578_v23, %v1577_v29  ;;  %v1677_v29 = vmul.f32 %v3144_v27, %v3144_v27  ;;  %v1799_v23 = vsel %vm1416_vm1, %v1676_v41, 0.0 }
 0x1a6   : > { %v1778_v6 = vadd.f32 %v1777_v60, %v1776_v13  ;;  %v1581_v7 = vadd.f32 %v1580_v48, %v1579_v33  ;;  %v1679_v13 = vmul.f32 %v3170_v20, %v3170_v20  ;;  %v1801_v4 = vsel %vm1416_vm1, %v1677_v29, 0.0 }
 0x1a7   : > { %v1604_v48 = vsel %vm1416_vm1, %v3155_v52, 0.0 }
 0x1a8   : > { %v1780_v47 = vadd.f32 %v1779_v38, %v1778_v6  ;;  %v1583_v40 = vadd.f32 %v1582_v34, %v1581_v7  ;;  %v1803_v7 = vsel %vm1416_vm1, %v1678_v56, 0.0  ;;  %v1805_v38 = vsel %vm1416_vm1, %v1679_v13, 0.0 }
 0x1aa   : > { %v1782_v32 = vadd.f32 %v1781_v9, %v1780_v47  ;;  %v1585_v10 = vadd.f32 %v1584_v8, %v1583_v40 }
 0x1ac   : > { %v1784_v46 = vadd.f32 %v1783_v11, %v1782_v32  ;;  %v1587_v5 = vadd.f32 %v1586_v18, %v1585_v10 }
 0x1ae   : > { %v1786_v57 = vadd.f32 %v1785_v19, %v1784_v46  ;;  %v1589_v50 = vadd.f32 %v1588_v26, %v1587_v5 }
 0x1b0   : > { %v1788_v55 = vadd.f32 %v1787_v24, %v1786_v57  ;;  %v1591_v1 = vadd.f32 %v1590_v35, %v1589_v50 }
 0x1b2   : > { %v1790_v31 = vadd.f32 %v1789_v54, %v1788_v55  ;;  %v1593_v16 = vadd.f32 %v1592_v44, %v1591_v1 }
 0x1b4   : > { %v1792_v36 = vadd.f32 %v1791_v21, %v1790_v31  ;;  %v1595_v37 = vadd.f32 %v1594_v51, %v1593_v16 }
 0x1b6   : > { %v1794_v62 = vadd.f32 %v1793_v12, %v1792_v36  ;;  %v1597_v25 = vadd.f32 %v1596_v59, %v1595_v37 }
 0x1b8   : > { %v1796_v45 = vadd.f32 %v1795_v14, %v1794_v62  ;;  %v1599_v3 = vadd.f32 %v1598_v22, %v1597_v25 }
 0x1ba   : > { %v1798_v49 = vadd.f32 %v1797_v63, %v1796_v45  ;;  %v1601_v53 = vadd.f32 %v1600_v30, %v1599_v3 }
 0x1bc   : > { %v1800_v33 = vadd.f32 %v1799_v23, %v1798_v49  ;;  %v1603_v60 = vadd.f32 %v1602_v39, %v1601_v53 }
 0x1be   : > { %v1802_v6 = vadd.f32 %v1801_v4, %v1800_v33  ;;  %v1605_v27 = vadd.f32 %v1604_v48, %v1603_v60 }
 0x1c0   : > { %v1804_v34 = vadd.f32 %v1803_v7, %v1802_v6  ;;  %v1607_v0 = vadd.f32 %v1606_v61, %v1605_v27 }
 0x1c2   : > { %v1608_v47 = vrot.slane %v1607_v0, 4  ;;  %v1806_v40 = vadd.f32 %v1805_v38, %v1804_v34 }
 0x1c4   : > { %v1609_v9 = vadd.f32 %v1608_v47, %v1607_v0  ;;  %v1807_v8 = vrot.slane %v1806_v40, 4 }
 0x1c6   : > { %v1610_v43 = vrot.slane %v1609_v9, 2  ;;  %v1808_v32 = vadd.f32 %v1807_v8, %v1806_v40 }
 0x1c8   : > { %v1611_v52 = vadd.f32 %v1610_v43, %v1609_v9  ;;  %v1809_v10 = vrot.slane %v1808_v32, 2 }
 0x1ca   : > { %v1612_v11 = vrot.slane %v1611_v52, 1  ;;  %v1810_v20 = vadd.f32 %v1809_v10, %v1808_v32 }
 0x1cc   : > { %v1613_v18 = vadd.f32 %v1612_v11, %v1611_v52  ;;  %v1811_v15 = vrot.slane %v1810_v20, 1 }
 0x1ce   : > { %1615 = vst.msk [vmem:[%s271_s29] sm:$0x1] %vm1614_vm2, %v1613_v18  ;;  %v1812_v46 = vadd.f32 %v1811_v15, %v1810_v20 }
 0x1d0   : > { %1813 = vst.msk [vmem:[%s274_s8] sm:$0x1] %vm1614_vm2, %v1812_v46 }
 0x1d1 PF: > { %s17_s21 = sadd.s32 1, %s2066_s21  }
 0x1d2   : > { %p14_p5 = scmp.ge.s32.totalorder %s17_s21, 4  }
 0x1d4   :  { %16 = sbr.rel (!%p14_p5) target bundleno = 1 (0x1), region = 90 }

// kernel: double_conv.5
= control target key start
LH: loop header
LB: loop body
LE: loop exit
PB: predicated region body
PF: predicated region fallthrough
CT: control target
= control target key end

     0   :  { %s148_s0 = inlined_call_operand.vmem [shape: f32[64,128], index: 0, kind: input, shape index: {}]   ;;  %s149_s1 = inlined_call_operand.vmem [shape: f32[1,128], index: 1, kind: input, shape index: {}]   ;;  %s150_s2 = inlined_call_operand.vmem [shape: f32[1,128], index: 2, kind: input, shape index: {}]   ;;  %s151_s3 = inlined_call_operand.vmem [shape: f32[64,128], index: 3, kind: output, shape index: {}]  }
   0x1   :  { %v14_v0 = vld [vmem:[%s148_s0] sm:$0xff]  ;;  %v15_v4 = vld [vmem:[%s148_s0 + $0x8] sm:$0xff]  ;;  %v16_v5 = vld [vmem:[%s148_s0 + $0x10] sm:$0xff] }
   0x2   :  { %v72_v1 = vld [vmem:[%s149_s1] ss:$0 sm:$0xff]  ;;  %v17_v6 = vld [vmem:[%s148_s0 + $0x18] sm:$0xff]  ;;  %v19_v11 = vld [vmem:[%s148_s0 + $0x28] sm:$0xff] }
   0x3   :  { %v73_v2 = vld [vmem:[%s150_s2] ss:$0 sm:$0xff]  ;;  %v29_v3 = vmul.f32 %v72_v1, %v14_v0  ;;  %v30_v7 = vmul.f32 %v72_v1, %v15_v4  ;;  %v31_v8 = vmul.f32 %v72_v1, %v16_v5  ;;  %v32_v9 = vmul.f32 %v72_v1, %v17_v6  ;;  %v20_v12 = vld [vmem:[%s148_s0 + $0x30] sm:$0xff]  ;;  %v21_v17 = vld [vmem:[%s148_s0 + $0x38] sm:$0xff] }
   0x4   :  { %v18_v10 = vld [vmem:[%s148_s0 + $0x20] sm:$0xff]  ;;  %v34_v15 = vmul.f32 %v72_v1, %v19_v11  ;;  %v35_v16 = vmul.f32 %v72_v1, %v20_v12  ;;  %v36_v21 = vmul.f32 %v72_v1, %v21_v17 }
   0x5   :  { %v44_v13 = vadd.f32 %v73_v2, %v29_v3  ;;  %v33_v14 = vmul.f32 %v72_v1, %v18_v10  ;;  %v45_v18 = vadd.f32 %v73_v2, %v30_v7  ;;  %v46_v19 = vadd.f32 %v73_v2, %v31_v8 }
   0x6   :  { %v47_v20 = vadd.f32 %v73_v2, %v32_v9  ;;  %v49_v24 = vadd.f32 %v73_v2, %v34_v15  ;;  %v50_v25 = vadd.f32 %v73_v2, %v35_v16  ;;  %v51_v29 = vadd.f32 %v73_v2, %v36_v21 }
   0x7   :  { %v52_v22 = vmax.f32 %v44_v13, 0.0  ;;  %v48_v23 = vadd.f32 %v73_v2, %v33_v14  ;;  %v53_v26 = vmax.f32 %v45_v18, 0.0  ;;  %v54_v27 = vmax.f32 %v46_v19, 0.0 }
   0x8   :  { %v55_v28 = vmax.f32 %v47_v20, 0.0  ;;  %v57_v31 = vmax.f32 %v49_v24, 0.0  ;;  %v58_v32 = vmax.f32 %v50_v25, 0.0  ;;  %v59_v33 = vmax.f32 %v51_v29, 0.0 }
   0x9   :  { %60 = vst [vmem:[%s151_s3] sm:$0xff] %v52_v22  ;;  %v56_v30 = vmax.f32 %v48_v23, 0.0  ;;  %61 = vst [vmem:[%s151_s3 + $0x8] sm:$0xff] %v53_v26 }
   0xa   :  { %62 = vst [vmem:[%s151_s3 + $0x10] sm:$0xff] %v54_v27  ;;  %63 = vst [vmem:[%s151_s3 + $0x18] sm:$0xff] %v55_v28 }
   0xb   :  { %64 = vst [vmem:[%s151_s3 + $0x20] sm:$0xff] %v56_v30  ;;  %65 = vst [vmem:[%s151_s3 + $0x28] sm:$0xff] %v57_v31 }
   0xc   :  { %66 = vst [vmem:[%s151_s3 + $0x30] sm:$0xff] %v58_v32  ;;  %67 = vst [vmem:[%s151_s3 + $0x38] sm:$0xff] %v59_v33 }

</bundles_post_ra>
